<compile_context>
chip_gen: v6e
topology: v6e:2x2x1
jax: 0.10.0
libtpu: 0.0.40
codegen_flags: <defaults>
</compile_context>

<pallas_src>
import math
import functools

import jax
import jax.numpy as jnp
from jax import lax
from jax.experimental import pallas as pl
from jax.experimental.pallas import tpu as pltpu


# --------------------------------------------------------------------------- #
# Helpers
# --------------------------------------------------------------------------- #
def _pick_tile(dim, target, mult):
    """Largest tile <= target that is a multiple of `mult` and divides `dim`.
    Falls back to the full dimension (always a legal block)."""
    if dim <= target:
        return dim
    t = (target // mult) * mult
    while t >= mult:
        if dim % t == 0:
            return t
        t -= mult
    return dim


def _choose_group(num_heads, head_dim):
    """Smallest head-group size G dividing num_heads with G*head_dim % 128 == 0
    (lane-dense blocks).  Returns None if no such G exists."""
    for g in range(1, num_heads + 1):
        if num_heads % g == 0 and (g * head_dim) % 128 == 0:
            return g
    return None


# --------------------------------------------------------------------------- #
# Fused linear projection: y = x @ W + b   (W is the concatenated QKV weight)
# --------------------------------------------------------------------------- #
def _linear_kernel(x_ref, w_ref, b_ref, o_ref, acc_ref):
    k = pl.program_id(2)

    @pl.when(k == 0)
    def _():
        acc_ref[...] = jnp.zeros_like(acc_ref)

    acc_ref[...] += jnp.dot(
        x_ref[...], w_ref[...], preferred_element_type=jnp.float32
    )

    @pl.when(k == pl.num_programs(2) - 1)
    def _():
        o_ref[...] = (acc_ref[...] + b_ref[...].astype(jnp.float32)).astype(o_ref.dtype)


def _linear(x2, w, b, *, tm_target=1024, tn_target=1024, tk_target=512):
    """x2: [rows, K]; w: [K, N]; b: [N] -> [rows, N]."""
    rows, K = x2.shape
    _, N = w.shape
    tm = _pick_tile(rows, tm_target, 8)
    tn = _pick_tile(N, tn_target, 128)
    tk = _pick_tile(K, tk_target, 128)
    grid = (rows // tm, N // tn, K // tk)
    b2 = b.reshape(1, N)

    return pl.pallas_call(
        _linear_kernel,
        out_shape=jax.ShapeDtypeStruct((rows, N), x2.dtype),
        grid_spec=pltpu.PrefetchScalarGridSpec(
            num_scalar_prefetch=0,
            grid=grid,
            in_specs=[
                pl.BlockSpec((tm, tk), lambda i, j, k: (i, k)),
                pl.BlockSpec((tk, tn), lambda i, j, k: (k, j)),
                pl.BlockSpec((1, tn), lambda i, j, k: (0, j)),
            ],
            out_specs=pl.BlockSpec((tm, tn), lambda i, j, k: (i, j)),
            scratch_shapes=[pltpu.VMEM((tm, tn), jnp.float32)],
        ),
        compiler_params=pltpu.CompilerParams(
            dimension_semantics=("parallel", "parallel", "arbitrary"),
            vmem_limit_bytes=32 * 1024 * 1024,
        ),
    )(x2, w, b2)


# --------------------------------------------------------------------------- #
# Fused cross attention: one (batch, head-group, query-tile) per grid step.
#
#   q_ref:     (1, tq, G*Dh)   queries for G heads (head h at cols h*Dh:(h+1)*Dh)
#   k_ref:     (1, Sk, G*Dh)   keys
#   v_ref:     (1, Sk, G*Dh)   values
#   m_ref:     (1, mq, Sk)     multiplicative mask (mq in {1, tq})
#   probs_ref: (1, G, tq, Sk)
#   ctx_ref:   (1, tq, G*Dh)   written straight into the [B, Sq, H] context
# --------------------------------------------------------------------------- #
def _cross_attn_kernel(q_ref, k_ref, v_ref, m_ref, probs_ref, ctx_ref, *, G, Dh, scale):
    q = q_ref[0]                             # (tq, G*Dh), native dtype (bf16/f32)
    k = k_ref[0]                             # (Sk, G*Dh)
    v = v_ref[0]                             # (Sk, G*Dh)
    m = m_ref[0].astype(jnp.float32)         # (mq, Sk)

    qs = q * scale                           # fold softmax scale into Q (cheap dim)

    ctx_parts = []
    for g in range(G):                       # static, fully unrolled
        lo, hi = g * Dh, (g + 1) * Dh
        # scores = Q_g @ K_g^T without materializing a transpose of K.
        s = lax.dot_general(
            qs[:, lo:hi], k[:, lo:hi],
            dimension_numbers=(((1,), (1,)), ((), ())),
            preferred_element_type=jnp.float32,
        )                                    # (tq, Sk) f32
        s = s * m                            # multiplicative mask (module semantics)

        s_max = jnp.max(s, axis=-1, keepdims=True)
        e = jnp.exp(s - s_max)
        denom = jnp.sum(e, axis=-1, keepdims=True)
        p = e * pl.reciprocal(denom, approx=True)   # divide on the EUP slot

        probs_ref[0, g] = p.astype(probs_ref.dtype)
        ctx_parts.append(
            jnp.dot(p.astype(v.dtype), v[:, lo:hi],
                    preferred_element_type=jnp.float32)
        )                                    # (tq, Dh) f32

    ctx = ctx_parts[0] if G == 1 else jnp.concatenate(ctx_parts, axis=-1)
    ctx_ref[0] = ctx.astype(ctx_ref.dtype)   # lane-dense (tq, G*Dh) store


def _cross_attention(qkv_q, qkv_kv, mask, *, num_heads, head_dim, scale,
                     tq_target=512):
    """qkv_q: [B, Sq, 3H] (only the Q slab is read); qkv_kv: [B, Sk, 3H];
    mask: [B, mq, Sk].  Returns (probs [B, Hn, Sq, Sk], ctx [B, Sq, H])."""
    B, Sq, _ = qkv_q.shape
    _, Sk, _ = qkv_kv.shape
    H = num_heads * head_dim
    dtype = qkv_q.dtype
    mq = mask.shape[1]

    G = _choose_group(num_heads, head_dim)
    if G is None:
        # Fallback for tiny head dims: slice Q/K/V out (extra copy) and process
        # all heads in a single group -> block last dim == H (always legal).
        G = num_heads
        GD = H
        NG = 1
        q_in = qkv_q[..., :H]
        k_in = qkv_kv[..., H:2 * H]
        v_in = qkv_kv[..., 2 * H:]
        kv_off = 0
    else:
        GD = G * head_dim
        NG = num_heads // G
        q_in, k_in, v_in = qkv_q, qkv_kv, qkv_kv
        kv_off = NG                          # K slab starts at block index NG, V at 2*NG

    tq = _pick_tile(Sq, tq_target, 8)
    grid = (B, NG, Sq // tq)

    q_spec = pl.BlockSpec((1, tq, GD), lambda b, g, t: (b, t, g))
    k_spec = pl.BlockSpec((1, Sk, GD), lambda b, g, t, _o=kv_off: (b, 0, g + _o))
    v_spec = pl.BlockSpec((1, Sk, GD), lambda b, g, t, _o=kv_off: (b, 0, g + 2 * _o))
    if mq == 1:
        m_spec = pl.BlockSpec((1, 1, Sk), lambda b, g, t: (b, 0, 0))
    else:
        m_spec = pl.BlockSpec((1, tq, Sk), lambda b, g, t: (b, t, 0))

    probs, ctx = pl.pallas_call(
        functools.partial(_cross_attn_kernel, G=G, Dh=head_dim, scale=scale),
        out_shape=(
            jax.ShapeDtypeStruct((B, num_heads, Sq, Sk), dtype),
            jax.ShapeDtypeStruct((B, Sq, H), dtype),
        ),
        grid_spec=pltpu.PrefetchScalarGridSpec(
            num_scalar_prefetch=0,
            grid=grid,
            in_specs=[q_spec, k_spec, v_spec, m_spec],
            out_specs=[
                pl.BlockSpec((1, G, tq, Sk), lambda b, g, t: (b, g, t, 0)),
                pl.BlockSpec((1, tq, GD), lambda b, g, t: (b, t, g)),
            ],
        ),
        compiler_params=pltpu.CompilerParams(
            dimension_semantics=("parallel", "parallel", "arbitrary"),
            vmem_limit_bytes=32 * 1024 * 1024,
        ),
    )(q_in, k_in, v_in, mask)
    return probs, ctx


# --------------------------------------------------------------------------- #
# Full module forward
# --------------------------------------------------------------------------- #
def _prep_mask(mask, B, Sq, Sk, dtype):
    """Standard BERT-style mask (e.g. [B,1,1,Sk]) -> [B, mq, Sk] (no head copy)."""
    m = jnp.asarray(mask, dtype=dtype)
    m = jnp.reshape(m, (1,) * (4 - m.ndim) + m.shape)     # -> 4D [B?,h?,q?,Sk]
    # TODO(synk): per-head masks (head dim > 1) are not supported by this layout.
    assert m.shape[1] == 1, "per-head attention masks not supported"
    mq = Sq if m.shape[2] != 1 else 1
    m = jnp.broadcast_to(m, (B, 1, mq, Sk))
    return m.reshape(B, mq, Sk)


def bert_bi_attention(params, input_tensor1, attention_mask1,
                      input_tensor2, attention_mask2, num_attention_heads):
    B, S1, H = input_tensor1.shape
    _, S2, _ = input_tensor2.shape
    Hn = num_attention_heads
    Dh = H // Hn
    scale = 1.0 / math.sqrt(Dh)
    dtype = input_tensor1.dtype

    # Fused QKV weights: [H, 3H] and [3H].
    w_qkv1 = jnp.concatenate([params["q1_w"], params["k1_w"], params["v1_w"]], axis=1)
    b_qkv1 = jnp.concatenate([params["q1_b"], params["k1_b"], params["v1_b"]], axis=0)
    w_qkv2 = jnp.concatenate([params["q2_w"], params["k2_w"], params["v2_w"]], axis=1)
    b_qkv2 = jnp.concatenate([params["q2_b"], params["k2_b"], params["v2_b"]], axis=0)

    qkv1 = _linear(input_tensor1.reshape(B * S1, H), w_qkv1, b_qkv1).reshape(B, S1, 3 * H)
    qkv2 = _linear(input_tensor2.reshape(B * S2, H), w_qkv2, b_qkv2).reshape(B, S2, 3 * H)

    mask1f = _prep_mask(attention_mask1, B, S2, S1, dtype)   # masks scores1 [.., S2, S1]
    mask2f = _prep_mask(attention_mask2, B, S1, S2, dtype)   # masks scores2 [.., S1, S2]

    # direction 1: query2 attends over (key1, value1)
    probs1, context_layer1 = _cross_attention(
        qkv2, qkv1, mask1f, num_heads=Hn, head_dim=Dh, scale=scale)
    # direction 2: query1 attends over (key2, value2)
    probs2, context_layer2 = _cross_attention(
        qkv1, qkv2, mask2f, num_heads=Hn, head_dim=Dh, scale=scale)
    # TODO(synk): dropout1/dropout2 are inference-mode identity here (no PRNG drop).

    # Head-transposed Q/K layers only for the returned attn_data dict (not on the
    # attention compute path) -- layout matches the PyTorch module.
    def heads(x, S):          # [B, S, H] -> [B, Hn, S, Dh]
        return x.reshape(B, S, Hn, Dh).transpose(0, 2, 1, 3)

    q1 = heads(qkv1[..., :H], S1)
    k1 = heads(qkv1[..., H:2 * H], S1)
    q2 = heads(qkv2[..., :H], S2)
    k2 = heads(qkv2[..., H:2 * H], S2)

    attn_data = {
        "attn2": probs2,
        "queries2": q2,
        "keys1": k1,
        "attn1": probs1,
        "querues1": q1,     # (sic) key name matches the original module
        "keys2": k2,
    }
    return context_layer1, context_layer2, attn_data


# --------------------------------------------------------------------------- #
# Pure-JAX reference (mirrors the PyTorch forward, dropout in eval mode)
# --------------------------------------------------------------------------- #
def _reference(params, x1, m1, x2, m2, Hn):
    B, S1, H = x1.shape
    _, S2, _ = x2.shape
    Dh = H // Hn

    def lin(x, w, b):
        return x @ w + b

    def heads(x):
        b_, s_, _ = x.shape
        return x.reshape(b_, s_, Hn, Dh).transpose(0, 2, 1, 3)

    q1 = heads(lin(x1, params["q1_w"], params["q1_b"]))
    k1 = heads(lin(x1, params["k1_w"], params["k1_b"]))
    v1 = heads(lin(x1, params["v1_w"], params["v1_b"]))
    q2 = heads(lin(x2, params["q2_w"], params["q2_b"]))
    k2 = heads(lin(x2, params["k2_w"], params["k2_b"]))
    v2 = heads(lin(x2, params["v2_w"], params["v2_b"]))

    s1 = jnp.einsum("bhqd,bhkd->bhqk", q2, k1) / math.sqrt(Dh)
    s1 = s1 * m1
    p1 = jax.nn.softmax(s1, axis=-1)
    c1 = jnp.einsum("bhqk,bhkd->bhqd", p1, v1)
    c1 = c1.transpose(0, 2, 1, 3).reshape(B, S2, H)

    s2 = jnp.einsum("bhqd,bhkd->bhqk", q1, k2) / math.sqrt(Dh)
    s2 = s2 * m2
    p2 = jax.nn.softmax(s2, axis=-1)
    c2 = jnp.einsum("bhqk,bhkd->bhqd", p2, v2)
    c2 = c2.transpose(0, 2, 1, 3).reshape(B, S1, H)

    return c1, c2, p1, p2


if __name__ == "__main__":
    # Small shapes using the module's default config (hidden=512, heads=8 -> Dh=64).
    batch, heads, hidden = 2, 8, 512
    seq1, seq2 = 128, 256

    key = jax.random.PRNGKey(0)
    ks = jax.random.split(key, 16)

    x1 = jax.random.normal(ks[0], (batch, seq1, hidden), dtype=jnp.float32)
    x2 = jax.random.normal(ks[1], (batch, seq2, hidden), dtype=jnp.float32)
    # Multiplicative masks (as in the module), standard BERT-style [B, 1, 1, S_kv].
    mask1 = jax.random.bernoulli(ks[2], 0.8, (batch, 1, 1, seq1)).astype(jnp.float32)
    mask2 = jax.random.bernoulli(ks[3], 0.8, (batch, 1, 1, seq2)).astype(jnp.float32)

    def init_w(k):
        return 0.02 * jax.random.normal(k, (hidden, hidden), dtype=jnp.float32)

    def init_b(k):
        return 0.02 * jax.random.normal(k, (hidden,), dtype=jnp.float32)

    params = {
        "q1_w": init_w(ks[4]),  "q1_b": init_b(ks[5]),
        "k1_w": init_w(ks[6]),  "k1_b": init_b(ks[7]),
        "v1_w": init_w(ks[8]),  "v1_b": init_b(ks[9]),
        "q2_w": init_w(ks[10]), "q2_b": init_b(ks[11]),
        "k2_w": init_w(ks[12]), "k2_b": init_b(ks[13]),
        "v2_w": init_w(ks[14]), "v2_b": init_b(ks[15]),
    }

    c1, c2, attn = bert_bi_attention(params, x1, mask1, x2, mask2, heads)
    c1 = jax.block_until_ready(c1)
    c2 = jax.block_until_ready(c2)

    r1, r2, rp1, rp2 = _reference(params, x1, mask1, x2, mask2, heads)

    # Tolerances account for the approximate (EUP) reciprocal in the softmax.
    assert jnp.allclose(c1, r1, atol=2e-3, rtol=2e-3)
    assert jnp.allclose(c2, r2, atol=2e-3, rtol=2e-3)
    assert jnp.allclose(attn["attn1"], rp1, atol=2e-3, rtol=2e-3)
    assert jnp.allclose(attn["attn2"], rp2, atol=2e-3, rtol=2e-3)

    print("KERNEL_OK")
</pallas_src>

<mosaic_0001>
module attributes {stable_mosaic.version = 11 : i64} {
  func.func @_linear_kernel(%arg0: i32, %arg1: i32, %arg2: i32, %arg3: memref<256x512xf32, #tpu.memory_space<vmem>>, %arg4: memref<512x768xf32, #tpu.memory_space<vmem>>, %arg5: memref<1x768xf32, #tpu.memory_space<vmem>>, %arg6: memref<256x768xf32, #tpu.memory_space<vmem>>, %arg7: memref<256x768xf32, #tpu.memory_space<vmem>>) attributes {dimension_semantics = [#tpu.dimension_semantics<parallel>, #tpu.dimension_semantics<parallel>, #tpu.dimension_semantics<arbitrary>], iteration_bounds = array<i64: 1, 2, 1>, scalar_prefetch = 0 : i64, scratch_operands = 1 : i64, tpu.core_type = #tpu.core_type<tc>, window_params = [{transform_indices = @transform_0, window_bounds = array<i64: 256, 512>}, {transform_indices = @transform_1, window_bounds = array<i64: 512, 768>}, {transform_indices = @transform_2, window_bounds = array<i64: 1, 768>}, {transform_indices = @transform_3, window_bounds = array<i64: 256, 768>}]} {
    %c0_i32 = arith.constant 0 : i32
    %0 = arith.cmpi eq, %arg2, %c0_i32 : i32
    %1 = arith.extui %0 : i1 to i32
    %c0_i32_0 = arith.constant 0 : i32
    %2 = arith.cmpi ne, %1, %c0_i32_0 : i32
    scf.if %2 {
      %cst_10 = arith.constant 0.000000e+00 : f32
      %12 = vector.broadcast %cst_10 : f32 to vector<256x768xf32>
      %c0_11 = arith.constant 0 : index
      %c0_12 = arith.constant 0 : index
      %13 = vector.load %arg7[%c0_11, %c0_12] : memref<256x768xf32, #tpu.memory_space<vmem>>, vector<256x768xf32>
      tpu.vector_store %arg7[%c0_11, %c0_12], %12 {strides = array<i32>} : memref<256x768xf32, #tpu.memory_space<vmem>>, vector<256x768xf32>,
    } else {
    }
    %c0 = arith.constant 0 : index
    %c0_1 = arith.constant 0 : index
    %3 = vector.load %arg7[%c0, %c0_1] : memref<256x768xf32, #tpu.memory_space<vmem>>, vector<256x768xf32>
    %c0_2 = arith.constant 0 : index
    %c0_3 = arith.constant 0 : index
    %4 = vector.load %arg3[%c0_2, %c0_3] : memref<256x512xf32, #tpu.memory_space<vmem>>, vector<256x512xf32>
    %c0_4 = arith.constant 0 : index
    %c0_5 = arith.constant 0 : index
    %5 = vector.load %arg4[%c0_4, %c0_5] : memref<512x768xf32, #tpu.memory_space<vmem>>, vector<512x768xf32>
    %cst = arith.constant dense<0.000000e+00> : vector<256x768xf32>
    %6 = tpu.matmul %4, %5, %cst {dimension_numbers = #tpu.dot_dimension_numbers<[1], [0], [0], [1], [0, 0, 1, 1], [], []>} : vector<256x512xf32>, vector<512x768xf32>, vector<256x768xf32> -> vector<256x768xf32>
    %7 = arith.addf %3, %6 : vector<256x768xf32>
    %c0_6 = arith.constant 0 : index
    %c0_7 = arith.constant 0 : index
    %8 = vector.load %arg7[%c0_6, %c0_7] : memref<256x768xf32, #tpu.memory_space<vmem>>, vector<256x768xf32>
    tpu.vector_store %arg7[%c0_6, %c0_7], %7 {strides = array<i32>} : memref<256x768xf32, #tpu.memory_space<vmem>>, vector<256x768xf32>,
    %c0_i32_8 = arith.constant 0 : i32
    %9 = arith.cmpi eq, %arg2, %c0_i32_8 : i32
    %10 = arith.extui %9 : i1 to i32
    %c0_i32_9 = arith.constant 0 : i32
    %11 = arith.cmpi ne, %10, %c0_i32_9 : i32
    scf.if %11 {
      %c0_10 = arith.constant 0 : index
      %c0_11 = arith.constant 0 : index
      %12 = vector.load %arg7[%c0_10, %c0_11] : memref<256x768xf32, #tpu.memory_space<vmem>>, vector<256x768xf32>
      %c0_12 = arith.constant 0 : index
      %c0_13 = arith.constant 0 : index
      %13 = vector.load %arg5[%c0_12, %c0_13] : memref<1x768xf32, #tpu.memory_space<vmem>>, vector<1x768xf32>
      %14 = vector.broadcast %13 : vector<1x768xf32> to vector<256x768xf32>
      %15 = arith.addf %12, %14 : vector<256x768xf32>
      %c0_14 = arith.constant 0 : index
      %c0_15 = arith.constant 0 : index
      %16 = vector.load %arg6[%c0_14, %c0_15] : memref<256x768xf32, #tpu.memory_space<vmem>>, vector<256x768xf32>
      tpu.vector_store %arg6[%c0_14, %c0_15], %15 {strides = array<i32>} : memref<256x768xf32, #tpu.memory_space<vmem>>, vector<256x768xf32>,
    } else {
    }
    return
  }
  func.func @transform_0(%arg0: i32, %arg1: i32, %arg2: i32) -> (i32, i32) {
    %c0_i32 = arith.constant 0 : i32
    return %arg0, %arg2 : i32, i32
  }
  func.func @transform_1(%arg0: i32, %arg1: i32, %arg2: i32) -> (i32, i32) {
    %c0_i32 = arith.constant 0 : i32
    return %arg2, %arg1 : i32, i32
  }
  func.func @transform_2(%arg0: i32, %arg1: i32, %arg2: i32) -> (i32, i32) {
    %c0_i32 = arith.constant 0 : i32
    %c0_i32_0 = arith.constant 0 : i32
    return %c0_i32, %arg1 : i32, i32
  }
  func.func @transform_3(%arg0: i32, %arg1: i32, %arg2: i32) -> (i32, i32) {
    %c0_i32 = arith.constant 0 : i32
    return %arg0, %arg1 : i32, i32
  }
}

</mosaic_0001>

<bundles_post_ra>
// kernel: tpu_custom_call.1
= control target key start
LH: loop header
LB: loop body
LE: loop exit
PB: predicated region body
PF: predicated region fallthrough
CT: control target
= control target key end

     0   :  { %8 = vsyncpa [#allocation4], 0  ;;  %s5789_s0 = inlined_call_operand.hbm [shape: f32[256,512], index: 0, kind: input, shape index: {}]   ;;  %s5790_s1 = inlined_call_operand.hbm [shape: f32[512,1536], index: 1, kind: input, shape index: {}]   ;;  %s5791_s2 = inlined_call_operand.hbm [shape: f32[1,1536], index: 2, kind: input, shape index: {}]   ;;  %s5792_s3 = inlined_call_operand.hbm [shape: f32[256,1536], index: 3, kind: output, shape index: {}]  }
   0x1   :  { %9 = vsyncpa [#allocation7], 0 }
   0x2   :  { %11 = vsyncpa [#allocation7 + $0x1], 0 }
   0x3   :  { %12 = vsyncpa [#allocation5], 0 }
   0x4   :  { %14 = vsyncpa [#allocation5 + $0x1], 0  ;;  %s4311_s12 = smov 0   ;;  %s4313_s13 = smov 0  }
   0x5   :  { %s4315_s14 = smov 0   ;;  %s4317_s15 = smov 0  }
   0x6   :  { %s4319_s16 = smov 0   ;;  %s4321_s17 = smov 0  }
   0x7 LB: > { %s35_s18 = sadd.s32 1, %s4273_s16  ;;  %s76_s19 = sadd.s32 1, %s4265_s14  ;;  %s4277_s17 = sphi %s4321_s17, %s20_s17   ;;  %s4273_s16 = sphi %s4319_s16, %s5932_s16   ;;  %s4269_s15 = sphi %s4317_s15, %s5931_s15   ;;  %s4265_s14 = sphi %s4315_s14, %s5930_s14   ;;  %s4261_s13 = sphi %s4313_s13, %s5929_s13   ;;  %s4257_s12 = sphi %s4311_s12, %s5928_s12  }
   0x8   : > { %p37_p0 = scmp.ge.s32.totalorder %s35_s18, 2  ;;  %p83_p1 = scmp.ne.s32.totalorder %s4265_s14, %s4261_s13 }
   0x9   : > { %p84_p2 = scmp.eq.s32.totalorder %s4277_s17, 0  ;;  %p3912_p5 = scmp.lt.s32.totalorder %s4277_s17, 2 }
   0xa   : > { %s5934_s18 = smov (%p37_p0, %s35_s18), 0  ;;  %s186_s21 = sand.u32 1, %s4277_s17  }
   0xb   : > { %p85_p4 = por %p84_p2, %p83_p1  ;;  %s72_s20 = ssub.s32 %s4273_s16, %s5934_s18 }
   0xc   : > { %p74_p6 = scmp.eq.s32.totalorder %s72_s20, 0  ;;  %s188_s22 = sand.u32 1, %s4265_s14  }
   0xd   : > { %s3878_s23 = smul.u32 768, %s4273_s16  ;;  %p4366_p7 = pnand %p3912_p5, %p85_p4 }
   0xe   : > { %s4359_s24 = scalar_select %p74_p6, %s4265_s14, %s76_s19  }
   0xf   : > { %s3881_s25 = smul.u32 3072, %s188_s22  ;;  %s199_s28 = scalar_lea.hbm %s5790_s1, %s3878_s23 }
  0x10   : > { %s4370_s5 = scalar_lea.sflag [#allocation7], %s186_s21  ;;  %p5794_p8 = pneg %p4366_p7 }
  0x11   : > { %s190_s30 = scalar_lea.vmem [#allocation6], %s3881_s25  ;;  %s4279_s7 = smov [#allocation6]  }
  0x12   : > { %s200_s4 = sshll.u32 %s190_s30, 4  ;;  %s4129_s8 = sshll.u32 %s4279_s7, 4  ;;  %s201_s4 = int_to_ptr.vmem [resolvable:$true] %s200_s4  ;;  %s4130_s8 = int_to_ptr.vmem [resolvable:$false] %s4129_s8 }
  0x13   : > { %s4124_s6 = scalar_lea.vmem %s201_s4, 49152  ;;  %s4131_s9 = scalar_lea.vmem %s4130_s8, 98304 }
  0x14   : > { %p4125_p9 = scmp.ne.s32.totalorder %s201_s4, %s4124_s6  ;;  %p4132_p12 = scmp.lt.s32.totalorder %s201_s4, %s4130_s8 }
  0x15   : > { %p4133_p13 = scmp.lt.s32.totalorder %s4131_s9, %s4124_s6 }
  0x16   : > { %p4127_p10 = pnand %p4125_p9, %p5794_p8 }
  0x17   : > { %p4134_p0 = por %p4133_p13, %p4132_p12 }
  0x18   : > { %p4128_p11 = pneg %p4127_p10 }
  0x1a   : > { %p4135_p2 = pnand %p4134_p0, %p4128_p11 }
  0x1c   : > { %4138 = shalt.err (!%p4135_p2)
}
  0x1d   : > { %s4280_s10 = smov 1536   ;;  %s4281_s11 = smov 768  }
  0x1e   : > { %s4282_s19 = smov 48   ;;  %s4381_s20 = sadd.s32 4294967295, %s4277_s17  }
  0x1f   : > { %3903 = dma.hbm_to_vmem [thread:$0]  (!%p4366_p7), %s199_s28, 49152, %s201_s4, %s4370_s5, %s4280_s10, %s4281_s11, %s4282_s19  }
  0x20   : > { %s3867_s21 = sadd.s32 4294967294, %s4277_s17   ;;  %p89_p4 = scmp.ne.s32.totalorder %s4261_s13, %s4257_s12 }
  0x21   : > { %p5793_p5 = scmp.eq.s32.totalorder %s4381_s20, 0  ;;  %p141_p6 = scmp.eq.s32.totalorder %s4381_s20, 1 }
  0x22   : > { %p147_p9 = scmp.eq.s32.totalorder %s3867_s21, 1  ;;  %p3868_p11 = scmp.ge.s32.totalorder %s4277_s17, 1 }
  0x23   : > { %p4390_p10 = por %p5793_p5, %p89_p4  ;;  %p4398_p12 = por %p141_p6, %p83_p1 }
  0x24   : > { %p4402_p13 = por %p147_p9, %p89_p4  ;;  %p154_p0 = scmp.lt.s32.totalorder %s4277_s17, 3 }
  0x25   : > { %s5838_s25 = scalar_select %p4398_p12, 1, 0 }
  0x26   : > { %s5839_s26 = scalar_select %p4402_p13, 1, 0 }
  0x27   : > { %p4407_p2 = pnand %p3868_p11, %p154_p0  ;;  %s4283_s28 = smov [#allocation3]  }
  0x28   : > { %s172_s30 = sshll.u32 %s4283_s28, 4  ;;  %s3882_s4 = smul.u32 6, %s188_s22  ;;  %s173_s30 = int_to_ptr.vmem [resolvable:$true] %s172_s30 }
  0x29   : > { %p3896_p3 = pneg %p4407_p2  ;;  %s3879_s6 = smul.u32 96, %s4273_s16 }
  0x2a   : > { %s214_s11 = scalar_lea.vmem [#allocation8], %s3882_s4  ;;  %s4150_s21 = scalar_lea.vmem %s173_s30, 16384 }
  0x2b   : > { %p4418_p1 = pnand %p3896_p3, %p5793_p5  ;;  %s4425_s10 = scalar_lea.hbm %s5791_s2, %s3879_s6 }
  0x2c   : > { %s222_s19 = sshll.u32 %s214_s11, 4  ;;  %p4151_p6 = scmp.ne.s32.totalorder %s173_s30, %s4150_s21  ;;  %s223_s19 = int_to_ptr.vmem [resolvable:$true] %s222_s19 }
  0x2d   : > { %p4141_p4 = pneg %p4418_p1  ;;  %p4158_p0 = scmp.lt.s32.totalorder %s173_s30, %s173_s30 }
  0x2e   : > { %p4159_p3 = scmp.lt.s32.totalorder %s4150_s21, %s4150_s21 }
  0x2f   : > { %p4153_p9 = pnand %p4151_p6, %p4141_p4 }
  0x30   : > { %p4160_p5 = por %p4159_p3, %p4158_p0 }
  0x31   : > { %p4154_p11 = pneg %p4153_p9 }
  0x33   : > { %p4161_p8 = pnand %p4160_p5, %p4154_p11 }
  0x35   : > { %4164 = shalt.err (!%p4161_p8)
}
  0x36   : > { %s4284_s22 = smov 512   ;;  %s4285_s28 = smov 32  }
  0x37   : > { %3899 = dma.hbm_to_vmem [thread:$0]  (!%p4418_p1), %s5789_s0, 16384, %s173_s30, [#allocation4], %s4284_s22, %s4284_s22, %s4285_s28  }
  0x38   : > { %s4178_s8 = scalar_lea.vmem %s223_s19, 96  ;;  %p5842_p12 = pneg %p4366_p7 }
  0x39   : > { %p4179_p13 = scmp.ne.s32.totalorder %s223_s19, %s4178_s8  ;;  %s4286_s9 = smov [#allocation8]  }
  0x3a   : > { %s4183_s11 = sshll.u32 %s4286_s9, 4  ;;  %s4184_s11 = int_to_ptr.vmem [resolvable:$false] %s4183_s11 }
  0x3b   : > { %p4181_p4 = pnand %p4179_p13, %p5842_p12  ;;  %s4185_s21 = scalar_lea.vmem %s4184_s11, 192 }
  0x3c   : > { %p4186_p8 = scmp.lt.s32.totalorder %s223_s19, %s4184_s11  ;;  %p4187_p5 = scmp.lt.s32.totalorder %s4185_s21, %s4178_s8 }
  0x3d   : > { %p4182_p6 = pneg %p4181_p4 }
  0x3e   : > { %p4188_p9 = por %p4187_p5, %p4186_p8 }
  0x40   : > { %p4189_p11 = pnand %p4188_p9, %p4182_p6 }
  0x42   : > { %4192 = shalt.err (!%p4189_p11)
}
  0x43   : > { %3906 = dma.hbm_to_vmem [thread:$0]  (!%p4366_p7), %s4425_s10, 96, %s223_s19, %s4370_s5  }
  0x44   : > { %231 = sbr.rel (%p4407_p2) target bundleno = 742 (0x2e6), region = 32 }
  0x49   : > { %p5843_p12 = scmp.eq.s32.totalorder %s4381_s20, 0 }
  0x4b   : > { %4244 = dma.done.wait (%p5843_p12), [#allocation4], 16384   ;;  %p5844_p13 = pmov %p5843_p12 }
  0x4c   : > { %s237_s30 = sand.u32 1, %s4381_s20   ;;  %s4449_s7 = sand.u32 1, %s4261_s13  }
  0x4d   : > { %4246 = vsyncadd (%p5844_p13), [#allocation4], 4294950912  ;;  %s3883_s29 = smul.u32 3072, %s4449_s7  ;;  %s238_s22 = scalar_lea.sflag [#allocation7], %s237_s30 }
  0x4f   : > { %s4452_s28 = scalar_lea.vmem [#allocation6], %s3883_s29 }
  0x50   : > { %4248 = dma.done.wait (%p4390_p10), %s238_s22, 49248  }
  0x51   : > { %4250 = vsyncadd (%p4390_p10), %s238_s22, 4294918048  ;;  %v892_v0 = vld [vmem:[%s4452_s28 + $0x2d8] sm:$0xff]  ;;  %v891_v2 = vld [vmem:[%s4452_s28 + $0x2d0] sm:$0xff]  ;;  %s3884_s5 = smul.u32 6, %s4449_s7  ;;  %s3723_s8 = scalar_lea.sflag [#allocation5], %s4449_s7 }
  0x52   : > { %v1084_v1 = vld [vmem:[%s4452_s28 + $0x8d8] sm:$0xff]  ;;  %1185 = vmatprep.subr.mxu0 %v892_v0  ;;  %v1083_v3 = vld [vmem:[%s4452_s28 + $0x8d0] sm:$0xff]  ;;  %v886_v4 = vld [vmem:[%s4452_s28 + $0x2a8] sm:$0xff]  ;;  %s3885_s23 = smul.u32 1536, %s4449_s7  ;;  %p5925_p10 = scmp.ne.s32.totalorder %s5838_s25, 0 }
  0x53   : > { %1442 = vmatprep.subr.mxu1 %v1084_v1  ;;  %v1078_v5 = vld [vmem:[%s4452_s28 + $0x8a8] sm:$0xff]  ;;  %1186 = vmatpush1.msra.mxu0 %v891_v2  ;;  %v885_v6 = vld [vmem:[%s4452_s28 + $0x2a0] sm:$0xff]  ;;  %v880_v8 = vld [vmem:[%s4452_s28 + $0x278] sm:$0xff]  ;;  %s5108_s20 = scalar_lea.vmem [#allocation8], %s3884_s5  ;;  %s3880_s10 = smul.u32 768, %s4269_s15 }
  0x54   : > { %1443 = vmatpush1.msra.mxu1 %v1083_v3  ;;  %v1077_v7 = vld [vmem:[%s4452_s28 + $0x8a0] sm:$0xff]  ;;  %1187 = vmatprep.subr.mxu0 %v886_v4  ;;  %v1072_v9 = vld [vmem:[%s4452_s28 + $0x878] sm:$0xff]  ;;  %v879_v10 = vld [vmem:[%s4452_s28 + $0x270] sm:$0xff]  ;;  %s5136_s27 = scalar_lea.vmem [#allocation9], %s3885_s23  ;;  %s4287_s11 = smov [#allocation9]  }
  0x55   : > { %1444 = vmatprep.subr.mxu1 %v1078_v5  ;;  %v1071_v11 = vld [vmem:[%s4452_s28 + $0x870] sm:$0xff]  ;;  %1188 = vmatpush1.msra.mxu0 %v885_v6  ;;  %v874_v12 = vld [vmem:[%s4452_s28 + $0x248] sm:$0xff]  ;;  %v873_v14 = vld [vmem:[%s4452_s28 + $0x240] sm:$0xff]  ;;  %s3739_s19 = sshll.u32 %s5136_s27, 4  ;;  %s5736_s15 = scalar_lea.hbm %s5792_s3, %s3880_s10  ;;  %s5738_s19 = int_to_ptr.vmem [resolvable:$true] %s3739_s19 }
  0x56   : > { %1445 = vmatpush1.msra.mxu1 %v1077_v7  ;;  %v1066_v13 = vld [vmem:[%s4452_s28 + $0x848] sm:$0xff]  ;;  %1189 = vmatprep.subr.mxu0 %v880_v8  ;;  %v1065_v15 = vld [vmem:[%s4452_s28 + $0x840] sm:$0xff]  ;;  %v868_v16 = vld [vmem:[%s4452_s28 + $0x218] sm:$0xff]  ;;  %s4193_s9 = scalar_lea.vmem %s5738_s19, 24576  ;;  %s4197_s21 = sshll.u32 %s4287_s11, 4  ;;  %s4198_s21 = int_to_ptr.vmem [resolvable:$false] %s4197_s21 }
  0x57   : > { %1446 = vmatprep.subr.mxu1 %v1072_v9  ;;  %1190 = vmatpush1.msra.mxu0 %v879_v10  ;;  %v1060_v17 = vld [vmem:[%s4452_s28 + $0x818] sm:$0xff]  ;;  %v867_v18 = vld [vmem:[%s4452_s28 + $0x210] sm:$0xff]  ;;  %v862_v20 = vld [vmem:[%s4452_s28 + $0x1e8] sm:$0xff]  ;;  %p4194_p7 = scmp.ne.s32.totalorder %s5738_s19, %s4193_s9  ;;  %s4199_s30 = scalar_lea.vmem %s4198_s21, 49152 }
  0x58   : > { %1447 = vmatpush1.msra.mxu1 %v1071_v11  ;;  %1191 = vmatprep.subr.mxu0 %v874_v12  ;;  %v1059_v19 = vld [vmem:[%s4452_s28 + $0x810] sm:$0xff]  ;;  %v1054_v21 = vld [vmem:[%s4452_s28 + $0x7e8] sm:$0xff]  ;;  %v861_v22 = vld [vmem:[%s4452_s28 + $0x1e0] sm:$0xff]  ;;  %p4200_p0 = scmp.lt.s32.totalorder %s5738_s19, %s4198_s21  ;;  %p4201_p3 = scmp.lt.s32.totalorder %s4199_s30, %s4193_s9 }
  0x59   : > { %1448 = vmatprep.subr.mxu1 %v1066_v13  ;;  %1192 = vmatpush1.msra.mxu0 %v873_v14  ;;  %v1053_v23 = vld [vmem:[%s4452_s28 + $0x7e0] sm:$0xff]  ;;  %v856_v24 = vld [vmem:[%s4452_s28 + $0x1b8] sm:$0xff]  ;;  %v855_v26 = vld [vmem:[%s4452_s28 + $0x1b0] sm:$0xff]  ;;  %p4195_p2 = pnand %p4194_p7, %p5925_p10 }
  0x5a   : > { %1449 = vmatpush1.msra.mxu1 %v1065_v15  ;;  %1193 = vmatprep.subr.mxu0 %v868_v16  ;;  %v1048_v25 = vld [vmem:[%s4452_s28 + $0x7b8] sm:$0xff]  ;;  %v1047_v27 = vld [vmem:[%s4452_s28 + $0x7b0] sm:$0xff]  ;;  %v850_v28 = vld [vmem:[%s4452_s28 + $0x188] sm:$0xff]  ;;  %p4202_p4 = por %p4201_p3, %p4200_p0 }
  0x5b   : > { %1450 = vmatprep.subr.mxu1 %v1060_v17  ;;  %1194 = vmatpush1.msra.mxu0 %v867_v18  ;;  %v1042_v29 = vld [vmem:[%s4452_s28 + $0x788] sm:$0xff]  ;;  %v849_v30 = vld [vmem:[%s4452_s28 + $0x180] sm:$0xff]  ;;  %v844_v32 = vld [vmem:[%s4452_s28 + $0x158] sm:$0xff]  ;;  %p4196_p1 = pneg %p4195_p2 }
  0x5c   : > { %1451 = vmatpush1.msra.mxu1 %v1059_v19  ;;  %1195 = vmatprep.subr.mxu0 %v862_v20  ;;  %v1041_v31 = vld [vmem:[%s4452_s28 + $0x780] sm:$0xff]  ;;  %v1036_v33 = vld [vmem:[%s4452_s28 + $0x758] sm:$0xff]  ;;  %v843_v34 = vld [vmem:[%s4452_s28 + $0x150] sm:$0xff] }
  0x5d   : > { %1452 = vmatprep.subr.mxu1 %v1054_v21  ;;  %1196 = vmatpush1.msra.mxu0 %v861_v22  ;;  %v1035_v35 = vld [vmem:[%s4452_s28 + $0x750] sm:$0xff]  ;;  %v838_v36 = vld [vmem:[%s4452_s28 + $0x128] sm:$0xff]  ;;  %v837_v38 = vld [vmem:[%s4452_s28 + $0x120] sm:$0xff]  ;;  %p4203_p6 = pnand %p4202_p4, %p4196_p1 }
  0x5e   : > { %1453 = vmatpush1.msra.mxu1 %v1053_v23  ;;  %1197 = vmatprep.subr.mxu0 %v856_v24  ;;  %v1030_v37 = vld [vmem:[%s4452_s28 + $0x728] sm:$0xff]  ;;  %v1029_v39 = vld [vmem:[%s4452_s28 + $0x720] sm:$0xff]  ;;  %v832_v40 = vld [vmem:[%s4452_s28 + $0xf8] sm:$0xff] }
  0x5f   : > { %1454 = vmatprep.subr.mxu1 %v1048_v25  ;;  %1198 = vmatpush1.msra.mxu0 %v855_v26  ;;  %v1024_v41 = vld [vmem:[%s4452_s28 + $0x6f8] sm:$0xff]  ;;  %v831_v42 = vld [vmem:[%s4452_s28 + $0xf0] sm:$0xff]  ;;  %v826_v44 = vld [vmem:[%s4452_s28 + $0xc8] sm:$0xff] }
  0x60   : > { %1455 = vmatpush1.msra.mxu1 %v1047_v27  ;;  %1199 = vmatprep.subr.mxu0 %v850_v28  ;;  %v1023_v43 = vld [vmem:[%s4452_s28 + $0x6f0] sm:$0xff]  ;;  %v1018_v45 = vld [vmem:[%s4452_s28 + $0x6c8] sm:$0xff]  ;;  %v825_v46 = vld [vmem:[%s4452_s28 + $0xc0] sm:$0xff] }
  0x61   : > { %1456 = vmatprep.subr.mxu1 %v1042_v29  ;;  %1200 = vmatpush1.msra.mxu0 %v849_v30  ;;  %v1017_v47 = vld [vmem:[%s4452_s28 + $0x6c0] sm:$0xff]  ;;  %v820_v48 = vld [vmem:[%s4452_s28 + $0x98] sm:$0xff]  ;;  %v819_v50 = vld [vmem:[%s4452_s28 + $0x90] sm:$0xff] }
  0x62   : > { %1457 = vmatpush1.msra.mxu1 %v1041_v31  ;;  %1201 = vmatprep.subr.mxu0 %v844_v32  ;;  %v1012_v49 = vld [vmem:[%s4452_s28 + $0x698] sm:$0xff]  ;;  %v1011_v51 = vld [vmem:[%s4452_s28 + $0x690] sm:$0xff]  ;;  %v814_v52 = vld [vmem:[%s4452_s28 + $0x68] sm:$0xff] }
  0x63   : > { %1458 = vmatprep.subr.mxu1 %v1036_v33  ;;  %1202 = vmatpush1.msra.mxu0 %v843_v34  ;;  %v1006_v53 = vld [vmem:[%s4452_s28 + $0x668] sm:$0xff]  ;;  %v813_v54 = vld [vmem:[%s4452_s28 + $0x60] sm:$0xff]  ;;  %v808_v56 = vld [vmem:[%s4452_s28 + $0x38] sm:$0xff] }
  0x64   : > { %1459 = vmatpush1.msra.mxu1 %v1035_v35  ;;  %1203 = vmatprep.subr.mxu0 %v838_v36  ;;  %v1005_v55 = vld [vmem:[%s4452_s28 + $0x660] sm:$0xff]  ;;  %v1000_v57 = vld [vmem:[%s4452_s28 + $0x638] sm:$0xff]  ;;  %v807_v58 = vld [vmem:[%s4452_s28 + $0x30] sm:$0xff] }
  0x65   : > { %1460 = vmatprep.subr.mxu1 %v1030_v37  ;;  %1204 = vmatpush1.msra.mxu0 %v837_v38  ;;  %v999_v59 = vld [vmem:[%s4452_s28 + $0x630] sm:$0xff]  ;;  %v802_v60 = vld [vmem:[%s4452_s28 + $0x8] sm:$0xff]  ;;  %v801_v62 = vld [vmem:[%s4452_s28] sm:$0xff] }
  0x66   : > { %1461 = vmatpush1.msra.mxu1 %v1029_v39  ;;  %1205 = vmatprep.subr.mxu0 %v832_v40  ;;  %v994_v61 = vld [vmem:[%s4452_s28 + $0x608] sm:$0xff]  ;;  %v993_v63 = vld [vmem:[%s4452_s28 + $0x600] sm:$0xff]  ;;  %v988_v0 = vld [vmem:[%s4452_s28 + $0x5d8] sm:$0xff] }
  0x67   : > { %1462 = vmatprep.subr.mxu1 %v1024_v41  ;;  %1206 = vmatpush1.msra.mxu0 %v831_v42  ;;  %v1180_v1 = vld [vmem:[%s4452_s28 + $0xbd8] sm:$0xff]  ;;  %v987_v2 = vld [vmem:[%s4452_s28 + $0x5d0] sm:$0xff]  ;;  %v982_v4 = vld [vmem:[%s4452_s28 + $0x5a8] sm:$0xff] }
  0x68   : > { %1463 = vmatpush1.msra.mxu1 %v1023_v43  ;;  %1207 = vmatprep.subr.mxu0 %v826_v44  ;;  %v1179_v3 = vld [vmem:[%s4452_s28 + $0xbd0] sm:$0xff]  ;;  %v1174_v5 = vld [vmem:[%s4452_s28 + $0xba8] sm:$0xff]  ;;  %v981_v6 = vld [vmem:[%s4452_s28 + $0x5a0] sm:$0xff] }
  0x69   : > { %1464 = vmatprep.subr.mxu1 %v1018_v45  ;;  %1208 = vmatpush1.msra.mxu0 %v825_v46  ;;  %v1173_v7 = vld [vmem:[%s4452_s28 + $0xba0] sm:$0xff]  ;;  %v976_v8 = vld [vmem:[%s4452_s28 + $0x578] sm:$0xff]  ;;  %v975_v10 = vld [vmem:[%s4452_s28 + $0x570] sm:$0xff] }
  0x6a   : > { %1465 = vmatpush1.msra.mxu1 %v1017_v47  ;;  %1209 = vmatprep.subr.mxu0 %v820_v48  ;;  %v1168_v9 = vld [vmem:[%s4452_s28 + $0xb78] sm:$0xff]  ;;  %v1167_v11 = vld [vmem:[%s4452_s28 + $0xb70] sm:$0xff]  ;;  %v970_v12 = vld [vmem:[%s4452_s28 + $0x548] sm:$0xff] }
  0x6b   : > { %1466 = vmatprep.subr.mxu1 %v1012_v49  ;;  %1210 = vmatpush1.msra.mxu0 %v819_v50  ;;  %v1162_v13 = vld [vmem:[%s4452_s28 + $0xb48] sm:$0xff]  ;;  %v969_v14 = vld [vmem:[%s4452_s28 + $0x540] sm:$0xff]  ;;  %v964_v16 = vld [vmem:[%s4452_s28 + $0x518] sm:$0xff] }
  0x6c   : > { %1467 = vmatpush1.msra.mxu1 %v1011_v51  ;;  %1211 = vmatprep.subr.mxu0 %v814_v52  ;;  %v1161_v15 = vld [vmem:[%s4452_s28 + $0xb40] sm:$0xff]  ;;  %v1156_v17 = vld [vmem:[%s4452_s28 + $0xb18] sm:$0xff]  ;;  %v963_v18 = vld [vmem:[%s4452_s28 + $0x510] sm:$0xff] }
  0x6d   : > { %1468 = vmatprep.subr.mxu1 %v1006_v53  ;;  %1212 = vmatpush1.msra.mxu0 %v813_v54  ;;  %v1155_v19 = vld [vmem:[%s4452_s28 + $0xb10] sm:$0xff]  ;;  %v958_v20 = vld [vmem:[%s4452_s28 + $0x4e8] sm:$0xff]  ;;  %v957_v22 = vld [vmem:[%s4452_s28 + $0x4e0] sm:$0xff] }
  0x6e   : > { %1469 = vmatpush1.msra.mxu1 %v1005_v55  ;;  %1213 = vmatprep.subr.mxu0 %v808_v56  ;;  %v1150_v21 = vld [vmem:[%s4452_s28 + $0xae8] sm:$0xff]  ;;  %v1149_v23 = vld [vmem:[%s4452_s28 + $0xae0] sm:$0xff]  ;;  %v952_v24 = vld [vmem:[%s4452_s28 + $0x4b8] sm:$0xff] }
  0x6f   : > { %1470 = vmatprep.subr.mxu1 %v1000_v57  ;;  %1214 = vmatpush1.msra.mxu0 %v807_v58  ;;  %v1144_v25 = vld [vmem:[%s4452_s28 + $0xab8] sm:$0xff]  ;;  %v951_v26 = vld [vmem:[%s4452_s28 + $0x4b0] sm:$0xff]  ;;  %v946_v28 = vld [vmem:[%s4452_s28 + $0x488] sm:$0xff] }
  0x70   : > { %1471 = vmatpush1.msra.mxu1 %v999_v59  ;;  %1215 = vmatprep.subr.mxu0 %v802_v60  ;;  %v1143_v27 = vld [vmem:[%s4452_s28 + $0xab0] sm:$0xff]  ;;  %v1138_v29 = vld [vmem:[%s4452_s28 + $0xa88] sm:$0xff]  ;;  %v945_v30 = vld [vmem:[%s4452_s28 + $0x480] sm:$0xff] }
  0x71   : > { %1472 = vmatprep.subr.mxu1 %v994_v61  ;;  %1216 = vmatpush1.msra.mxu0 %v801_v62  ;;  %v1137_v31 = vld [vmem:[%s4452_s28 + $0xa80] sm:$0xff]  ;;  %v940_v32 = vld [vmem:[%s4452_s28 + $0x458] sm:$0xff]  ;;  %v939_v34 = vld [vmem:[%s4452_s28 + $0x450] sm:$0xff] }
  0x72   : > { %1473 = vmatpush1.msra.mxu1 %v993_v63  ;;  %1217 = vmatprep.subr.mxu0 %v988_v0  ;;  %v1132_v33 = vld [vmem:[%s4452_s28 + $0xa58] sm:$0xff]  ;;  %v1131_v35 = vld [vmem:[%s4452_s28 + $0xa50] sm:$0xff]  ;;  %v934_v36 = vld [vmem:[%s4452_s28 + $0x428] sm:$0xff] }
  0x73   : > { %1474 = vmatprep.subr.mxu1 %v1180_v1  ;;  %1218 = vmatpush2.msra.mxu0 %v987_v2  ;;  %v1126_v37 = vld [vmem:[%s4452_s28 + $0xa28] sm:$0xff]  ;;  %v933_v38 = vld [vmem:[%s4452_s28 + $0x420] sm:$0xff]  ;;  %v928_v40 = vld [vmem:[%s4452_s28 + $0x3f8] sm:$0xff] }
  0x74   : > { %1475 = vmatpush2.msra.mxu1 %v1179_v3  ;;  %1219 = vmatprep.subr.mxu0 %v982_v4  ;;  %v1125_v39 = vld [vmem:[%s4452_s28 + $0xa20] sm:$0xff]  ;;  %v1120_v41 = vld [vmem:[%s4452_s28 + $0x9f8] sm:$0xff]  ;;  %v927_v42 = vld [vmem:[%s4452_s28 + $0x3f0] sm:$0xff] }
  0x75   : > { %1476 = vmatprep.subr.mxu1 %v1174_v5  ;;  %1220 = vmatpush2.msra.mxu0 %v981_v6  ;;  %v1119_v43 = vld [vmem:[%s4452_s28 + $0x9f0] sm:$0xff]  ;;  %v922_v44 = vld [vmem:[%s4452_s28 + $0x3c8] sm:$0xff]  ;;  %v921_v46 = vld [vmem:[%s4452_s28 + $0x3c0] sm:$0xff] }
  0x76   : > { %1477 = vmatpush2.msra.mxu1 %v1173_v7  ;;  %1221 = vmatprep.subr.mxu0 %v976_v8  ;;  %v1114_v45 = vld [vmem:[%s4452_s28 + $0x9c8] sm:$0xff]  ;;  %v1113_v47 = vld [vmem:[%s4452_s28 + $0x9c0] sm:$0xff]  ;;  %v916_v48 = vld [vmem:[%s4452_s28 + $0x398] sm:$0xff] }
  0x77   : > { %1478 = vmatprep.subr.mxu1 %v1168_v9  ;;  %1222 = vmatpush2.msra.mxu0 %v975_v10  ;;  %v1108_v49 = vld [vmem:[%s4452_s28 + $0x998] sm:$0xff]  ;;  %v915_v50 = vld [vmem:[%s4452_s28 + $0x390] sm:$0xff]  ;;  %v910_v52 = vld [vmem:[%s4452_s28 + $0x368] sm:$0xff] }
  0x78   : > { %1479 = vmatpush2.msra.mxu1 %v1167_v11  ;;  %1223 = vmatprep.subr.mxu0 %v970_v12  ;;  %v1107_v51 = vld [vmem:[%s4452_s28 + $0x990] sm:$0xff]  ;;  %v1102_v53 = vld [vmem:[%s4452_s28 + $0x968] sm:$0xff]  ;;  %v909_v54 = vld [vmem:[%s4452_s28 + $0x360] sm:$0xff] }
  0x79   : > { %1480 = vmatprep.subr.mxu1 %v1162_v13  ;;  %1224 = vmatpush2.msra.mxu0 %v969_v14  ;;  %v1101_v55 = vld [vmem:[%s4452_s28 + $0x960] sm:$0xff]  ;;  %v904_v56 = vld [vmem:[%s4452_s28 + $0x338] sm:$0xff]  ;;  %v903_v58 = vld [vmem:[%s4452_s28 + $0x330] sm:$0xff] }
  0x7a   : > { %1481 = vmatpush2.msra.mxu1 %v1161_v15  ;;  %1225 = vmatprep.subr.mxu0 %v964_v16  ;;  %v1096_v57 = vld [vmem:[%s4452_s28 + $0x938] sm:$0xff]  ;;  %v1095_v59 = vld [vmem:[%s4452_s28 + $0x930] sm:$0xff]  ;;  %v898_v60 = vld [vmem:[%s4452_s28 + $0x308] sm:$0xff] }
  0x7b   : > { %1482 = vmatprep.subr.mxu1 %v1156_v17  ;;  %1226 = vmatpush2.msra.mxu0 %v963_v18  ;;  %v1090_v61 = vld [vmem:[%s4452_s28 + $0x908] sm:$0xff]  ;;  %v897_v62 = vld [vmem:[%s4452_s28 + $0x300] sm:$0xff]  ;;  %v676_v1 = vld [vmem:[#allocation3 + $0x18] sm:$0xff] }
  0x7c   : > { %1483 = vmatpush2.msra.mxu1 %v1155_v19  ;;  %1227 = vmatprep.subr.mxu0 %v958_v20  ;;  %v674_v63 = vld [vmem:[#allocation3 + $0x8] sm:$0xff]  ;;  %v1089_v0 = vld [vmem:[%s4452_s28 + $0x900] sm:$0xff]  ;;  %v675_v3 = vld [vmem:[#allocation3 + $0x10] sm:$0xff] }
  0x7d   : > { %1484 = vmatprep.subr.mxu1 %v1150_v21  ;;  %1228 = vmatpush2.msra.mxu0 %v957_v22  ;;  %v673_v2 = vld [vmem:[#allocation3] sm:$0xff]  ;;  %v894_v4 = vld [vmem:[%s4452_s28 + $0x2e8] sm:$0xff]  ;;  %v680_v9 = vld [vmem:[#allocation3 + $0x38] sm:$0xff] }
  0x7e   : > { %1485 = vmatpush2.msra.mxu1 %v1149_v23  ;;  %1229 = vmatprep.subr.mxu0 %v952_v24  ;;  %v1086_v5 = vld [vmem:[%s4452_s28 + $0x8e8] sm:$0xff]  ;;  %v893_v6 = vld [vmem:[%s4452_s28 + $0x2e0] sm:$0xff]  ;;  %v679_v11 = vld [vmem:[#allocation3 + $0x30] sm:$0xff] }
  0x7f   : > { %1486 = vmatprep.subr.mxu1 %v1144_v25  ;;  %1230 = vmatpush2.msra.mxu0 %v951_v26  ;;  %v1085_v7 = vld [vmem:[%s4452_s28 + $0x8e0] sm:$0xff]  ;;  %v678_v8 = vld [vmem:[#allocation3 + $0x28] sm:$0xff]  ;;  %v888_v12 = vld [vmem:[%s4452_s28 + $0x2b8] sm:$0xff] }
  0x80   : > { %1487 = vmatpush2.msra.mxu1 %v1143_v27  ;;  %1231 = vmatprep.subr.mxu0 %v946_v28  ;;  %v677_v10 = vld [vmem:[#allocation3 + $0x20] sm:$0xff]  ;;  %v1080_v13 = vld [vmem:[%s4452_s28 + $0x8b8] sm:$0xff]  ;;  %v887_v14 = vld [vmem:[%s4452_s28 + $0x2b0] sm:$0xff] }
  0x81   : > { %1488 = vmatprep.subr.mxu1 %v1138_v29  ;;  %1232 = vmatpush2.msra.mxu0 %v945_v30  ;;  %v1079_v15 = vld [vmem:[%s4452_s28 + $0x8b0] sm:$0xff]  ;;  %v4594_v16 = vld [vmem:[#allocation3 + $0x48] sm:$0xff]  ;;  %v4596_v17 = vld [vmem:[#allocation3 + $0x58] sm:$0xff] }
  0x82   : > { %1489 = vmatpush2.msra.mxu1 %v1137_v31  ;;  %1233 = vmatprep.subr.mxu0 %v940_v32  ;;  %v4598_v18 = vld [vmem:[#allocation3 + $0x40] sm:$0xff]  ;;  %v4600_v19 = vld [vmem:[#allocation3 + $0x50] sm:$0xff]  ;;  %v882_v20 = vld [vmem:[%s4452_s28 + $0x288] sm:$0xff] }
  0x83   : > { %1490 = vmatprep.subr.mxu1 %v1132_v33  ;;  %1234 = vmatpush2.msra.mxu0 %v939_v34  ;;  %v1074_v21 = vld [vmem:[%s4452_s28 + $0x888] sm:$0xff]  ;;  %v881_v22 = vld [vmem:[%s4452_s28 + $0x280] sm:$0xff]  ;;  %v4612_v25 = vld [vmem:[#allocation3 + $0x78] sm:$0xff] }
  0x84   : > { %1491 = vmatpush2.msra.mxu1 %v1131_v35  ;;  %1235 = vmatprep.subr.mxu0 %v934_v36  ;;  %v1073_v23 = vld [vmem:[%s4452_s28 + $0x880] sm:$0xff]  ;;  %v4610_v24 = vld [vmem:[#allocation3 + $0x68] sm:$0xff]  ;;  %v4616_v27 = vld [vmem:[#allocation3 + $0x70] sm:$0xff] }
  0x85   : > { %1492 = vmatprep.subr.mxu1 %v1126_v37  ;;  %1236 = vmatpush2.msra.mxu0 %v933_v38  ;;  %v4614_v26 = vld [vmem:[#allocation3 + $0x60] sm:$0xff]  ;;  %v876_v28 = vld [vmem:[%s4452_s28 + $0x258] sm:$0xff]  ;;  %v875_v30 = vld [vmem:[%s4452_s28 + $0x250] sm:$0xff] }
  0x86   : > { %1493 = vmatpush2.msra.mxu1 %v1125_v39  ;;  %1237 = vmatprep.subr.mxu0 %v928_v40  ;;  %v1068_v29 = vld [vmem:[%s4452_s28 + $0x858] sm:$0xff]  ;;  %v1067_v31 = vld [vmem:[%s4452_s28 + $0x850] sm:$0xff]  ;;  %v4626_v32 = vld [vmem:[#allocation3 + $0x88] sm:$0xff] }
  0x87   : > { %1494 = vmatprep.subr.mxu1 %v1120_v41  ;;  %1238 = vmatpush2.msra.mxu0 %v927_v42  ;;  %v4628_v33 = vld [vmem:[#allocation3 + $0x98] sm:$0xff]  ;;  %v4630_v34 = vld [vmem:[#allocation3 + $0x80] sm:$0xff]  ;;  %v4632_v35 = vld [vmem:[#allocation3 + $0x90] sm:$0xff] }
  0x88   : > { %1495 = vmatpush2.msra.mxu1 %v1119_v43  ;;  %1239 = vmatprep.subr.mxu0 %v922_v44  ;;  %v870_v36 = vld [vmem:[%s4452_s28 + $0x228] sm:$0xff]  ;;  %v869_v38 = vld [vmem:[%s4452_s28 + $0x220] sm:$0xff]  ;;  %v4644_v41 = vld [vmem:[#allocation3 + $0xb8] sm:$0xff] }
  0x89   : > { %1496 = vmatprep.subr.mxu1 %v1114_v45  ;;  %1240 = vmatpush2.msra.mxu0 %v921_v46  ;;  %v1062_v37 = vld [vmem:[%s4452_s28 + $0x828] sm:$0xff]  ;;  %v1061_v39 = vld [vmem:[%s4452_s28 + $0x820] sm:$0xff]  ;;  %v4648_v43 = vld [vmem:[#allocation3 + $0xb0] sm:$0xff] }
  0x8a   : > { %1497 = vmatpush2.msra.mxu1 %v1113_v47  ;;  %1241 = vmatprep.subr.mxu0 %v916_v48  ;;  %v4642_v40 = vld [vmem:[#allocation3 + $0xa8] sm:$0xff]  ;;  %v4646_v42 = vld [vmem:[#allocation3 + $0xa0] sm:$0xff]  ;;  %v864_v44 = vld [vmem:[%s4452_s28 + $0x1f8] sm:$0xff] }
  0x8b   : > { %1498 = vmatprep.subr.mxu1 %v1108_v49  ;;  %1242 = vmatpush2.msra.mxu0 %v915_v50  ;;  %v1056_v45 = vld [vmem:[%s4452_s28 + $0x7f8] sm:$0xff]  ;;  %v863_v46 = vld [vmem:[%s4452_s28 + $0x1f0] sm:$0xff]  ;;  %v4658_v48 = vld [vmem:[#allocation3 + $0xc8] sm:$0xff] }
  0x8c   : > { %1499 = vmatpush2.msra.mxu1 %v1107_v51  ;;  %1243 = vmatprep.subr.mxu0 %v910_v52  ;;  %v1055_v47 = vld [vmem:[%s4452_s28 + $0x7f0] sm:$0xff]  ;;  %v4660_v49 = vld [vmem:[#allocation3 + $0xd8] sm:$0xff]  ;;  %v4662_v50 = vld [vmem:[#allocation3 + $0xc0] sm:$0xff] }
  0x8d   : > { %1500 = vmatprep.subr.mxu1 %v1102_v53  ;;  %1244 = vmatpush2.msra.mxu0 %v909_v54  ;;  %v4664_v51 = vld [vmem:[#allocation3 + $0xd0] sm:$0xff]  ;;  %v858_v52 = vld [vmem:[%s4452_s28 + $0x1c8] sm:$0xff]  ;;  %v857_v54 = vld [vmem:[%s4452_s28 + $0x1c0] sm:$0xff] }
  0x8e   : > { %1501 = vmatpush2.msra.mxu1 %v1101_v55  ;;  %1245 = vmatprep.subr.mxu0 %v904_v56  ;;  %v1050_v53 = vld [vmem:[%s4452_s28 + $0x7c8] sm:$0xff]  ;;  %v1049_v55 = vld [vmem:[%s4452_s28 + $0x7c0] sm:$0xff] }
  0x8f   : > { %1502 = vmatprep.subr.mxu1 %v1096_v57  ;;  %1246 = vmatpush2.msra.mxu0 %v903_v58  ;;  %v4674_v56 = vld [vmem:[#allocation3 + $0xe8] sm:$0xff]  ;;  %v4676_v57 = vld [vmem:[#allocation3 + $0xf8] sm:$0xff]  ;;  %v4678_v58 = vld [vmem:[#allocation3 + $0xe0] sm:$0xff] }
  0x90   : > { %1503 = vmatpush2.msra.mxu1 %v1095_v59  ;;  %1247 = vmatprep.subr.mxu0 %v898_v60  ;;  %v4680_v59 = vld [vmem:[#allocation3 + $0xf0] sm:$0xff]  ;;  %v852_v60 = vld [vmem:[%s4452_s28 + $0x198] sm:$0xff] }
  0x91   : > { %1504 = vmatprep.subr.mxu1 %v1090_v61  ;;  %1248 = vmatpush2.msra.mxu0 %v897_v62  ;;  %v1044_v61 = vld [vmem:[%s4452_s28 + $0x798] sm:$0xff]  ;;  %v851_v62 = vld [vmem:[%s4452_s28 + $0x190] sm:$0xff] }
  0x92   : > { %1249 = vmatprep.mubr.f32.mxu0 %v674_v63  ;;  %1505 = vmatpush2.msra.mxu1 %v1089_v0  ;;  %v1043_v63 = vld [vmem:[%s4452_s28 + $0x790] sm:$0xff]  ;;  %v4690_v0 = vld [vmem:[#allocation3 + $0x108] sm:$0xff] }
  0x93   : > { %1506 = vmatprep.mubr.f32.mxu1 %v676_v1  ;;  %1250 = vmatmul.mubr.f32.vlgmr.msra.gmra.mxu0 %v673_v2  ;;  %v4692_v1 = vld [vmem:[#allocation3 + $0x118] sm:$0xff]  ;;  %v4694_v2 = vld [vmem:[#allocation3 + $0x100] sm:$0xff] }
  0x94   : > { %1507 = vmatmul.mubr.f32.vlgmr.msra.gmra.mxu1 %v675_v3  ;;  %1699 = vmatprep.subr.mxu0 %v894_v4  ;;  %v4696_v3 = vld [vmem:[#allocation3 + $0x110] sm:$0xff]  ;;  %v846_v4 = vld [vmem:[%s4452_s28 + $0x168] sm:$0xff] }
  0x95   : > { %1956 = vmatprep.subr.mxu1 %v1086_v5  ;;  %1700 = vmatpush1.msra.mxu0 %v893_v6  ;;  %v1038_v5 = vld [vmem:[%s4452_s28 + $0x768] sm:$0xff]  ;;  %v845_v6 = vld [vmem:[%s4452_s28 + $0x160] sm:$0xff] }
  0x96   : > { %1957 = vmatpush1.msra.mxu1 %v1085_v7  ;;  %1255 = vmatprep.mubr.f32.mxu0 %v678_v8  ;;  %v1037_v7 = vld [vmem:[%s4452_s28 + $0x760] sm:$0xff]  ;;  %v4706_v8 = vld [vmem:[#allocation3 + $0x128] sm:$0xff] }
  0x97   : > { %1512 = vmatprep.mubr.f32.mxu1 %v680_v9  ;;  %1256 = vmatmul.mubr.f32.gmra.mxu0 %v677_v10  ;;  %v4708_v9 = vld [vmem:[#allocation3 + $0x138] sm:$0xff]  ;;  %v4710_v10 = vld [vmem:[#allocation3 + $0x120] sm:$0xff] }
  0x98   : > { %1513 = vmatmul.mubr.f32.gmra.mxu1 %v679_v11  ;;  %1701 = vmatprep.subr.mxu0 %v888_v12  ;;  %v4712_v11 = vld [vmem:[#allocation3 + $0x130] sm:$0xff]  ;;  %v840_v12 = vld [vmem:[%s4452_s28 + $0x138] sm:$0xff] }
  0x99   : > { %1958 = vmatprep.subr.mxu1 %v1080_v13  ;;  %1702 = vmatpush1.msra.mxu0 %v887_v14  ;;  %v1032_v13 = vld [vmem:[%s4452_s28 + $0x738] sm:$0xff]  ;;  %v839_v14 = vld [vmem:[%s4452_s28 + $0x130] sm:$0xff] }
  0x9a   : > { %1959 = vmatpush1.msra.mxu1 %v1079_v15  ;;  %1261 = vmatprep.mubr.f32.mxu0 %v4594_v16  ;;  %v1031_v15 = vld [vmem:[%s4452_s28 + $0x730] sm:$0xff] }
  0x9b   : > { %1518 = vmatprep.mubr.f32.mxu1 %v4596_v17  ;;  %1262 = vmatmul.mubr.f32.gmra.mxu0 %v4598_v18 }
  0x9c   : > { %1519 = vmatmul.mubr.f32.gmra.mxu1 %v4600_v19  ;;  %1703 = vmatprep.subr.mxu0 %v882_v20  ;;  %v4722_v20 = vld [vmem:[#allocation3 + $0x148] sm:$0xff] }
  0x9d   : > { %1960 = vmatprep.subr.mxu1 %v1074_v21  ;;  %1704 = vmatpush1.msra.mxu0 %v881_v22  ;;  %v4724_v21 = vld [vmem:[#allocation3 + $0x158] sm:$0xff]  ;;  %v4726_v22 = vld [vmem:[#allocation3 + $0x140] sm:$0xff] }
  0x9e   : > { %1961 = vmatpush1.msra.mxu1 %v1073_v23  ;;  %1267 = vmatprep.mubr.f32.mxu0 %v4610_v24  ;;  %v4728_v23 = vld [vmem:[#allocation3 + $0x150] sm:$0xff] }
  0x9f   : > { %1524 = vmatprep.mubr.f32.mxu1 %v4612_v25  ;;  %1268 = vmatmul.mubr.f32.gmra.mxu0 %v4614_v26 }
  0xa0   : > { %1525 = vmatmul.mubr.f32.gmra.mxu1 %v4616_v27  ;;  %1705 = vmatprep.subr.mxu0 %v876_v28  ;;  %v834_v28 = vld [vmem:[%s4452_s28 + $0x108] sm:$0xff] }
  0xa1   : > { %1962 = vmatprep.subr.mxu1 %v1068_v29  ;;  %1706 = vmatpush1.msra.mxu0 %v875_v30  ;;  %v1026_v29 = vld [vmem:[%s4452_s28 + $0x708] sm:$0xff]  ;;  %v833_v30 = vld [vmem:[%s4452_s28 + $0x100] sm:$0xff] }
  0xa2   : > { %1963 = vmatpush1.msra.mxu1 %v1067_v31  ;;  %1273 = vmatprep.mubr.f32.mxu0 %v4626_v32  ;;  %v1025_v31 = vld [vmem:[%s4452_s28 + $0x700] sm:$0xff] }
  0xa3   : > { %1530 = vmatprep.mubr.f32.mxu1 %v4628_v33  ;;  %1274 = vmatmul.mubr.f32.gmra.mxu0 %v4630_v34 }
  0xa4   : > { %1531 = vmatmul.mubr.f32.gmra.mxu1 %v4632_v35  ;;  %1707 = vmatprep.subr.mxu0 %v870_v36  ;;  %v4738_v36 = vld [vmem:[#allocation3 + $0x168] sm:$0xff] }
  0xa5   : > { %1964 = vmatprep.subr.mxu1 %v1062_v37  ;;  %1708 = vmatpush1.msra.mxu0 %v869_v38  ;;  %v4740_v37 = vld [vmem:[#allocation3 + $0x178] sm:$0xff]  ;;  %v4742_v38 = vld [vmem:[#allocation3 + $0x160] sm:$0xff] }
  0xa6   : > { %1965 = vmatpush1.msra.mxu1 %v1061_v39  ;;  %1279 = vmatprep.mubr.f32.mxu0 %v4642_v40  ;;  %v4744_v39 = vld [vmem:[#allocation3 + $0x170] sm:$0xff] }
  0xa7   : > { %1536 = vmatprep.mubr.f32.mxu1 %v4644_v41  ;;  %1280 = vmatmul.mubr.f32.gmra.mxu0 %v4646_v42 }
  0xa8   : > { %1537 = vmatmul.mubr.f32.gmra.mxu1 %v4648_v43  ;;  %1709 = vmatprep.subr.mxu0 %v864_v44  ;;  %v828_v44 = vld [vmem:[%s4452_s28 + $0xd8] sm:$0xff] }
  0xa9   : > { %1966 = vmatprep.subr.mxu1 %v1056_v45  ;;  %1710 = vmatpush1.msra.mxu0 %v863_v46  ;;  %v1020_v45 = vld [vmem:[%s4452_s28 + $0x6d8] sm:$0xff]  ;;  %v827_v46 = vld [vmem:[%s4452_s28 + $0xd0] sm:$0xff] }
  0xaa   : > { %1967 = vmatpush1.msra.mxu1 %v1055_v47  ;;  %1285 = vmatprep.mubr.f32.mxu0 %v4658_v48  ;;  %v1019_v47 = vld [vmem:[%s4452_s28 + $0x6d0] sm:$0xff] }
  0xab   : > { %1542 = vmatprep.mubr.f32.mxu1 %v4660_v49  ;;  %1286 = vmatmul.mubr.f32.gmra.mxu0 %v4662_v50 }
  0xac   : > { %1543 = vmatmul.mubr.f32.gmra.mxu1 %v4664_v51  ;;  %1711 = vmatprep.subr.mxu0 %v858_v52  ;;  %v4754_v52 = vld [vmem:[#allocation3 + $0x188] sm:$0xff] }
  0xad   : > { %1968 = vmatprep.subr.mxu1 %v1050_v53  ;;  %1712 = vmatpush1.msra.mxu0 %v857_v54  ;;  %v4756_v53 = vld [vmem:[#allocation3 + $0x198] sm:$0xff]  ;;  %v4758_v54 = vld [vmem:[#allocation3 + $0x180] sm:$0xff] }
  0xae   : > { %1969 = vmatpush1.msra.mxu1 %v1049_v55  ;;  %1291 = vmatprep.mubr.f32.mxu0 %v4674_v56  ;;  %v4760_v55 = vld [vmem:[#allocation3 + $0x190] sm:$0xff] }
  0xaf   : > { %1548 = vmatprep.mubr.f32.mxu1 %v4676_v57  ;;  %1292 = vmatmul.mubr.f32.gmra.mxu0 %v4678_v58 }
  0xb0   : > { %1549 = vmatmul.mubr.f32.gmra.mxu1 %v4680_v59  ;;  %1713 = vmatprep.subr.mxu0 %v852_v60  ;;  %v822_v60 = vld [vmem:[%s4452_s28 + $0xa8] sm:$0xff] }
  0xb1   : > { %1970 = vmatprep.subr.mxu1 %v1044_v61  ;;  %1714 = vmatpush1.msra.mxu0 %v851_v62  ;;  %v1014_v61 = vld [vmem:[%s4452_s28 + $0x6a8] sm:$0xff]  ;;  %v821_v62 = vld [vmem:[%s4452_s28 + $0xa0] sm:$0xff] }
  0xb2   : > { %1971 = vmatpush1.msra.mxu1 %v1043_v63  ;;  %1297 = vmatprep.mubr.f32.mxu0 %v4690_v0  ;;  %v1013_v63 = vld [vmem:[%s4452_s28 + $0x6a0] sm:$0xff] }
  0xb3   : > { %1554 = vmatprep.mubr.f32.mxu1 %v4692_v1  ;;  %1298 = vmatmul.mubr.f32.gmra.mxu0 %v4694_v2 }
  0xb4   : > { %1555 = vmatmul.mubr.f32.gmra.mxu1 %v4696_v3  ;;  %1715 = vmatprep.subr.mxu0 %v846_v4  ;;  %v4770_v4 = vld [vmem:[#allocation3 + $0x1a8] sm:$0xff] }
  0xb5   : > { %1972 = vmatprep.subr.mxu1 %v1038_v5  ;;  %1716 = vmatpush1.msra.mxu0 %v845_v6  ;;  %v4772_v5 = vld [vmem:[#allocation3 + $0x1b8] sm:$0xff]  ;;  %v4774_v6 = vld [vmem:[#allocation3 + $0x1a0] sm:$0xff] }
  0xb6   : > { %1973 = vmatpush1.msra.mxu1 %v1037_v7  ;;  %1303 = vmatprep.mubr.f32.mxu0 %v4706_v8  ;;  %v4776_v7 = vld [vmem:[#allocation3 + $0x1b0] sm:$0xff] }
  0xb7   : > { %1560 = vmatprep.mubr.f32.mxu1 %v4708_v9  ;;  %1304 = vmatmul.mubr.f32.gmra.mxu0 %v4710_v10 }
  0xb8   : > { %1561 = vmatmul.mubr.f32.gmra.mxu1 %v4712_v11  ;;  %1717 = vmatprep.subr.mxu0 %v840_v12  ;;  %v816_v12 = vld [vmem:[%s4452_s28 + $0x78] sm:$0xff] }
  0xb9   : > { %1974 = vmatprep.subr.mxu1 %v1032_v13  ;;  %1718 = vmatpush1.msra.mxu0 %v839_v14  ;;  %v1008_v13 = vld [vmem:[%s4452_s28 + $0x678] sm:$0xff]  ;;  %v815_v14 = vld [vmem:[%s4452_s28 + $0x70] sm:$0xff] }
  0xba   : > { %1975 = vmatpush1.msra.mxu1 %v1031_v15  ;;  %1309 = vmatprep.mubr.f32.mxu0 %v4722_v20  ;;  %v1007_v15 = vld [vmem:[%s4452_s28 + $0x670] sm:$0xff] }
  0xbb   : > { %1566 = vmatprep.mubr.f32.mxu1 %v4724_v21  ;;  %1310 = vmatmul.mubr.f32.gmra.mxu0 %v4726_v22 }
  0xbc   : > { %1567 = vmatmul.mubr.f32.gmra.mxu1 %v4728_v23  ;;  %1719 = vmatprep.subr.mxu0 %v834_v28  ;;  %v4786_v28 = vld [vmem:[#allocation3 + $0x1c8] sm:$0xff] }
  0xbd   : > { %1976 = vmatprep.subr.mxu1 %v1026_v29  ;;  %1720 = vmatpush1.msra.mxu0 %v833_v30  ;;  %v4788_v29 = vld [vmem:[#allocation3 + $0x1d8] sm:$0xff]  ;;  %v4790_v30 = vld [vmem:[#allocation3 + $0x1c0] sm:$0xff] }
  0xbe   : > { %1977 = vmatpush1.msra.mxu1 %v1025_v31  ;;  %1315 = vmatprep.mubr.f32.mxu0 %v4738_v36  ;;  %5845 = vst [vmem:[#allocation13_spill] sm:$0xff] %v4790_v30  ;;  %v4792_v31 = vld [vmem:[#allocation3 + $0x1d0] sm:$0xff] }
  0xbf   : > { %1572 = vmatprep.mubr.f32.mxu1 %v4740_v37  ;;  %1316 = vmatmul.mubr.f32.gmra.mxu0 %v4742_v38  ;;  %5846 = vst [vmem:[#allocation14_spill] sm:$0xff] %v4792_v31 }
  0xc0   : > { %1573 = vmatmul.mubr.f32.gmra.mxu1 %v4744_v39  ;;  %1721 = vmatprep.subr.mxu0 %v828_v44  ;;  %v810_v44 = vld [vmem:[%s4452_s28 + $0x48] sm:$0xff] }
  0xc1   : > { %1978 = vmatprep.subr.mxu1 %v1020_v45  ;;  %1722 = vmatpush1.msra.mxu0 %v827_v46  ;;  %v1002_v45 = vld [vmem:[%s4452_s28 + $0x648] sm:$0xff]  ;;  %v809_v46 = vld [vmem:[%s4452_s28 + $0x40] sm:$0xff] }
  0xc2   : > { %1979 = vmatpush1.msra.mxu1 %v1019_v47  ;;  %1321 = vmatprep.mubr.f32.mxu0 %v4754_v52  ;;  %v1001_v47 = vld [vmem:[%s4452_s28 + $0x640] sm:$0xff] }
  0xc3   : > { %1578 = vmatprep.mubr.f32.mxu1 %v4756_v53  ;;  %1322 = vmatmul.mubr.f32.gmra.mxu0 %v4758_v54 }
  0xc4   : > { %1579 = vmatmul.mubr.f32.gmra.mxu1 %v4760_v55  ;;  %1723 = vmatprep.subr.mxu0 %v822_v60  ;;  %v4802_v60 = vld [vmem:[#allocation3 + $0x1e8] sm:$0xff] }
  0xc5   : > { %1980 = vmatprep.subr.mxu1 %v1014_v61  ;;  %1724 = vmatpush1.msra.mxu0 %v821_v62  ;;  %5847 = vst [vmem:[#allocation15_spill] sm:$0xff] %v4802_v60  ;;  %v4804_v61 = vld [vmem:[#allocation3 + $0x1f8] sm:$0xff]  ;;  %v4806_v62 = vld [vmem:[#allocation3 + $0x1e0] sm:$0xff] }
  0xc6   : > { %1981 = vmatpush1.msra.mxu1 %v1013_v63  ;;  %1327 = vmatprep.mubr.f32.mxu0 %v4770_v4  ;;  %5848 = vst [vmem:[#allocation16_spill] sm:$0xff] %v4804_v61  ;;  %5849 = vst [vmem:[#allocation17_spill] sm:$0xff] %v4806_v62  ;;  %v4808_v63 = vld [vmem:[#allocation3 + $0x1f0] sm:$0xff] }
  0xc7   : > { %1584 = vmatprep.mubr.f32.mxu1 %v4772_v5  ;;  %1328 = vmatmul.mubr.f32.gmra.mxu0 %v4774_v6  ;;  %5850 = vst [vmem:[#allocation18_spill] sm:$0xff] %v4808_v63 }
  0xc8   : > { %1585 = vmatmul.mubr.f32.gmra.mxu1 %v4776_v7  ;;  %1725 = vmatprep.subr.mxu0 %v816_v12  ;;  %v804_v12 = vld [vmem:[%s4452_s28 + $0x18] sm:$0xff] }
  0xc9   : > { %1982 = vmatprep.subr.mxu1 %v1008_v13  ;;  %1726 = vmatpush1.msra.mxu0 %v815_v14  ;;  %v996_v13 = vld [vmem:[%s4452_s28 + $0x618] sm:$0xff]  ;;  %v803_v14 = vld [vmem:[%s4452_s28 + $0x10] sm:$0xff] }
  0xca   : > { %1983 = vmatpush1.msra.mxu1 %v1007_v15  ;;  %1333 = vmatprep.mubr.f32.mxu0 %v4786_v28  ;;  %v995_v15 = vld [vmem:[%s4452_s28 + $0x610] sm:$0xff] }
  0xcb   : > { %1590 = vmatprep.mubr.f32.mxu1 %v4788_v29  ;;  %1334 = vmatmul.mubr.f32.gmra.mxu0 %v4790_v30  ;;  %v1128_v30 = vld [vmem:[%s4452_s28 + $0xa38] sm:$0xff] }
  0xcc   : > { %1591 = vmatmul.mubr.f32.gmra.mxu1 %v4792_v31  ;;  %1727 = vmatprep.subr.mxu0 %v810_v44  ;;  %v4818_v44 = vld [vmem:[#allocation3 + $0x208] sm:$0xff]  ;;  %v936_v31 = vld [vmem:[%s4452_s28 + $0x438] sm:$0xff] }
  0xcd   : > { %1984 = vmatprep.subr.mxu1 %v1002_v45  ;;  %1728 = vmatpush1.msra.mxu0 %v809_v46  ;;  %5851 = vst [vmem:[#allocation19_spill] sm:$0xff] %v4818_v44  ;;  %v4820_v45 = vld [vmem:[#allocation3 + $0x218] sm:$0xff]  ;;  %v4822_v46 = vld [vmem:[#allocation3 + $0x200] sm:$0xff] }
  0xce   : > { %1985 = vmatpush1.msra.mxu1 %v1001_v47  ;;  %1339 = vmatprep.mubr.f32.mxu0 %v4802_v60  ;;  %5852 = vst [vmem:[#allocation20_spill] sm:$0xff] %v4820_v45  ;;  %5853 = vst [vmem:[#allocation21_spill] sm:$0xff] %v4822_v46  ;;  %v4824_v47 = vld [vmem:[#allocation3 + $0x210] sm:$0xff]  ;;  %v1182_v60 = vld [vmem:[%s4452_s28 + $0xbe8] sm:$0xff] }
  0xcf   : > { %1596 = vmatprep.mubr.f32.mxu1 %v4804_v61  ;;  %1340 = vmatmul.mubr.f32.gmra.mxu0 %v4806_v62  ;;  %5854 = vst [vmem:[#allocation22_spill] sm:$0xff] %v4824_v47  ;;  %v990_v61 = vld [vmem:[%s4452_s28 + $0x5e8] sm:$0xff]  ;;  %v1181_v62 = vld [vmem:[%s4452_s28 + $0xbe0] sm:$0xff] }
  0xd0   : > { %1597 = vmatmul.mubr.f32.gmra.mxu1 %v4808_v63  ;;  %1729 = vmatprep.subr.mxu0 %v804_v12  ;;  %v989_v63 = vld [vmem:[%s4452_s28 + $0x5e0] sm:$0xff]  ;;  %v4834_v12 = vld [vmem:[#allocation3 + $0x228] sm:$0xff] }
  0xd1   : > { %1986 = vmatprep.subr.mxu1 %v996_v13  ;;  %1730 = vmatpush1.msra.mxu0 %v803_v14  ;;  %5855 = vst [vmem:[#allocation23_spill] sm:$0xff] %v4834_v12  ;;  %v4836_v13 = vld [vmem:[#allocation3 + $0x238] sm:$0xff]  ;;  %v4838_v14 = vld [vmem:[#allocation3 + $0x220] sm:$0xff] }
  0xd2   : > { %1987 = vmatpush1.msra.mxu1 %v995_v15  ;;  %1345 = vmatprep.mubr.f32.mxu0 %v4818_v44  ;;  %5856 = vst [vmem:[#allocation24_spill] sm:$0xff] %v4836_v13  ;;  %5857 = vst [vmem:[#allocation25_spill] sm:$0xff] %v4838_v14  ;;  %v4840_v15 = vld [vmem:[#allocation3 + $0x230] sm:$0xff]  ;;  %v1176_v44 = vld [vmem:[%s4452_s28 + $0xbb8] sm:$0xff] }
  0xd3   : > { %1602 = vmatprep.mubr.f32.mxu1 %v4820_v45  ;;  %1346 = vmatmul.mubr.f32.gmra.mxu0 %v4822_v46  ;;  %5858 = vst [vmem:[#allocation26_spill] sm:$0xff] %v4840_v15  ;;  %v984_v45 = vld [vmem:[%s4452_s28 + $0x5b8] sm:$0xff]  ;;  %v1175_v46 = vld [vmem:[%s4452_s28 + $0xbb0] sm:$0xff] }
  0xd4   : > { %1603 = vmatmul.mubr.f32.gmra.mxu1 %v4824_v47  ;;  %1731 = vmatprep.subr.mxu0 %v990_v61  ;;  %v983_v47 = vld [vmem:[%s4452_s28 + $0x5b0] sm:$0xff]  ;;  %v4852_v61 = vld [vmem:[#allocation3 + $0x258] sm:$0xff] }
  0xd5   : > { %1988 = vmatprep.subr.mxu1 %v1182_v60  ;;  %1732 = vmatpush2.msra.mxu0 %v989_v63  ;;  %v4850_v60 = vld [vmem:[#allocation3 + $0x248] sm:$0xff]  ;;  %5860 = vst [vmem:[#allocation28_spill] sm:$0xff] %v4852_v61  ;;  %v4856_v63 = vld [vmem:[#allocation3 + $0x250] sm:$0xff] }
  0xd6   : > { %1989 = vmatpush2.msra.mxu1 %v1181_v62  ;;  %1351 = vmatprep.mubr.f32.mxu0 %v4834_v12  ;;  %5859 = vst [vmem:[#allocation27_spill] sm:$0xff] %v4850_v60  ;;  %v4854_v62 = vld [vmem:[#allocation3 + $0x240] sm:$0xff]  ;;  %5862 = vst [vmem:[#allocation30_spill] sm:$0xff] %v4856_v63  ;;  %v1170_v12 = vld [vmem:[%s4452_s28 + $0xb88] sm:$0xff] }
  0xd7   : > { %1608 = vmatprep.mubr.f32.mxu1 %v4836_v13  ;;  %1352 = vmatmul.mubr.f32.gmra.mxu0 %v4838_v14  ;;  %5861 = vst [vmem:[#allocation29_spill] sm:$0xff] %v4854_v62  ;;  %v978_v13 = vld [vmem:[%s4452_s28 + $0x588] sm:$0xff]  ;;  %v1169_v14 = vld [vmem:[%s4452_s28 + $0xb80] sm:$0xff] }
  0xd8   : > { %1609 = vmatmul.mubr.f32.gmra.mxu1 %v4840_v15  ;;  %1733 = vmatprep.subr.mxu0 %v984_v45  ;;  %v977_v15 = vld [vmem:[%s4452_s28 + $0x580] sm:$0xff]  ;;  %v4868_v45 = vld [vmem:[#allocation3 + $0x278] sm:$0xff] }
  0xd9   : > { %1990 = vmatprep.subr.mxu1 %v1176_v44  ;;  %1734 = vmatpush2.msra.mxu0 %v983_v47  ;;  %v4866_v44 = vld [vmem:[#allocation3 + $0x268] sm:$0xff]  ;;  %5864 = vst [vmem:[#allocation32_spill] sm:$0xff] %v4868_v45  ;;  %v4872_v47 = vld [vmem:[#allocation3 + $0x270] sm:$0xff] }
  0xda   : > { %1991 = vmatpush2.msra.mxu1 %v1175_v46  ;;  %1357 = vmatprep.mubr.f32.mxu0 %v4850_v60  ;;  %5863 = vst [vmem:[#allocation31_spill] sm:$0xff] %v4866_v44  ;;  %v4870_v46 = vld [vmem:[#allocation3 + $0x260] sm:$0xff]  ;;  %5866 = vst [vmem:[#allocation34_spill] sm:$0xff] %v4872_v47  ;;  %v1164_v60 = vld [vmem:[%s4452_s28 + $0xb58] sm:$0xff] }
  0xdb   : > { %1614 = vmatprep.mubr.f32.mxu1 %v4852_v61  ;;  %1358 = vmatmul.mubr.f32.gmra.mxu0 %v4854_v62  ;;  %5865 = vst [vmem:[#allocation33_spill] sm:$0xff] %v4870_v46  ;;  %v972_v61 = vld [vmem:[%s4452_s28 + $0x558] sm:$0xff]  ;;  %v1163_v62 = vld [vmem:[%s4452_s28 + $0xb50] sm:$0xff] }
  0xdc   : > { %1615 = vmatmul.mubr.f32.gmra.mxu1 %v4856_v63  ;;  %1735 = vmatprep.subr.mxu0 %v978_v13  ;;  %v971_v63 = vld [vmem:[%s4452_s28 + $0x550] sm:$0xff]  ;;  %v4884_v13 = vld [vmem:[#allocation3 + $0x298] sm:$0xff] }
  0xdd   : > { %1992 = vmatprep.subr.mxu1 %v1170_v12  ;;  %1736 = vmatpush2.msra.mxu0 %v977_v15  ;;  %v4882_v12 = vld [vmem:[#allocation3 + $0x288] sm:$0xff]  ;;  %5868 = vst [vmem:[#allocation36_spill] sm:$0xff] %v4884_v13  ;;  %v4888_v15 = vld [vmem:[#allocation3 + $0x290] sm:$0xff] }
  0xde   : > { %1993 = vmatpush2.msra.mxu1 %v1169_v14  ;;  %1363 = vmatprep.mubr.f32.mxu0 %v4866_v44  ;;  %5867 = vst [vmem:[#allocation35_spill] sm:$0xff] %v4882_v12  ;;  %v4886_v14 = vld [vmem:[#allocation3 + $0x280] sm:$0xff]  ;;  %5870 = vst [vmem:[#allocation38_spill] sm:$0xff] %v4888_v15  ;;  %v1158_v44 = vld [vmem:[%s4452_s28 + $0xb28] sm:$0xff] }
  0xdf   : > { %1620 = vmatprep.mubr.f32.mxu1 %v4868_v45  ;;  %1364 = vmatmul.mubr.f32.gmra.mxu0 %v4870_v46  ;;  %5869 = vst [vmem:[#allocation37_spill] sm:$0xff] %v4886_v14  ;;  %v966_v45 = vld [vmem:[%s4452_s28 + $0x528] sm:$0xff]  ;;  %v1157_v46 = vld [vmem:[%s4452_s28 + $0xb20] sm:$0xff] }
  0xe0   : > { %1621 = vmatmul.mubr.f32.gmra.mxu1 %v4872_v47  ;;  %1737 = vmatprep.subr.mxu0 %v972_v61  ;;  %v965_v47 = vld [vmem:[%s4452_s28 + $0x520] sm:$0xff]  ;;  %v4900_v61 = vld [vmem:[#allocation3 + $0x2b8] sm:$0xff] }
  0xe1   : > { %1994 = vmatprep.subr.mxu1 %v1164_v60  ;;  %1738 = vmatpush2.msra.mxu0 %v971_v63  ;;  %v4898_v60 = vld [vmem:[#allocation3 + $0x2a8] sm:$0xff]  ;;  %5872 = vst [vmem:[#allocation40_spill] sm:$0xff] %v4900_v61  ;;  %v4904_v63 = vld [vmem:[#allocation3 + $0x2b0] sm:$0xff] }
  0xe2   : > { %1995 = vmatpush2.msra.mxu1 %v1163_v62  ;;  %1369 = vmatprep.mubr.f32.mxu0 %v4882_v12  ;;  %5871 = vst [vmem:[#allocation39_spill] sm:$0xff] %v4898_v60  ;;  %v4902_v62 = vld [vmem:[#allocation3 + $0x2a0] sm:$0xff]  ;;  %5874 = vst [vmem:[#allocation42_spill] sm:$0xff] %v4904_v63  ;;  %v1152_v12 = vld [vmem:[%s4452_s28 + $0xaf8] sm:$0xff] }
  0xe3   : > { %1626 = vmatprep.mubr.f32.mxu1 %v4884_v13  ;;  %1370 = vmatmul.mubr.f32.gmra.mxu0 %v4886_v14  ;;  %5873 = vst [vmem:[#allocation41_spill] sm:$0xff] %v4902_v62  ;;  %v960_v13 = vld [vmem:[%s4452_s28 + $0x4f8] sm:$0xff]  ;;  %v1151_v14 = vld [vmem:[%s4452_s28 + $0xaf0] sm:$0xff] }
  0xe4   : > { %1627 = vmatmul.mubr.f32.gmra.mxu1 %v4888_v15  ;;  %1739 = vmatprep.subr.mxu0 %v966_v45  ;;  %v959_v15 = vld [vmem:[%s4452_s28 + $0x4f0] sm:$0xff]  ;;  %v4916_v45 = vld [vmem:[#allocation3 + $0x2d8] sm:$0xff] }
  0xe5   : > { %1996 = vmatprep.subr.mxu1 %v1158_v44  ;;  %1740 = vmatpush2.msra.mxu0 %v965_v47  ;;  %v4914_v44 = vld [vmem:[#allocation3 + $0x2c8] sm:$0xff]  ;;  %5876 = vst [vmem:[#allocation44_spill] sm:$0xff] %v4916_v45  ;;  %v4920_v47 = vld [vmem:[#allocation3 + $0x2d0] sm:$0xff] }
  0xe6   : > { %1997 = vmatpush2.msra.mxu1 %v1157_v46  ;;  %1375 = vmatprep.mubr.f32.mxu0 %v4898_v60  ;;  %5875 = vst [vmem:[#allocation43_spill] sm:$0xff] %v4914_v44  ;;  %v4918_v46 = vld [vmem:[#allocation3 + $0x2c0] sm:$0xff]  ;;  %5878 = vst [vmem:[#allocation46_spill] sm:$0xff] %v4920_v47  ;;  %v1146_v60 = vld [vmem:[%s4452_s28 + $0xac8] sm:$0xff] }
  0xe7   : > { %1632 = vmatprep.mubr.f32.mxu1 %v4900_v61  ;;  %1376 = vmatmul.mubr.f32.gmra.mxu0 %v4902_v62  ;;  %5877 = vst [vmem:[#allocation45_spill] sm:$0xff] %v4918_v46  ;;  %v954_v61 = vld [vmem:[%s4452_s28 + $0x4c8] sm:$0xff]  ;;  %v1145_v62 = vld [vmem:[%s4452_s28 + $0xac0] sm:$0xff] }
  0xe8   : > { %1633 = vmatmul.mubr.f32.gmra.mxu1 %v4904_v63  ;;  %1741 = vmatprep.subr.mxu0 %v960_v13  ;;  %v953_v63 = vld [vmem:[%s4452_s28 + $0x4c0] sm:$0xff]  ;;  %v4932_v13 = vld [vmem:[#allocation3 + $0x2f8] sm:$0xff] }
  0xe9   : > { %1998 = vmatprep.subr.mxu1 %v1152_v12  ;;  %1742 = vmatpush2.msra.mxu0 %v959_v15  ;;  %v4930_v12 = vld [vmem:[#allocation3 + $0x2e8] sm:$0xff]  ;;  %5880 = vst [vmem:[#allocation48_spill] sm:$0xff] %v4932_v13  ;;  %v4936_v15 = vld [vmem:[#allocation3 + $0x2f0] sm:$0xff] }
  0xea   : > { %1999 = vmatpush2.msra.mxu1 %v1151_v14  ;;  %1381 = vmatprep.mubr.f32.mxu0 %v4914_v44  ;;  %5879 = vst [vmem:[#allocation47_spill] sm:$0xff] %v4930_v12  ;;  %v4934_v14 = vld [vmem:[#allocation3 + $0x2e0] sm:$0xff]  ;;  %5882 = vst [vmem:[#allocation50_spill] sm:$0xff] %v4936_v15  ;;  %v1140_v44 = vld [vmem:[%s4452_s28 + $0xa98] sm:$0xff] }
  0xeb   : > { %1638 = vmatprep.mubr.f32.mxu1 %v4916_v45  ;;  %1382 = vmatmul.mubr.f32.gmra.mxu0 %v4918_v46  ;;  %5881 = vst [vmem:[#allocation49_spill] sm:$0xff] %v4934_v14  ;;  %v948_v45 = vld [vmem:[%s4452_s28 + $0x498] sm:$0xff]  ;;  %v1139_v46 = vld [vmem:[%s4452_s28 + $0xa90] sm:$0xff] }
  0xec   : > { %1639 = vmatmul.mubr.f32.gmra.mxu1 %v4920_v47  ;;  %1743 = vmatprep.subr.mxu0 %v954_v61  ;;  %v947_v47 = vld [vmem:[%s4452_s28 + $0x490] sm:$0xff]  ;;  %v4948_v61 = vld [vmem:[#allocation3 + $0x318] sm:$0xff] }
  0xed   : > { %2000 = vmatprep.subr.mxu1 %v1146_v60  ;;  %1744 = vmatpush2.msra.mxu0 %v953_v63  ;;  %v4946_v60 = vld [vmem:[#allocation3 + $0x308] sm:$0xff]  ;;  %5884 = vst [vmem:[#allocation52_spill] sm:$0xff] %v4948_v61  ;;  %v771_v63 = vld [vmem:[#allocation3 + $0x310] sm:$0xff] }
  0xee   : > { %2001 = vmatpush2.msra.mxu1 %v1145_v62  ;;  %1387 = vmatprep.mubr.f32.mxu0 %v4930_v12  ;;  %5883 = vst [vmem:[#allocation51_spill] sm:$0xff] %v4946_v60  ;;  %v769_v62 = vld [vmem:[#allocation3 + $0x300] sm:$0xff]  ;;  %v942_v12 = vld [vmem:[%s4452_s28 + $0x468] sm:$0xff] }
  0xef   : > { %1644 = vmatprep.mubr.f32.mxu1 %v4932_v13  ;;  %1388 = vmatmul.mubr.f32.gmra.mxu0 %v4934_v14  ;;  %v1134_v13 = vld [vmem:[%s4452_s28 + $0xa68] sm:$0xff]  ;;  %v941_v14 = vld [vmem:[%s4452_s28 + $0x460] sm:$0xff] }
  0xf0   : > { %1645 = vmatmul.mubr.f32.gmra.mxu1 %v4936_v15  ;;  %1745 = vmatprep.subr.mxu0 %v948_v45  ;;  %v1133_v15 = vld [vmem:[%s4452_s28 + $0xa60] sm:$0xff]  ;;  %v774_v45 = vld [vmem:[#allocation3 + $0x328] sm:$0xff] }
  0xf1   : > { %2002 = vmatprep.subr.mxu1 %v1140_v44  ;;  %1746 = vmatpush2.msra.mxu0 %v947_v47  ;;  %v776_v44 = vld [vmem:[#allocation3 + $0x338] sm:$0xff]  ;;  %v773_v47 = vld [vmem:[#allocation3 + $0x320] sm:$0xff] }
  0xf2   : > { %2003 = vmatpush2.msra.mxu1 %v1139_v46  ;;  %1393 = vmatprep.mubr.f32.mxu0 %v4946_v60  ;;  %v775_v46 = vld [vmem:[#allocation3 + $0x330] sm:$0xff] }
  0xf3   : > { %1650 = vmatprep.mubr.f32.mxu1 %v4948_v61  ;;  %1394 = vmatmul.mubr.f32.gmra.mxu0 %v769_v62  ;;  %v935_v61 = vld [vmem:[%s4452_s28 + $0x430] sm:$0xff]  ;;  %v778_v62 = vld [vmem:[#allocation3 + $0x348] sm:$0xff] }
  0xf4   : > { %1651 = vmatmul.mubr.f32.gmra.mxu1 %v771_v63  ;;  %1747 = vmatprep.subr.mxu0 %v942_v12  ;;  %v1127_v60 = vld [vmem:[%s4452_s28 + $0xa30] sm:$0xff]  ;;  %v780_v63 = vld [vmem:[#allocation3 + $0x358] sm:$0xff]  ;;  %v777_v12 = vld [vmem:[#allocation3 + $0x340] sm:$0xff] }
  0xf5   : > { %2004 = vmatprep.subr.mxu1 %v1134_v13  ;;  %1748 = vmatpush2.msra.mxu0 %v941_v14  ;;  %v779_v13 = vld [vmem:[#allocation3 + $0x350] sm:$0xff]  ;;  %v930_v14 = vld [vmem:[%s4452_s28 + $0x408] sm:$0xff] }
  0xf6   : > { %2005 = vmatpush2.msra.mxu1 %v1133_v15  ;;  %1399 = vmatprep.mubr.f32.mxu0 %v774_v45  ;;  %v1122_v15 = vld [vmem:[%s4452_s28 + $0xa08] sm:$0xff]  ;;  %v929_v45 = vld [vmem:[%s4452_s28 + $0x400] sm:$0xff] }
  0xf7   : > { %1656 = vmatprep.mubr.f32.mxu1 %v776_v44  ;;  %1400 = vmatmul.mubr.f32.gmra.mxu0 %v773_v47  ;;  %v1121_v44 = vld [vmem:[%s4452_s28 + $0xa00] sm:$0xff]  ;;  %v782_v47 = vld [vmem:[#allocation3 + $0x368] sm:$0xff] }
  0xf8   : > { %1657 = vmatmul.mubr.f32.gmra.mxu1 %v775_v46  ;;  %1749 = vmatprep.subr.mxu0 %v936_v31  ;;  %v784_v46 = vld [vmem:[#allocation3 + $0x378] sm:$0xff]  ;;  %v783_v31 = vld [vmem:[#allocation3 + $0x370] sm:$0xff] }
  0xf9   : > { %2006 = vmatprep.subr.mxu1 %v1128_v30  ;;  %1750 = vmatpush2.msra.mxu0 %v935_v61  ;;  %v781_v30 = vld [vmem:[#allocation3 + $0x360] sm:$0xff]  ;;  %v1116_v61 = vld [vmem:[%s4452_s28 + $0x9d8] sm:$0xff] }
  0xfa   : > { %2007 = vmatpush2.msra.mxu1 %v1127_v60  ;;  %1405 = vmatprep.mubr.f32.mxu0 %v778_v62  ;;  %v924_v60 = vld [vmem:[%s4452_s28 + $0x3d8] sm:$0xff]  ;;  %v923_v62 = vld [vmem:[%s4452_s28 + $0x3d0] sm:$0xff] }
  0xfb   : > { %1662 = vmatprep.mubr.f32.mxu1 %v780_v63  ;;  %1406 = vmatmul.mubr.f32.gmra.mxu0 %v777_v12  ;;  %v1115_v63 = vld [vmem:[%s4452_s28 + $0x9d0] sm:$0xff]  ;;  %v786_v12 = vld [vmem:[#allocation3 + $0x388] sm:$0xff] }
  0xfc   : > { %1663 = vmatmul.mubr.f32.gmra.mxu1 %v779_v13  ;;  %1751 = vmatprep.subr.mxu0 %v930_v14  ;;  %v788_v13 = vld [vmem:[#allocation3 + $0x398] sm:$0xff]  ;;  %v785_v14 = vld [vmem:[#allocation3 + $0x380] sm:$0xff] }
  0xfd   : > { %2008 = vmatprep.subr.mxu1 %v1122_v15  ;;  %1752 = vmatpush2.msra.mxu0 %v929_v45  ;;  %v787_v15 = vld [vmem:[#allocation3 + $0x390] sm:$0xff]  ;;  %v918_v45 = vld [vmem:[%s4452_s28 + $0x3a8] sm:$0xff] }
  0xfe   : > { %2009 = vmatpush2.msra.mxu1 %v1121_v44  ;;  %1411 = vmatprep.mubr.f32.mxu0 %v782_v47  ;;  %v1110_v44 = vld [vmem:[%s4452_s28 + $0x9a8] sm:$0xff]  ;;  %v917_v47 = vld [vmem:[%s4452_s28 + $0x3a0] sm:$0xff] }
  0xff   : > { %1668 = vmatprep.mubr.f32.mxu1 %v784_v46  ;;  %1412 = vmatmul.mubr.f32.gmra.mxu0 %v781_v30  ;;  %v1109_v46 = vld [vmem:[%s4452_s28 + $0x9a0] sm:$0xff]  ;;  %v790_v30 = vld [vmem:[#allocation3 + $0x3a8] sm:$0xff] }
 0x100   : > { %1669 = vmatmul.mubr.f32.gmra.mxu1 %v783_v31  ;;  %1753 = vmatprep.subr.mxu0 %v924_v60  ;;  %v792_v31 = vld [vmem:[#allocation3 + $0x3b8] sm:$0xff]  ;;  %v789_v60 = vld [vmem:[#allocation3 + $0x3a0] sm:$0xff] }
 0x101   : > { %2010 = vmatprep.subr.mxu1 %v1116_v61  ;;  %1754 = vmatpush2.msra.mxu0 %v923_v62  ;;  %v791_v61 = vld [vmem:[#allocation3 + $0x3b0] sm:$0xff]  ;;  %v912_v62 = vld [vmem:[%s4452_s28 + $0x378] sm:$0xff] }
 0x102   : > { %2011 = vmatpush2.msra.mxu1 %v1115_v63  ;;  %1417 = vmatprep.mubr.f32.mxu0 %v786_v12  ;;  %v1104_v63 = vld [vmem:[%s4452_s28 + $0x978] sm:$0xff]  ;;  %v911_v12 = vld [vmem:[%s4452_s28 + $0x370] sm:$0xff] }
 0x103   : > { %1674 = vmatprep.mubr.f32.mxu1 %v788_v13  ;;  %1418 = vmatmul.mubr.f32.gmra.mxu0 %v785_v14  ;;  %v1103_v13 = vld [vmem:[%s4452_s28 + $0x970] sm:$0xff]  ;;  %v794_v14 = vld [vmem:[#allocation3 + $0x3c8] sm:$0xff] }
 0x104   : > { %1675 = vmatmul.mubr.f32.gmra.mxu1 %v787_v15  ;;  %1755 = vmatprep.subr.mxu0 %v918_v45  ;;  %v796_v15 = vld [vmem:[#allocation3 + $0x3d8] sm:$0xff]  ;;  %v793_v45 = vld [vmem:[#allocation3 + $0x3c0] sm:$0xff] }
 0x105   : > { %2012 = vmatprep.subr.mxu1 %v1110_v44  ;;  %1756 = vmatpush2.msra.mxu0 %v917_v47  ;;  %v795_v44 = vld [vmem:[#allocation3 + $0x3d0] sm:$0xff]  ;;  %v906_v47 = vld [vmem:[%s4452_s28 + $0x348] sm:$0xff] }
 0x106   : > { %2013 = vmatpush2.msra.mxu1 %v1109_v46  ;;  %1423 = vmatprep.mubr.f32.mxu0 %v790_v30  ;;  %v1098_v46 = vld [vmem:[%s4452_s28 + $0x948] sm:$0xff]  ;;  %v905_v30 = vld [vmem:[%s4452_s28 + $0x340] sm:$0xff] }
 0x107   : > { %1680 = vmatprep.mubr.f32.mxu1 %v792_v31  ;;  %1424 = vmatmul.mubr.f32.gmra.mxu0 %v789_v60  ;;  %v1097_v31 = vld [vmem:[%s4452_s28 + $0x940] sm:$0xff]  ;;  %v798_v60 = vld [vmem:[#allocation3 + $0x3e8] sm:$0xff] }
 0x108   : > { %1681 = vmatmul.mubr.f32.gmra.mxu1 %v791_v61  ;;  %1757 = vmatprep.subr.mxu0 %v912_v62  ;;  %v800_v61 = vld [vmem:[#allocation3 + $0x3f8] sm:$0xff]  ;;  %v797_v62 = vld [vmem:[#allocation3 + $0x3e0] sm:$0xff] }
 0x109   : > { %2014 = vmatprep.subr.mxu1 %v1104_v63  ;;  %1758 = vmatpush2.msra.mxu0 %v911_v12  ;;  %v799_v63 = vld [vmem:[#allocation3 + $0x3f0] sm:$0xff]  ;;  %v900_v12 = vld [vmem:[%s4452_s28 + $0x318] sm:$0xff] }
 0x10a   : > { %2015 = vmatpush2.msra.mxu1 %v1103_v13  ;;  %1429 = vmatprep.mubr.f32.mxu0 %v794_v14  ;;  %v1092_v13 = vld [vmem:[%s4452_s28 + $0x918] sm:$0xff]  ;;  %v899_v14 = vld [vmem:[%s4452_s28 + $0x310] sm:$0xff] }
 0x10b   : > { %1686 = vmatprep.mubr.f32.mxu1 %v796_v15  ;;  %1430 = vmatmul.mubr.f32.gmra.mxu0 %v793_v45  ;;  %v1091_v15 = vld [vmem:[%s4452_s28 + $0x910] sm:$0xff]  ;;  %v896_v45 = vld [vmem:[%s4452_s28 + $0x2f8] sm:$0xff] }
 0x10c   : > { %1687 = vmatmul.mubr.f32.gmra.mxu1 %v795_v44  ;;  %1759 = vmatprep.subr.mxu0 %v906_v47  ;;  %v1088_v44 = vld [vmem:[%s4452_s28 + $0x8f8] sm:$0xff]  ;;  %v3972_v47 = vld [vmem:[#allocation3 + $0x8] sm:$0xff] }
 0x10d   : > { %2016 = vmatprep.subr.mxu1 %v1098_v46  ;;  %1760 = vmatpush2.msra.mxu0 %v905_v30  ;;  %v3973_v46 = vld [vmem:[#allocation3 + $0x18] sm:$0xff]  ;;  %v895_v30 = vld [vmem:[%s4452_s28 + $0x2f0] sm:$0xff] }
 0x10e   : > { %2017 = vmatpush2.msra.mxu1 %v1097_v31  ;;  %1435 = vmatprep.mubr.f32.mxu0 %v798_v60  ;;  %v1087_v31 = vld [vmem:[%s4452_s28 + $0x8f0] sm:$0xff]  ;;  %v3974_v60 = vld [vmem:[#allocation3] sm:$0xff] }
 0x10f   : > { %1692 = vmatprep.mubr.f32.mxu1 %v800_v61  ;;  %1436 = vmatmul.mubr.f32.gmra.mxu0 %v797_v62  ;;  %v3975_v61 = vld [vmem:[#allocation3 + $0x10] sm:$0xff]  ;;  %v890_v62 = vld [vmem:[%s4452_s28 + $0x2c8] sm:$0xff] }
 0x110   : > { %1693 = vmatmul.mubr.f32.gmra.mxu1 %v799_v63  ;;  %1761 = vmatprep.subr.mxu0 %v900_v12  ;;  %v1082_v63 = vld [vmem:[%s4452_s28 + $0x8c8] sm:$0xff] }
 0x111   : > { %2018 = vmatprep.subr.mxu1 %v1092_v13  ;;  %1762 = vmatpush2.msra.mxu0 %v899_v14  ;;  %v3976_v12 = vld [vmem:[#allocation3 + $0x28] sm:$0xff]  ;;  %v3977_v13 = vld [vmem:[#allocation3 + $0x38] sm:$0xff]  ;;  %v889_v14 = vld [vmem:[%s4452_s28 + $0x2c0] sm:$0xff] }
 0x112   : > { %2019 = vmatpush2.msra.mxu1 %v1091_v15  ;;  %1763 = vmatprep.mubr.f32.mxu0 %v3972_v47  ;;  %v1081_v15 = vld [vmem:[%s4452_s28 + $0x8c0] sm:$0xff] }
 0x113   : > { %2020 = vmatprep.mubr.f32.mxu1 %v3973_v46  ;;  %1764 = vmatmul.mubr.f32.vlgmr.msra.gmra.mxu0 %v3974_v60  ;;  %v3978_v47 = vld [vmem:[#allocation3 + $0x20] sm:$0xff]  ;;  %v3979_v46 = vld [vmem:[#allocation3 + $0x30] sm:$0xff]  ;;  %v878_v60 = vld [vmem:[%s4452_s28 + $0x268] sm:$0xff] }
 0x114   : > { %2021 = vmatmul.mubr.f32.vlgmr.msra.gmra.mxu1 %v3975_v61  ;;  %2213 = vmatprep.subr.mxu0 %v896_v45  ;;  %v884_v45 = vld [vmem:[%s4452_s28 + $0x298] sm:$0xff]  ;;  %v1070_v61 = vld [vmem:[%s4452_s28 + $0x868] sm:$0xff] }
 0x115   : > { %2470 = vmatprep.subr.mxu1 %v1088_v44  ;;  %2214 = vmatpush1.msra.mxu0 %v895_v30  ;;  %v1076_v44 = vld [vmem:[%s4452_s28 + $0x898] sm:$0xff]  ;;  %v883_v30 = vld [vmem:[%s4452_s28 + $0x290] sm:$0xff] }
 0x116   : > { %2471 = vmatpush1.msra.mxu1 %v1087_v31  ;;  %1769 = vmatprep.mubr.f32.mxu0 %v3976_v12  ;;  %v1075_v31 = vld [vmem:[%s4452_s28 + $0x890] sm:$0xff]  ;;  %v806_v12 = vld [vmem:[%s4452_s28 + $0x28] sm:$0xff] }
 0x117   : > { %2026 = vmatprep.mubr.f32.mxu1 %v3977_v13  ;;  %1770 = vmatmul.mubr.f32.gmra.mxu0 %v3978_v47  ;;  %v998_v13 = vld [vmem:[%s4452_s28 + $0x628] sm:$0xff] }
 0x118   : > { %2027 = vmatmul.mubr.f32.gmra.mxu1 %v3979_v46  ;;  %2215 = vmatprep.subr.mxu0 %v890_v62  ;;  %v1003_v62 = vld [vmem:[%s4452_s28 + $0x650] sm:$0xff] }
 0x119   : > { %2472 = vmatprep.subr.mxu1 %v1082_v63  ;;  %2216 = vmatpush1.msra.mxu0 %v889_v14  ;;  %v5886_v63 = vld [vmem:[#allocation14_spill] sm:$0xff]  ;;  %v5887_v14 = vld [vmem:[#allocation15_spill] sm:$0xff]  ;;  %v5889_v46 = vld [vmem:[#allocation17_spill] sm:$0xff] }
 0x11a   : > { %2473 = vmatpush1.msra.mxu1 %v1081_v15  ;;  %1775 = vmatprep.mubr.f32.mxu0 %v4594_v16  ;;  %v877_v16 = vld [vmem:[%s4452_s28 + $0x260] sm:$0xff] }
 0x11b   : > { %2032 = vmatprep.mubr.f32.mxu1 %v4596_v17  ;;  %1776 = vmatmul.mubr.f32.gmra.mxu0 %v4598_v18  ;;  %v1069_v17 = vld [vmem:[%s4452_s28 + $0x860] sm:$0xff]  ;;  %v872_v18 = vld [vmem:[%s4452_s28 + $0x238] sm:$0xff] }
 0x11c   : > { %2033 = vmatmul.mubr.f32.gmra.mxu1 %v4600_v19  ;;  %2217 = vmatprep.subr.mxu0 %v884_v45  ;;  %v1064_v19 = vld [vmem:[%s4452_s28 + $0x838] sm:$0xff]  ;;  %v997_v15 = vld [vmem:[%s4452_s28 + $0x620] sm:$0xff] }
 0x11d   : > { %2474 = vmatprep.subr.mxu1 %v1076_v44  ;;  %2218 = vmatpush1.msra.mxu0 %v883_v30  ;;  %v5890_v45 = vld [vmem:[#allocation18_spill] sm:$0xff]  ;;  %v3306_v44 = vld [vmem:[%s5108_s20] sm:$0x3f] }
 0x11e   : > { %2475 = vmatpush1.msra.mxu1 %v1075_v31  ;;  %1781 = vmatprep.mubr.f32.mxu0 %v4610_v24  ;;  %v871_v24 = vld [vmem:[%s4452_s28 + $0x230] sm:$0xff]  ;;  %v992_v31 = vld [vmem:[%s4452_s28 + $0x5f8] sm:$0xff] }
 0x11f   : > { %2038 = vmatprep.mubr.f32.mxu1 %v4612_v25  ;;  %1782 = vmatmul.mubr.f32.gmra.mxu0 %v4614_v26  ;;  %v1063_v25 = vld [vmem:[%s4452_s28 + $0x830] sm:$0xff]  ;;  %v866_v26 = vld [vmem:[%s4452_s28 + $0x208] sm:$0xff] }
 0x120   : > { %2039 = vmatmul.mubr.f32.gmra.mxu1 %v4616_v27  ;;  %2219 = vmatprep.subr.mxu0 %v878_v60  ;;  %v1058_v27 = vld [vmem:[%s4452_s28 + $0x808] sm:$0xff]  ;;  %v1184_v60 = vld [vmem:[%s4452_s28 + $0xbf8] sm:$0xff] }
 0x121   : > { %2476 = vmatprep.subr.mxu1 %v1070_v61  ;;  %2220 = vmatpush1.msra.mxu0 %v877_v16  ;;  %v5891_v61 = vld [vmem:[#allocation19_spill] sm:$0xff]  ;;  %v5892_v16 = vld [vmem:[#allocation20_spill] sm:$0xff] }
 0x122   : > { %2477 = vmatpush1.msra.mxu1 %v1069_v17  ;;  %1787 = vmatprep.mubr.f32.mxu0 %v4626_v32  ;;  %v865_v32 = vld [vmem:[%s4452_s28 + $0x200] sm:$0xff] }
 0x123   : > { %2044 = vmatprep.mubr.f32.mxu1 %v4628_v33  ;;  %1788 = vmatmul.mubr.f32.gmra.mxu0 %v4630_v34  ;;  %v1057_v33 = vld [vmem:[%s4452_s28 + $0x800] sm:$0xff]  ;;  %v860_v34 = vld [vmem:[%s4452_s28 + $0x1d8] sm:$0xff] }
 0x124   : > { %2045 = vmatmul.mubr.f32.gmra.mxu1 %v4632_v35  ;;  %2221 = vmatprep.subr.mxu0 %v872_v18  ;;  %v1052_v35 = vld [vmem:[%s4452_s28 + $0x7d8] sm:$0xff]  ;;  %v991_v18 = vld [vmem:[%s4452_s28 + $0x5f0] sm:$0xff] }
 0x125   : > { %2478 = vmatprep.subr.mxu1 %v1064_v19  ;;  %2222 = vmatpush1.msra.mxu0 %v871_v24  ;;  %v1183_v19 = vld [vmem:[%s4452_s28 + $0xbf0] sm:$0xff] }
 0x126   : > { %2479 = vmatpush1.msra.mxu1 %v1063_v25  ;;  %1793 = vmatprep.mubr.f32.mxu0 %v4642_v40  ;;  %v859_v40 = vld [vmem:[%s4452_s28 + $0x1d0] sm:$0xff] }
 0x127   : > { %2050 = vmatprep.mubr.f32.mxu1 %v4644_v41  ;;  %1794 = vmatmul.mubr.f32.gmra.mxu0 %v4646_v42  ;;  %v1051_v41 = vld [vmem:[%s4452_s28 + $0x7d0] sm:$0xff]  ;;  %v854_v42 = vld [vmem:[%s4452_s28 + $0x1a8] sm:$0xff] }
 0x128   : > { %2051 = vmatmul.mubr.f32.gmra.mxu1 %v4648_v43  ;;  %2223 = vmatprep.subr.mxu0 %v866_v26  ;;  %v1046_v43 = vld [vmem:[%s4452_s28 + $0x7a8] sm:$0xff] }
 0x129   : > { %2480 = vmatprep.subr.mxu1 %v1058_v27  ;;  %2224 = vmatpush1.msra.mxu0 %v865_v32  ;;  %v5893_v26 = vld [vmem:[#allocation21_spill] sm:$0xff]  ;;  %v5894_v27 = vld [vmem:[#allocation22_spill] sm:$0xff] }
 0x12a   : > { %2481 = vmatpush1.msra.mxu1 %v1057_v33  ;;  %1799 = vmatprep.mubr.f32.mxu0 %v4658_v48  ;;  %v853_v48 = vld [vmem:[%s4452_s28 + $0x1a0] sm:$0xff] }
 0x12b   : > { %2056 = vmatprep.mubr.f32.mxu1 %v4660_v49  ;;  %1800 = vmatmul.mubr.f32.gmra.mxu0 %v4662_v50  ;;  %v1045_v49 = vld [vmem:[%s4452_s28 + $0x7a0] sm:$0xff]  ;;  %v848_v50 = vld [vmem:[%s4452_s28 + $0x178] sm:$0xff] }
 0x12c   : > { %2057 = vmatmul.mubr.f32.gmra.mxu1 %v4664_v51  ;;  %2225 = vmatprep.subr.mxu0 %v860_v34  ;;  %v1040_v51 = vld [vmem:[%s4452_s28 + $0x778] sm:$0xff] }
 0x12d   : > { %2482 = vmatprep.subr.mxu1 %v1052_v35  ;;  %2226 = vmatpush1.msra.mxu0 %v859_v40  ;;  %v986_v40 = vld [vmem:[%s4452_s28 + $0x5c8] sm:$0xff] }
 0x12e   : > { %2483 = vmatpush1.msra.mxu1 %v1051_v41  ;;  %1805 = vmatprep.mubr.f32.mxu0 %v4674_v56  ;;  %v847_v56 = vld [vmem:[%s4452_s28 + $0x170] sm:$0xff]  ;;  %v1178_v41 = vld [vmem:[%s4452_s28 + $0xbc8] sm:$0xff] }
 0x12f   : > { %2062 = vmatprep.mubr.f32.mxu1 %v4676_v57  ;;  %1806 = vmatmul.mubr.f32.gmra.mxu0 %v4678_v58  ;;  %v1039_v57 = vld [vmem:[%s4452_s28 + $0x770] sm:$0xff]  ;;  %v842_v58 = vld [vmem:[%s4452_s28 + $0x148] sm:$0xff] }
 0x130   : > { %2063 = vmatmul.mubr.f32.gmra.mxu1 %v4680_v59  ;;  %2227 = vmatprep.subr.mxu0 %v854_v42  ;;  %v1034_v59 = vld [vmem:[%s4452_s28 + $0x748] sm:$0xff] }
 0x131   : > { %2484 = vmatprep.subr.mxu1 %v1046_v43  ;;  %2228 = vmatpush1.msra.mxu0 %v853_v48  ;;  %v5895_v48 = vld [vmem:[#allocation23_spill] sm:$0xff] }
 0x132   : > { %2485 = vmatpush1.msra.mxu1 %v1045_v49  ;;  %1811 = vmatprep.mubr.f32.mxu0 %v4690_v0  ;;  %v841_v0 = vld [vmem:[%s4452_s28 + $0x140] sm:$0xff] }
 0x133   : > { %2068 = vmatprep.mubr.f32.mxu1 %v4692_v1  ;;  %1812 = vmatmul.mubr.f32.gmra.mxu0 %v4694_v2  ;;  %v1033_v1 = vld [vmem:[%s4452_s28 + $0x740] sm:$0xff]  ;;  %v836_v2 = vld [vmem:[%s4452_s28 + $0x118] sm:$0xff] }
 0x134   : > { %2069 = vmatmul.mubr.f32.gmra.mxu1 %v4696_v3  ;;  %2229 = vmatprep.subr.mxu0 %v848_v50  ;;  %v1028_v3 = vld [vmem:[%s4452_s28 + $0x718] sm:$0xff]  ;;  %v5896_v49 = vld [vmem:[#allocation24_spill] sm:$0xff] }
 0x135   : > { %2486 = vmatprep.subr.mxu1 %v1040_v51  ;;  %2230 = vmatpush1.msra.mxu0 %v847_v56  ;;  %v985_v50 = vld [vmem:[%s4452_s28 + $0x5c0] sm:$0xff] }
 0x136   : > { %2487 = vmatpush1.msra.mxu1 %v1039_v57  ;;  %1817 = vmatprep.mubr.f32.mxu0 %v4706_v8  ;;  %v835_v8 = vld [vmem:[%s4452_s28 + $0x110] sm:$0xff]  ;;  %v1177_v51 = vld [vmem:[%s4452_s28 + $0xbc0] sm:$0xff] }
 0x137   : > { %2074 = vmatprep.mubr.f32.mxu1 %v4708_v9  ;;  %1818 = vmatmul.mubr.f32.gmra.mxu0 %v4710_v10  ;;  %v1027_v9 = vld [vmem:[%s4452_s28 + $0x710] sm:$0xff]  ;;  %v830_v10 = vld [vmem:[%s4452_s28 + $0xe8] sm:$0xff] }
 0x138   : > { %2075 = vmatmul.mubr.f32.gmra.mxu1 %v4712_v11  ;;  %2231 = vmatprep.subr.mxu0 %v842_v58  ;;  %v1022_v11 = vld [vmem:[%s4452_s28 + $0x6e8] sm:$0xff] }
 0x139   : > { %2488 = vmatprep.subr.mxu1 %v1034_v59  ;;  %2232 = vmatpush1.msra.mxu0 %v841_v0  ;;  %v5897_v58 = vld [vmem:[#allocation25_spill] sm:$0xff]  ;;  %v5898_v59 = vld [vmem:[#allocation26_spill] sm:$0xff] }
 0x13a   : > { %2489 = vmatpush1.msra.mxu1 %v1033_v1  ;;  %1823 = vmatprep.mubr.f32.mxu0 %v4722_v20  ;;  %v829_v20 = vld [vmem:[%s4452_s28 + $0xe0] sm:$0xff] }
 0x13b   : > { %2080 = vmatprep.mubr.f32.mxu1 %v4724_v21  ;;  %1824 = vmatmul.mubr.f32.gmra.mxu0 %v4726_v22  ;;  %v1021_v21 = vld [vmem:[%s4452_s28 + $0x6e0] sm:$0xff]  ;;  %v824_v22 = vld [vmem:[%s4452_s28 + $0xb8] sm:$0xff] }
 0x13c   : > { %2081 = vmatmul.mubr.f32.gmra.mxu1 %v4728_v23  ;;  %2233 = vmatprep.subr.mxu0 %v836_v2  ;;  %v1016_v23 = vld [vmem:[%s4452_s28 + $0x6b8] sm:$0xff] }
 0x13d   : > { %2490 = vmatprep.subr.mxu1 %v1028_v3  ;;  %2234 = vmatpush1.msra.mxu0 %v835_v8  ;;  %v980_v8 = vld [vmem:[%s4452_s28 + $0x598] sm:$0xff] }
 0x13e   : > { %2491 = vmatpush1.msra.mxu1 %v1027_v9  ;;  %1829 = vmatprep.mubr.f32.mxu0 %v4738_v36  ;;  %v823_v36 = vld [vmem:[%s4452_s28 + $0xb0] sm:$0xff]  ;;  %v1172_v9 = vld [vmem:[%s4452_s28 + $0xb98] sm:$0xff] }
 0x13f   : > { %2086 = vmatprep.mubr.f32.mxu1 %v4740_v37  ;;  %1830 = vmatmul.mubr.f32.gmra.mxu0 %v4742_v38  ;;  %v1015_v37 = vld [vmem:[%s4452_s28 + $0x6b0] sm:$0xff]  ;;  %v818_v38 = vld [vmem:[%s4452_s28 + $0x88] sm:$0xff] }
 0x140   : > { %2087 = vmatmul.mubr.f32.gmra.mxu1 %v4744_v39  ;;  %2235 = vmatprep.subr.mxu0 %v830_v10  ;;  %v1010_v39 = vld [vmem:[%s4452_s28 + $0x688] sm:$0xff] }
 0x141   : > { %2492 = vmatprep.subr.mxu1 %v1022_v11  ;;  %2236 = vmatpush1.msra.mxu0 %v829_v20  ;;  %v5899_v20 = vld [vmem:[#allocation27_spill] sm:$0xff] }
 0x142   : > { %2493 = vmatpush1.msra.mxu1 %v1021_v21  ;;  %1835 = vmatprep.mubr.f32.mxu0 %v4754_v52  ;;  %v817_v52 = vld [vmem:[%s4452_s28 + $0x80] sm:$0xff] }
 0x143   : > { %2092 = vmatprep.mubr.f32.mxu1 %v4756_v53  ;;  %1836 = vmatmul.mubr.f32.gmra.mxu0 %v4758_v54  ;;  %v1009_v53 = vld [vmem:[%s4452_s28 + $0x680] sm:$0xff]  ;;  %v3308_v54 = vlaneseq }
 0x144   : > { %2093 = vmatmul.mubr.f32.gmra.mxu1 %v4760_v55  ;;  %2237 = vmatprep.subr.mxu0 %v824_v22  ;;  %v812_v55 = vld [vmem:[%s4452_s28 + $0x58] sm:$0xff]  ;;  %v5900_v21 = vld [vmem:[#allocation28_spill] sm:$0xff]  ;;  %v979_v22 = vld [vmem:[%s4452_s28 + $0x590] sm:$0xff] }
 0x145   : > { %2494 = vmatprep.subr.mxu1 %v1016_v23  ;;  %2238 = vmatpush1.msra.mxu0 %v823_v36  ;;  %v1171_v23 = vld [vmem:[%s4452_s28 + $0xb90] sm:$0xff] }
 0x146   : > { %2495 = vmatpush1.msra.mxu1 %v1015_v37  ;;  %1841 = vmatprep.mubr.f32.mxu0 %v4770_v4  ;;  %v1004_v4 = vld [vmem:[%s4452_s28 + $0x658] sm:$0xff] }
 0x147   : > { %2098 = vmatprep.mubr.f32.mxu1 %v4772_v5  ;;  %1842 = vmatmul.mubr.f32.gmra.mxu0 %v4774_v6  ;;  %v811_v5 = vld [vmem:[%s4452_s28 + $0x50] sm:$0xff]  ;;  %v5095_v6 = vshrl.u32 %v3308_v54, 7 }
 0x148   : > { %2099 = vmatmul.mubr.f32.gmra.mxu1 %v4776_v7  ;;  %2239 = vmatprep.subr.mxu0 %v818_v38  ;;  %v5885_v7 = vld [vmem:[#allocation13_spill] sm:$0xff] }
 0x149   : > { %2496 = vmatprep.subr.mxu1 %v1010_v39  ;;  %2240 = vmatpush1.msra.mxu0 %v817_v52  ;;  %v3310_v47 = vsub.s32 0, %v5095_v6  ;;  %v3314_v30 = vsub.s32 1, %v5095_v6  ;;  %v5901_v38 = vld [vmem:[#allocation29_spill] sm:$0xff]  ;;  %v5902_v39 = vld [vmem:[#allocation30_spill] sm:$0xff] }
 0x14a   : > { %2497 = vmatpush1.msra.mxu1 %v1009_v53  ;;  %1847 = vmatprep.mubr.f32.mxu0 %v4786_v28  ;;  %v5888_v28 = vld [vmem:[#allocation16_spill] sm:$0xff] }
 0x14b   : > { %2104 = vmatprep.mubr.f32.mxu1 %v4788_v29  ;;  %1848 = vmatmul.mubr.f32.gmra.mxu0 %v5885_v7  ;;  %v805_v29 = vld [vmem:[%s4452_s28 + $0x20] sm:$0xff]  ;;  %v5117_v17 = vrot.slane %v3306_v44, %v3310_v47  ;;  %v5123_v33 = vrot.slane %v3306_v44, %v3314_v30  ;;  %v5906_v47 = vld [vmem:[#allocation34_spill] sm:$0xff] }
 0x14c   : > { %2105 = vmatmul.mubr.f32.gmra.mxu1 %v5886_v63  ;;  %2241 = vmatprep.subr.mxu0 %v812_v55  ;;  %v5903_v63 = vld [vmem:[#allocation31_spill] sm:$0xff] }
 0x14d   : > { %2498 = vmatprep.subr.mxu1 %v1004_v4  ;;  %2242 = vmatpush1.msra.mxu0 %v811_v5  ;;  %v974_v4 = vld [vmem:[%s4452_s28 + $0x568] sm:$0xff] }
 0x14e   : > { %2499 = vmatpush1.msra.mxu1 %v1003_v62  ;;  %1853 = vmatprep.mubr.f32.mxu0 %v5887_v14  ;;  %v1166_v5 = vld [vmem:[%s4452_s28 + $0xb68] sm:$0xff]  ;;  %v1165_v14 = vld [vmem:[%s4452_s28 + $0xb60] sm:$0xff] }
 0x14f   : > { %2110 = vmatprep.mubr.f32.mxu1 %v5888_v28  ;;  %1854 = vmatmul.mubr.f32.gmra.mxu0 %v5889_v46 }
 0x150   : > { %2111 = vmatmul.mubr.f32.gmra.mxu1 %v5890_v45  ;;  %2243 = vmatprep.subr.mxu0 %v806_v12  ;;  %v5904_v12 = vld [vmem:[#allocation32_spill] sm:$0xff] }
 0x151   : > { %2500 = vmatprep.subr.mxu1 %v998_v13  ;;  %2244 = vmatpush1.msra.mxu0 %v805_v29  ;;  %v973_v13 = vld [vmem:[%s4452_s28 + $0x560] sm:$0xff] }
 0x152   : > { %2501 = vmatpush1.msra.mxu1 %v997_v15  ;;  %1859 = vmatprep.mubr.f32.mxu0 %v5891_v61  ;;  %v5905_v15 = vld [vmem:[#allocation33_spill] sm:$0xff] }
 0x153   : > { %2116 = vmatprep.mubr.f32.mxu1 %v5892_v16  ;;  %v1251_v24 = vpop.f32.mrf.mxu0  ;;  %1860 = vmatmul.mubr.f32.gmra.mxu0 %v5893_v26 }
 0x154   : > { %v1508_v25 = vpop.f32.mrf.mxu1  ;;  %2117 = vmatmul.mubr.f32.gmra.mxu1 %v5894_v27  ;;  %2245 = vmatprep.subr.mxu0 %v992_v31  ;;  %v968_v31 = vld [vmem:[%s4452_s28 + $0x538] sm:$0xff] }
 0x155   : > { %v1509_v32 = vadd.f32 %v1508_v25, %v1251_v24  ;;  %2502 = vmatprep.subr.mxu1 %v1184_v60  ;;  %2246 = vmatpush2.msra.mxu0 %v991_v18  ;;  %v1253_v34 = vpop.f32.mrf.mxu0  ;;  %v1160_v60 = vld [vmem:[%s4452_s28 + $0xb38] sm:$0xff]  ;;  %v967_v24 = vld [vmem:[%s4452_s28 + $0x530] sm:$0xff] }
 0x156   : > { %2503 = vmatpush2.msra.mxu1 %v1183_v19  ;;  %v1510_v35 = vpop.f32.mrf.mxu1  ;;  %1865 = vmatprep.mubr.f32.mxu0 %v5895_v48  ;;  %v5907_v18 = vld [vmem:[#allocation35_spill] sm:$0xff]  ;;  %v5908_v19 = vld [vmem:[#allocation36_spill] sm:$0xff]  ;;  %v1159_v25 = vld [vmem:[%s4452_s28 + $0xb30] sm:$0xff] }
 0x157   : > { %v3338_v42 = vadd.f32 %v5117_v17, %v1509_v32  ;;  %v1511_v43 = vadd.f32 %v1510_v35, %v1253_v34  ;;  %2122 = vmatprep.mubr.f32.mxu1 %v5896_v49  ;;  %v1257_v56 = vpop.f32.mrf.mxu0  ;;  %1866 = vmatmul.mubr.f32.gmra.mxu0 %v5897_v58  ;;  %v5909_v32 = vld [vmem:[#allocation37_spill] sm:$0xff]  ;;  %v5910_v34 = vld [vmem:[#allocation38_spill] sm:$0xff]  ;;  %v1153_v58 = vld [vmem:[%s4452_s28 + $0xb00] sm:$0xff] }
 0x158   : > { %v1514_v57 = vpop.f32.mrf.mxu1  ;;  %2123 = vmatmul.mubr.f32.gmra.mxu1 %v5898_v59  ;;  %2247 = vmatprep.subr.mxu0 %v986_v40  ;;  %v1154_v48 = vld [vmem:[%s4452_s28 + $0xb08] sm:$0xff] }
 0x159   : > { %3530 = vst [vmem:[%s5136_s27] sm:$0xff] %v3338_v42  ;;  %v3339_v0 = vadd.f32 %v5123_v33, %v1511_v43  ;;  %v1515_v1 = vadd.f32 %v1514_v57, %v1257_v56  ;;  %2504 = vmatprep.subr.mxu1 %v1178_v41  ;;  %2248 = vmatpush2.msra.mxu0 %v985_v50  ;;  %v1259_v2 = vpop.f32.mrf.mxu0  ;;  %v962_v43 = vld [vmem:[%s4452_s28 + $0x508] sm:$0xff]  ;;  %v961_v57 = vld [vmem:[%s4452_s28 + $0x500] sm:$0xff] }
 0x15a   : > { %2505 = vmatpush2.msra.mxu1 %v1177_v51  ;;  %v1516_v3 = vpop.f32.mrf.mxu1  ;;  %1871 = vmatprep.mubr.f32.mxu0 %v5899_v20  ;;  %v5911_v51 = vld [vmem:[#allocation39_spill] sm:$0xff]  ;;  %v5912_v56 = vld [vmem:[#allocation40_spill] sm:$0xff] }
 0x15b   : > { %3531 = vst [vmem:[%s5136_s27 + $0x8] sm:$0xff] %v3339_v0  ;;  %v3344_v10 = vadd.f32 %v5117_v17, %v1515_v1  ;;  %v1517_v11 = vadd.f32 %v1516_v3, %v1259_v2  ;;  %2128 = vmatprep.mubr.f32.mxu1 %v5900_v21  ;;  %v1263_v36 = vpop.f32.mrf.mxu0  ;;  %1872 = vmatmul.mubr.f32.gmra.mxu0 %v5901_v38  ;;  %v5913_v1 = vld [vmem:[#allocation41_spill] sm:$0xff]  ;;  %v5914_v2 = vld [vmem:[#allocation42_spill] sm:$0xff] }
 0x15c   : > { %v1520_v37 = vpop.f32.mrf.mxu1  ;;  %2129 = vmatmul.mubr.f32.gmra.mxu1 %v5902_v39  ;;  %2249 = vmatprep.subr.mxu0 %v980_v8  ;;  %v1148_v20 = vld [vmem:[%s4452_s28 + $0xad8] sm:$0xff]  ;;  %v1147_v38 = vld [vmem:[%s4452_s28 + $0xad0] sm:$0xff] }
 0x15d   : > { %3536 = vst [vmem:[%s5136_s27 + $0x30] sm:$0xff] %v3344_v10  ;;  %v3345_v52 = vadd.f32 %v5123_v33, %v1517_v11  ;;  %v1521_v53 = vadd.f32 %v1520_v37, %v1263_v36  ;;  %2506 = vmatprep.subr.mxu1 %v1172_v9  ;;  %2250 = vmatpush2.msra.mxu0 %v979_v22  ;;  %v1265_v54 = vpop.f32.mrf.mxu0  ;;  %v956_v11 = vld [vmem:[%s4452_s28 + $0x4d8] sm:$0xff]  ;;  %v5916_v36 = vld [vmem:[#allocation44_spill] sm:$0xff]  ;;  %v955_v37 = vld [vmem:[%s4452_s28 + $0x4d0] sm:$0xff] }
 0x15e   : > { %2507 = vmatpush2.msra.mxu1 %v1171_v23  ;;  %v1522_v55 = vpop.f32.mrf.mxu1  ;;  %1877 = vmatprep.mubr.f32.mxu0 %v5903_v63  ;;  %v5915_v23 = vld [vmem:[#allocation43_spill] sm:$0xff]  ;;  %v1142_v63 = vld [vmem:[%s4452_s28 + $0xaa8] sm:$0xff] }
 0x15f   : > { %3537 = vst [vmem:[%s5136_s27 + $0x38] sm:$0xff] %v3345_v52  ;;  %v3350_v62 = vadd.f32 %v5117_v17, %v1521_v53  ;;  %v1523_v7 = vadd.f32 %v1522_v55, %v1265_v54  ;;  %2134 = vmatprep.mubr.f32.mxu1 %v5904_v12  ;;  %v1269_v28 = vpop.f32.mrf.mxu0  ;;  %1878 = vmatmul.mubr.f32.gmra.mxu0 %v5905_v15  ;;  %v5917_v53 = vld [vmem:[#allocation45_spill] sm:$0xff]  ;;  %v5918_v54 = vld [vmem:[#allocation46_spill] sm:$0xff]  ;;  %v1141_v15 = vld [vmem:[%s4452_s28 + $0xaa0] sm:$0xff] }
 0x160   : > { %v1526_v29 = vpop.f32.mrf.mxu1  ;;  %2135 = vmatmul.mubr.f32.gmra.mxu1 %v5906_v47  ;;  %2251 = vmatprep.subr.mxu0 %v974_v4 }
 0x161   : > { %3542 = vst [vmem:[%s5136_s27 + $0x60] sm:$0xff] %v3350_v62  ;;  %v3351_v46 = vadd.f32 %v5123_v33, %v1523_v7  ;;  %v1527_v45 = vadd.f32 %v1526_v29, %v1269_v28  ;;  %2508 = vmatprep.subr.mxu1 %v1166_v5  ;;  %2252 = vmatpush2.msra.mxu0 %v973_v13  ;;  %v1271_v44 = vpop.f32.mrf.mxu0  ;;  %v950_v7 = vld [vmem:[%s4452_s28 + $0x4a8] sm:$0xff]  ;;  %v949_v29 = vld [vmem:[%s4452_s28 + $0x4a0] sm:$0xff] }
 0x162   : > { %2509 = vmatpush2.msra.mxu1 %v1165_v14  ;;  %v1528_v30 = vpop.f32.mrf.mxu1  ;;  %1883 = vmatprep.mubr.f32.mxu0 %v5907_v18  ;;  %v5919_v14 = vld [vmem:[#allocation47_spill] sm:$0xff]  ;;  %v5920_v28 = vld [vmem:[#allocation48_spill] sm:$0xff] }
 0x163   : > { %3543 = vst [vmem:[%s5136_s27 + $0x68] sm:$0xff] %v3351_v46  ;;  %v3356_v61 = vadd.f32 %v5117_v17, %v1527_v45  ;;  %v1529_v16 = vadd.f32 %v1528_v30, %v1271_v44  ;;  %2140 = vmatprep.mubr.f32.mxu1 %v5908_v19  ;;  %v1275_v26 = vpop.f32.mrf.mxu0  ;;  %1884 = vmatmul.mubr.f32.gmra.mxu0 %v5909_v32  ;;  %v5921_v45 = vld [vmem:[#allocation49_spill] sm:$0xff]  ;;  %v5922_v44 = vld [vmem:[#allocation50_spill] sm:$0xff] }
 0x164   : > { %v1532_v27 = vpop.f32.mrf.mxu1  ;;  %2141 = vmatmul.mubr.f32.gmra.mxu1 %v5910_v34  ;;  %2253 = vmatprep.subr.mxu0 %v968_v31  ;;  %v1136_v18 = vld [vmem:[%s4452_s28 + $0xa78] sm:$0xff]  ;;  %v1135_v32 = vld [vmem:[%s4452_s28 + $0xa70] sm:$0xff] }
 0x165   : > { %3548 = vst [vmem:[%s5136_s27 + $0x90] sm:$0xff] %v3356_v61  ;;  %v3357_v35 = vadd.f32 %v5123_v33, %v1529_v16  ;;  %v1533_v40 = vadd.f32 %v1532_v27, %v1275_v26  ;;  %2510 = vmatprep.subr.mxu1 %v1160_v60  ;;  %2254 = vmatpush2.msra.mxu0 %v967_v24  ;;  %v1277_v41 = vpop.f32.mrf.mxu0  ;;  %v944_v16 = vld [vmem:[%s4452_s28 + $0x478] sm:$0xff]  ;;  %v5924_v26 = vld [vmem:[#allocation52_spill] sm:$0xff]  ;;  %v943_v27 = vld [vmem:[%s4452_s28 + $0x470] sm:$0xff] }
 0x166   : > { %2511 = vmatpush2.msra.mxu1 %v1159_v25  ;;  %v1534_v42 = vpop.f32.mrf.mxu1  ;;  %1889 = vmatprep.mubr.f32.mxu0 %v5911_v51  ;;  %v5923_v25 = vld [vmem:[#allocation51_spill] sm:$0xff]  ;;  %v1130_v51 = vld [vmem:[%s4452_s28 + $0xa48] sm:$0xff] }
 0x167   : > { %3549 = vst [vmem:[%s5136_s27 + $0x98] sm:$0xff] %v3357_v35  ;;  %v3362_v49 = vadd.f32 %v5117_v17, %v1533_v40  ;;  %v1535_v50 = vadd.f32 %v1534_v42, %v1277_v41  ;;  %2146 = vmatprep.mubr.f32.mxu1 %v5912_v56  ;;  %v1281_v59 = vpop.f32.mrf.mxu0  ;;  %1890 = vmatmul.mubr.f32.gmra.mxu0 %v5913_v1  ;;  %v3980_v40 = vld [vmem:[#allocation3 + $0x300] sm:$0xff]  ;;  %v3981_v41 = vld [vmem:[#allocation3 + $0x310] sm:$0xff] }
 0x168   : > { %v1538_v0 = vpop.f32.mrf.mxu1  ;;  %2147 = vmatmul.mubr.f32.gmra.mxu1 %v5914_v2  ;;  %2255 = vmatprep.subr.mxu0 %v962_v43  ;;  %v1129_v1 = vld [vmem:[%s4452_s28 + $0xa40] sm:$0xff] }
 0x169   : > { %3554 = vst [vmem:[%s5136_s27 + $0xc0] sm:$0xff] %v3362_v49  ;;  %v3363_v3 = vadd.f32 %v5123_v33, %v1535_v50  ;;  %v1539_v8 = vadd.f32 %v1538_v0, %v1281_v59  ;;  %2512 = vmatprep.subr.mxu1 %v1154_v48  ;;  %2256 = vmatpush2.msra.mxu0 %v961_v57  ;;  %v1283_v9 = vpop.f32.mrf.mxu0  ;;  %v938_v50 = vld [vmem:[%s4452_s28 + $0x448] sm:$0xff]  ;;  %v5229_v59 = vld [vmem:[#allocation3 + $0x338] sm:$0xff]  ;;  %v937_v0 = vld [vmem:[%s4452_s28 + $0x440] sm:$0xff] }
 0x16a   : > { %2513 = vmatpush2.msra.mxu1 %v1153_v58  ;;  %v1540_v10 = vpop.f32.mrf.mxu1  ;;  %1895 = vmatprep.mubr.f32.mxu0 %v5915_v23  ;;  %v5226_v58 = vld [vmem:[#allocation3 + $0x328] sm:$0xff]  ;;  %v1124_v23 = vld [vmem:[%s4452_s28 + $0xa18] sm:$0xff] }
 0x16b   : > { %3555 = vst [vmem:[%s5136_s27 + $0xc8] sm:$0xff] %v3363_v3  ;;  %v3368_v21 = vadd.f32 %v5117_v17, %v1539_v8  ;;  %v1541_v22 = vadd.f32 %v1540_v10, %v1283_v9  ;;  %2152 = vmatprep.mubr.f32.mxu1 %v5916_v36  ;;  %v1287_v39 = vpop.f32.mrf.mxu0  ;;  %1896 = vmatmul.mubr.f32.gmra.mxu0 %v5917_v53  ;;  %v5234_v8 = vld [vmem:[#allocation3 + $0x320] sm:$0xff]  ;;  %v5237_v9 = vld [vmem:[#allocation3 + $0x330] sm:$0xff] }
 0x16c   : > { %v1544_v52 = vpop.f32.mrf.mxu1  ;;  %2153 = vmatmul.mubr.f32.gmra.mxu1 %v5918_v54  ;;  %2257 = vmatprep.subr.mxu0 %v956_v11  ;;  %v1123_v53 = vld [vmem:[%s4452_s28 + $0xa10] sm:$0xff] }
 0x16d   : > { %3560 = vst [vmem:[%s5136_s27 + $0xf0] sm:$0xff] %v3368_v21  ;;  %v3369_v55 = vadd.f32 %v5123_v33, %v1541_v22  ;;  %v1545_v4 = vadd.f32 %v1544_v52, %v1287_v39  ;;  %2514 = vmatprep.subr.mxu1 %v1148_v20  ;;  %2258 = vmatpush2.msra.mxu0 %v955_v37  ;;  %v1289_v5 = vpop.f32.mrf.mxu0  ;;  %v932_v22 = vld [vmem:[%s4452_s28 + $0x418] sm:$0xff]  ;;  %v931_v52 = vld [vmem:[%s4452_s28 + $0x410] sm:$0xff] }
 0x16e   : > { %2515 = vmatpush2.msra.mxu1 %v1147_v38  ;;  %v1546_v62 = vpop.f32.mrf.mxu1  ;;  %1901 = vmatprep.mubr.f32.mxu0 %v5919_v14  ;;  %v5246_v38 = vld [vmem:[#allocation3 + $0x348] sm:$0xff]  ;;  %v5249_v39 = vld [vmem:[#allocation3 + $0x358] sm:$0xff] }
 0x16f   : > { %3561 = vst [vmem:[%s5136_s27 + $0xf8] sm:$0xff] %v3369_v55  ;;  %v3374_v12 = vadd.f32 %v5117_v17, %v1545_v4  ;;  %v1547_v13 = vadd.f32 %v1546_v62, %v1289_v5  ;;  %2158 = vmatprep.mubr.f32.mxu1 %v5920_v28  ;;  %v1293_v47 = vpop.f32.mrf.mxu0  ;;  %1902 = vmatmul.mubr.f32.gmra.mxu0 %v5921_v45  ;;  %v5254_v4 = vld [vmem:[#allocation3 + $0x340] sm:$0xff]  ;;  %v5257_v5 = vld [vmem:[#allocation3 + $0x350] sm:$0xff]  ;;  %v1118_v14 = vld [vmem:[%s4452_s28 + $0x9e8] sm:$0xff] }
 0x170   : > { %v1550_v46 = vpop.f32.mrf.mxu1  ;;  %2159 = vmatmul.mubr.f32.gmra.mxu1 %v5922_v44  ;;  %2259 = vmatprep.subr.mxu0 %v950_v7  ;;  %v1117_v45 = vld [vmem:[%s4452_s28 + $0x9e0] sm:$0xff] }
 0x171   : > { %3566 = vst [vmem:[%s5136_s27 + $0x120] sm:$0xff] %v3374_v12  ;;  %v3375_v30 = vadd.f32 %v5123_v33, %v1547_v13  ;;  %v1551_v31 = vadd.f32 %v1550_v46, %v1293_v47  ;;  %2516 = vmatprep.subr.mxu1 %v1142_v63  ;;  %2260 = vmatpush2.msra.mxu0 %v949_v29  ;;  %v1295_v60 = vpop.f32.mrf.mxu0  ;;  %v926_v13 = vld [vmem:[%s4452_s28 + $0x3e8] sm:$0xff]  ;;  %v5269_v47 = vld [vmem:[#allocation3 + $0x378] sm:$0xff]  ;;  %v925_v46 = vld [vmem:[%s4452_s28 + $0x3e0] sm:$0xff] }
 0x172   : > { %2517 = vmatpush2.msra.mxu1 %v1141_v15  ;;  %v1552_v61 = vpop.f32.mrf.mxu1  ;;  %1907 = vmatprep.mubr.f32.mxu0 %v5923_v25  ;;  %v5266_v15 = vld [vmem:[#allocation3 + $0x368] sm:$0xff]  ;;  %v1112_v25 = vld [vmem:[%s4452_s28 + $0x9b8] sm:$0xff] }
 0x173   : > { %3567 = vst [vmem:[%s5136_s27 + $0x128] sm:$0xff] %v3375_v30  ;;  %v3380_v19 = vadd.f32 %v5117_v17, %v1551_v31  ;;  %v1553_v24 = vadd.f32 %v1552_v61, %v1295_v60  ;;  %2164 = vmatprep.mubr.f32.mxu1 %v5924_v26  ;;  %v1299_v34 = vpop.f32.mrf.mxu0  ;;  %1908 = vmatmul.mubr.f32.gmra.mxu0 %v3980_v40  ;;  %v5274_v31 = vld [vmem:[#allocation3 + $0x360] sm:$0xff]  ;;  %v5277_v60 = vld [vmem:[#allocation3 + $0x370] sm:$0xff] }
 0x174   : > { %v1556_v35 = vpop.f32.mrf.mxu1  ;;  %2165 = vmatmul.mubr.f32.gmra.mxu1 %v3981_v41  ;;  %2261 = vmatprep.subr.mxu0 %v944_v16  ;;  %v1111_v40 = vld [vmem:[%s4452_s28 + $0x9b0] sm:$0xff] }
 0x175   : > { %3572 = vst [vmem:[%s5136_s27 + $0x150] sm:$0xff] %v3380_v19  ;;  %v3381_v42 = vadd.f32 %v5123_v33, %v1553_v24  ;;  %v1557_v43 = vadd.f32 %v1556_v35, %v1299_v34  ;;  %2518 = vmatprep.subr.mxu1 %v1136_v18  ;;  %2262 = vmatpush2.msra.mxu0 %v943_v27  ;;  %v1301_v48 = vpop.f32.mrf.mxu0  ;;  %v920_v24 = vld [vmem:[%s4452_s28 + $0x3b8] sm:$0xff]  ;;  %v919_v35 = vld [vmem:[%s4452_s28 + $0x3b0] sm:$0xff] }
 0x176   : > { %2519 = vmatpush2.msra.mxu1 %v1135_v32  ;;  %v1558_v49 = vpop.f32.mrf.mxu1  ;;  %1913 = vmatprep.mubr.f32.mxu0 %v5226_v58  ;;  %v5286_v32 = vld [vmem:[#allocation3 + $0x388] sm:$0xff]  ;;  %v5289_v34 = vld [vmem:[#allocation3 + $0x398] sm:$0xff] }
 0x177   : > { %3573 = vst [vmem:[%s5136_s27 + $0x158] sm:$0xff] %v3381_v42  ;;  %v3386_v56 = vadd.f32 %v5117_v17, %v1557_v43  ;;  %v1559_v57 = vadd.f32 %v1558_v49, %v1301_v48  ;;  %2170 = vmatprep.mubr.f32.mxu1 %v5229_v59  ;;  %v1305_v2 = vpop.f32.mrf.mxu0  ;;  %1914 = vmatmul.mubr.f32.gmra.mxu0 %v5234_v8  ;;  %v5294_v43 = vld [vmem:[#allocation3 + $0x380] sm:$0xff]  ;;  %v5297_v48 = vld [vmem:[#allocation3 + $0x390] sm:$0xff] }
 0x178   : > { %v1562_v3 = vpop.f32.mrf.mxu1  ;;  %2171 = vmatmul.mubr.f32.gmra.mxu1 %v5237_v9  ;;  %2263 = vmatprep.subr.mxu0 %v938_v50 }
 0x179   : > { %3578 = vst [vmem:[%s5136_s27 + $0x180] sm:$0xff] %v3386_v56  ;;  %v3387_v10 = vadd.f32 %v5123_v33, %v1559_v57  ;;  %v1563_v11 = vadd.f32 %v1562_v3, %v1305_v2  ;;  %2520 = vmatprep.subr.mxu1 %v1130_v51  ;;  %2264 = vmatpush2.msra.mxu0 %v937_v0  ;;  %v1307_v20 = vpop.f32.mrf.mxu0  ;;  %v914_v57 = vld [vmem:[%s4452_s28 + $0x388] sm:$0xff] }
 0x17a   : > { %2521 = vmatpush2.msra.mxu1 %v1129_v1  ;;  %v1564_v21 = vpop.f32.mrf.mxu1  ;;  %1919 = vmatprep.mubr.f32.mxu0 %v5246_v38  ;;  %v1106_v0 = vld [vmem:[%s4452_s28 + $0x988] sm:$0xff] }
 0x17b   : > { %3579 = vst [vmem:[%s5136_s27 + $0x188] sm:$0xff] %v3387_v10  ;;  %v3392_v36 = vadd.f32 %v5117_v17, %v1563_v11  ;;  %v1565_v37 = vadd.f32 %v1564_v21, %v1307_v20  ;;  %2176 = vmatprep.mubr.f32.mxu1 %v5249_v39  ;;  %v1311_v54 = vpop.f32.mrf.mxu0  ;;  %1920 = vmatmul.mubr.f32.gmra.mxu0 %v5254_v4  ;;  %v5306_v3 = vld [vmem:[#allocation3 + $0x3a8] sm:$0xff]  ;;  %v5309_v10 = vld [vmem:[#allocation3 + $0x3b8] sm:$0xff]  ;;  %v913_v11 = vld [vmem:[%s4452_s28 + $0x380] sm:$0xff] }
 0x17c   : > { %v1568_v55 = vpop.f32.mrf.mxu1  ;;  %2177 = vmatmul.mubr.f32.gmra.mxu1 %v5257_v5  ;;  %2265 = vmatprep.subr.mxu0 %v932_v22  ;;  %v1105_v20 = vld [vmem:[%s4452_s28 + $0x980] sm:$0xff] }
 0x17d   : > { %3584 = vst [vmem:[%s5136_s27 + $0x1b0] sm:$0xff] %v3392_v36  ;;  %v3393_v62 = vadd.f32 %v5123_v33, %v1565_v37  ;;  %v1569_v7 = vadd.f32 %v1568_v55, %v1311_v54  ;;  %2522 = vmatprep.subr.mxu1 %v1124_v23  ;;  %2266 = vmatpush2.msra.mxu0 %v931_v52  ;;  %v1313_v63 = vpop.f32.mrf.mxu0  ;;  %v5314_v23 = vld [vmem:[#allocation3 + $0x3a0] sm:$0xff]  ;;  %v5317_v36 = vld [vmem:[#allocation3 + $0x3b0] sm:$0xff]  ;;  %v908_v55 = vld [vmem:[%s4452_s28 + $0x358] sm:$0xff] }
 0x17e   : > { %2523 = vmatpush2.msra.mxu1 %v1123_v53  ;;  %v1570_v12 = vpop.f32.mrf.mxu1  ;;  %1925 = vmatprep.mubr.f32.mxu0 %v5266_v15 }
 0x17f   : > { %3585 = vst [vmem:[%s5136_s27 + $0x1b8] sm:$0xff] %v3393_v62  ;;  %v3398_v28 = vadd.f32 %v5117_v17, %v1569_v7  ;;  %v1571_v29 = vadd.f32 %v1570_v12, %v1313_v63  ;;  %2182 = vmatprep.mubr.f32.mxu1 %v5269_v47  ;;  %v1317_v44 = vpop.f32.mrf.mxu0  ;;  %1926 = vmatmul.mubr.f32.gmra.mxu0 %v5274_v31  ;;  %v1100_v62 = vld [vmem:[%s4452_s28 + $0x958] sm:$0xff]  ;;  %v5326_v12 = vld [vmem:[#allocation3 + $0x3c8] sm:$0xff] }
 0x180   : > { %v1574_v30 = vpop.f32.mrf.mxu1  ;;  %2183 = vmatmul.mubr.f32.gmra.mxu1 %v5277_v60  ;;  %2267 = vmatprep.subr.mxu0 %v926_v13  ;;  %v5329_v13 = vld [vmem:[#allocation3 + $0x3d8] sm:$0xff] }
 0x181   : > { %3590 = vst [vmem:[%s5136_s27 + $0x1e0] sm:$0xff] %v3398_v28  ;;  %v3399_v61 = vadd.f32 %v5123_v33, %v1571_v29  ;;  %v1575_v16 = vadd.f32 %v1574_v30, %v1317_v44  ;;  %2524 = vmatprep.subr.mxu1 %v1118_v14  ;;  %2268 = vmatpush2.msra.mxu0 %v925_v46  ;;  %v1319_v18 = vpop.f32.mrf.mxu0  ;;  %v907_v14 = vld [vmem:[%s4452_s28 + $0x350] sm:$0xff] }
 0x182   : > { %2525 = vmatpush2.msra.mxu1 %v1117_v45  ;;  %v1576_v19 = vpop.f32.mrf.mxu1  ;;  %1931 = vmatprep.mubr.f32.mxu0 %v5286_v32  ;;  %v1099_v28 = vld [vmem:[%s4452_s28 + $0x950] sm:$0xff]  ;;  %v5334_v45 = vld [vmem:[#allocation3 + $0x3c0] sm:$0xff] }
 0x183   : > { %3591 = vst [vmem:[%s5136_s27 + $0x1e8] sm:$0xff] %v3399_v61  ;;  %v3404_v26 = vadd.f32 %v5117_v17, %v1575_v16  ;;  %v1577_v27 = vadd.f32 %v1576_v19, %v1319_v18  ;;  %2188 = vmatprep.mubr.f32.mxu1 %v5289_v34  ;;  %v1323_v41 = vpop.f32.mrf.mxu0  ;;  %1932 = vmatmul.mubr.f32.gmra.mxu0 %v5294_v43  ;;  %v5337_v44 = vld [vmem:[#allocation3 + $0x3d0] sm:$0xff]  ;;  %v902_v19 = vld [vmem:[%s4452_s28 + $0x328] sm:$0xff] }
 0x184   : > { %v1580_v42 = vpop.f32.mrf.mxu1  ;;  %2189 = vmatmul.mubr.f32.gmra.mxu1 %v5297_v48  ;;  %2269 = vmatprep.subr.mxu0 %v920_v24  ;;  %v1094_v24 = vld [vmem:[%s4452_s28 + $0x928] sm:$0xff] }
 0x185   : > { %3596 = vst [vmem:[%s5136_s27 + $0x210] sm:$0xff] %v3404_v26  ;;  %v3405_v49 = vadd.f32 %v5123_v33, %v1577_v27  ;;  %v1581_v50 = vadd.f32 %v1580_v42, %v1323_v41  ;;  %2526 = vmatprep.subr.mxu1 %v1112_v25  ;;  %2270 = vmatpush2.msra.mxu0 %v919_v35  ;;  %v1325_v51 = vpop.f32.mrf.mxu0  ;;  %v5346_v27 = vld [vmem:[#allocation3 + $0x3e8] sm:$0xff]  ;;  %v5349_v35 = vld [vmem:[#allocation3 + $0x3f8] sm:$0xff]  ;;  %v1093_v41 = vld [vmem:[%s4452_s28 + $0x920] sm:$0xff] }
 0x186   : > { %2527 = vmatpush2.msra.mxu1 %v1111_v40  ;;  %v1582_v56 = vpop.f32.mrf.mxu1  ;;  %1937 = vmatprep.mubr.f32.mxu0 %v5306_v3  ;;  %v901_v40 = vld [vmem:[%s4452_s28 + $0x320] sm:$0xff] }
 0x187   : > { %3597 = vst [vmem:[%s5136_s27 + $0x218] sm:$0xff] %v3405_v49  ;;  %v3410_v1 = vadd.f32 %v5117_v17, %v1581_v50  ;;  %v1583_v2 = vadd.f32 %v1582_v56, %v1325_v51  ;;  %2194 = vmatprep.mubr.f32.mxu1 %v5309_v10  ;;  %v1329_v21 = vpop.f32.mrf.mxu0  ;;  %1938 = vmatmul.mubr.f32.gmra.mxu0 %v5314_v23  ;;  %v5354_v50 = vld [vmem:[#allocation3 + $0x3e0] sm:$0xff]  ;;  %v5357_v51 = vld [vmem:[#allocation3 + $0x3f0] sm:$0xff] }
 0x188   : > { %v1586_v22 = vpop.f32.mrf.mxu1  ;;  %2195 = vmatmul.mubr.f32.gmra.mxu1 %v5317_v36  ;;  %2271 = vmatprep.subr.mxu0 %v914_v57 }
 0x189   : > { %3602 = vst [vmem:[%s5136_s27 + $0x240] sm:$0xff] %v3410_v1  ;;  %v3411_v37 = vadd.f32 %v5123_v33, %v1583_v2  ;;  %v1587_v52 = vadd.f32 %v1586_v22, %v1329_v21  ;;  %2528 = vmatprep.subr.mxu1 %v1106_v0  ;;  %2272 = vmatpush2.msra.mxu0 %v913_v11  ;;  %v1331_v53 = vpop.f32.mrf.mxu0  ;;  %v4011_v21 = vld [vmem:[#allocation3 + $0x18] sm:$0xff] }
 0x18a   : > { %2529 = vmatpush2.msra.mxu1 %v1105_v20  ;;  %v1588_v54 = vpop.f32.mrf.mxu1  ;;  %1943 = vmatprep.mubr.f32.mxu0 %v5326_v12  ;;  %v4010_v20 = vld [vmem:[#allocation3 + $0x8] sm:$0xff] }
 0x18b   : > { %3603 = vst [vmem:[%s5136_s27 + $0x248] sm:$0xff] %v3411_v37  ;;  %v3416_v7 = vadd.f32 %v5117_v17, %v1587_v52  ;;  %v1589_v63 = vadd.f32 %v1588_v54, %v1331_v53  ;;  %2200 = vmatprep.mubr.f32.mxu1 %v5329_v13  ;;  %v1335_v29 = vpop.f32.mrf.mxu0  ;;  %1944 = vmatmul.mubr.f32.gmra.mxu0 %v5334_v45  ;;  %v4012_v52 = vld [vmem:[#allocation3] sm:$0xff]  ;;  %v4013_v53 = vld [vmem:[#allocation3 + $0x10] sm:$0xff] }
 0x18c   : > { %v1592_v46 = vpop.f32.mrf.mxu1  ;;  %2201 = vmatmul.mubr.f32.gmra.mxu1 %v5337_v44  ;;  %2273 = vmatprep.subr.mxu0 %v908_v55 }
 0x18d   : > { %3608 = vst [vmem:[%s5136_s27 + $0x270] sm:$0xff] %v3416_v7  ;;  %v3417_v30 = vadd.f32 %v5123_v33, %v1589_v63  ;;  %v1593_v61 = vadd.f32 %v1592_v46, %v1335_v29  ;;  %2530 = vmatprep.subr.mxu1 %v1100_v62  ;;  %2274 = vmatpush2.msra.mxu0 %v907_v14  ;;  %v1337_v16 = vpop.f32.mrf.mxu0  ;;  %v4014_v62 = vld [vmem:[#allocation3 + $0x28] sm:$0xff]  ;;  %v4015_v7 = vld [vmem:[#allocation3 + $0x38] sm:$0xff] }
 0x18e   : > { %2531 = vmatpush2.msra.mxu1 %v1099_v28  ;;  %v1594_v18 = vpop.f32.mrf.mxu1  ;;  %1949 = vmatprep.mubr.f32.mxu0 %v5346_v27 }
 0x18f   : > { %3609 = vst [vmem:[%s5136_s27 + $0x278] sm:$0xff] %v3417_v30  ;;  %v3422_v25 = vadd.f32 %v5117_v17, %v1593_v61  ;;  %v1595_v26 = vadd.f32 %v1594_v18, %v1337_v16  ;;  %2206 = vmatprep.mubr.f32.mxu1 %v5349_v35  ;;  %v1341_v42 = vpop.f32.mrf.mxu0  ;;  %1950 = vmatmul.mubr.f32.gmra.mxu0 %v5354_v50  ;;  %v4016_v61 = vld [vmem:[#allocation3 + $0x20] sm:$0xff]  ;;  %v4017_v16 = vld [vmem:[#allocation3 + $0x30] sm:$0xff] }
 0x190   : > { %v1598_v49 = vpop.f32.mrf.mxu1  ;;  %2207 = vmatmul.mubr.f32.gmra.mxu1 %v5357_v51  ;;  %2275 = vmatprep.subr.mxu0 %v902_v19 }
 0x191   : > { %3614 = vst [vmem:[%s5136_s27 + $0x2a0] sm:$0xff] %v3422_v25  ;;  %v3423_v56 = vadd.f32 %v5123_v33, %v1595_v26  ;;  %v1599_v57 = vadd.f32 %v1598_v49, %v1341_v42  ;;  %2532 = vmatprep.subr.mxu1 %v1094_v24  ;;  %2276 = vmatpush2.msra.mxu0 %v901_v40  ;;  %v1343_v0 = vpop.f32.mrf.mxu0  ;;  %v4018_v24 = vld [vmem:[#allocation3 + $0x48] sm:$0xff]  ;;  %v4019_v25 = vld [vmem:[#allocation3 + $0x58] sm:$0xff] }
 0x192   : > { %2533 = vmatpush2.msra.mxu1 %v1093_v41  ;;  %v1600_v1 = vpop.f32.mrf.mxu1  ;;  %2277 = vmatprep.mubr.f32.mxu0 %v4010_v20  ;;  %v4023_v20 = vld [vmem:[#allocation3 + $0x78] sm:$0xff] }
 0x193   : > { %3615 = vst [vmem:[%s5136_s27 + $0x2a8] sm:$0xff] %v3423_v56  ;;  %v3428_v2 = vadd.f32 %v5117_v17, %v1599_v57  ;;  %v1601_v11 = vadd.f32 %v1600_v1, %v1343_v0  ;;  %2534 = vmatprep.mubr.f32.mxu1 %v4011_v21  ;;  %v1347_v22 = vpop.f32.mrf.mxu0  ;;  %2278 = vmatmul.mubr.f32.vlgmr.msra.gmra.mxu0 %v4012_v52  ;;  %v4020_v57 = vld [vmem:[#allocation3 + $0x40] sm:$0xff]  ;;  %v4021_v0 = vld [vmem:[#allocation3 + $0x50] sm:$0xff] }
 0x194   : > { %v1604_v37 = vpop.f32.mrf.mxu1  ;;  %2535 = vmatmul.mubr.f32.vlgmr.msra.gmra.mxu1 %v4013_v53  ;;  %2283 = vmatprep.mubr.f32.mxu0 %v4014_v62  ;;  %v4025_v62 = vld [vmem:[#allocation3 + $0x70] sm:$0xff] }
 0x195   : > { %3620 = vst [vmem:[%s5136_s27 + $0x2d0] sm:$0xff] %v3428_v2  ;;  %v3429_v54 = vadd.f32 %v5123_v33, %v1601_v11  ;;  %v1605_v55 = vadd.f32 %v1604_v37, %v1347_v22  ;;  %2540 = vmatprep.mubr.f32.mxu1 %v4015_v7  ;;  %v1349_v63 = vpop.f32.mrf.mxu0  ;;  %v4022_v11 = vld [vmem:[#allocation3 + $0x68] sm:$0xff] }
 0x196   : > { %v1606_v14 = vpop.f32.mrf.mxu1 }
 0x197   : > { %3621 = vst [vmem:[%s5136_s27 + $0x2d8] sm:$0xff] %v3429_v54  ;;  %v3434_v28 = vadd.f32 %v5117_v17, %v1605_v55  ;;  %v1607_v29 = vadd.f32 %v1606_v14, %v1349_v63  ;;  %v1353_v46 = vpop.f32.mrf.mxu0  ;;  %2284 = vmatmul.mubr.f32.gmra.mxu0 %v4016_v61  ;;  %v4024_v55 = vld [vmem:[#allocation3 + $0x60] sm:$0xff]  ;;  %v4026_v14 = vld [vmem:[#allocation3 + $0x88] sm:$0xff] }
 0x198   : > { %v1610_v30 = vpop.f32.mrf.mxu1  ;;  %2541 = vmatmul.mubr.f32.gmra.mxu1 %v4017_v16  ;;  %2289 = vmatprep.mubr.f32.mxu0 %v4018_v24  ;;  %v4029_v24 = vld [vmem:[#allocation3 + $0x90] sm:$0xff] }
 0x199   : > { %3626 = vst [vmem:[%s5136_s27 + $0x300] sm:$0xff] %v3434_v28  ;;  %v3435_v18 = vadd.f32 %v5123_v33, %v1607_v29  ;;  %v1611_v19 = vadd.f32 %v1610_v30, %v1353_v46  ;;  %2546 = vmatprep.mubr.f32.mxu1 %v4019_v25  ;;  %v1355_v26 = vpop.f32.mrf.mxu0  ;;  %v4027_v28 = vld [vmem:[#allocation3 + $0x98] sm:$0xff] }
 0x19a   : > { %v1612_v40 = vpop.f32.mrf.mxu1 }
 0x19b   : > { %3627 = vst [vmem:[%s5136_s27 + $0x308] sm:$0xff] %v3435_v18  ;;  %v3440_v41 = vadd.f32 %v5117_v17, %v1611_v19  ;;  %v1613_v42 = vadd.f32 %v1612_v40, %v1355_v26  ;;  %v1359_v49 = vpop.f32.mrf.mxu0  ;;  %2290 = vmatmul.mubr.f32.gmra.mxu0 %v4020_v57  ;;  %v4028_v19 = vld [vmem:[#allocation3 + $0x80] sm:$0xff]  ;;  %v4030_v40 = vld [vmem:[#allocation3 + $0xa8] sm:$0xff] }
 0x19c   : > { %v1616_v56 = vpop.f32.mrf.mxu1  ;;  %2547 = vmatmul.mubr.f32.gmra.mxu1 %v4021_v0  ;;  %2295 = vmatprep.mubr.f32.mxu0 %v4022_v11  ;;  %v4033_v11 = vld [vmem:[#allocation3 + $0xb0] sm:$0xff] }
 0x19d   : > { %3632 = vst [vmem:[%s5136_s27 + $0x330] sm:$0xff] %v3440_v41  ;;  %v3441_v1 = vadd.f32 %v5123_v33, %v1613_v42  ;;  %v1617_v2 = vadd.f32 %v1616_v56, %v1359_v49  ;;  %2552 = vmatprep.mubr.f32.mxu1 %v4023_v20  ;;  %v1361_v21 = vpop.f32.mrf.mxu0  ;;  %v4031_v41 = vld [vmem:[#allocation3 + $0xb8] sm:$0xff] }
 0x19e   : > { %v1618_v22 = vpop.f32.mrf.mxu1 }
 0x19f   : > { %3633 = vst [vmem:[%s5136_s27 + $0x338] sm:$0xff] %v3441_v1  ;;  %v3446_v37 = vadd.f32 %v5117_v17, %v1617_v2  ;;  %v1619_v52 = vadd.f32 %v1618_v22, %v1361_v21  ;;  %v1365_v53 = vpop.f32.mrf.mxu0  ;;  %2296 = vmatmul.mubr.f32.gmra.mxu0 %v4024_v55  ;;  %v4032_v2 = vld [vmem:[#allocation3 + $0xa0] sm:$0xff]  ;;  %v4034_v22 = vld [vmem:[#allocation3 + $0xc8] sm:$0xff] }
 0x1a0   : > { %v1622_v54 = vpop.f32.mrf.mxu1  ;;  %2553 = vmatmul.mubr.f32.gmra.mxu1 %v4025_v62  ;;  %2301 = vmatprep.mubr.f32.mxu0 %v4026_v14  ;;  %v4037_v14 = vld [vmem:[#allocation3 + $0xd0] sm:$0xff] }
 0x1a1   : > { %3638 = vst [vmem:[%s5136_s27 + $0x360] sm:$0xff] %v3446_v37  ;;  %v3447_v7 = vadd.f32 %v5123_v33, %v1619_v52  ;;  %v1623_v63 = vadd.f32 %v1622_v54, %v1365_v53  ;;  %2558 = vmatprep.mubr.f32.mxu1 %v4027_v28  ;;  %v1367_v29 = vpop.f32.mrf.mxu0  ;;  %v4035_v37 = vld [vmem:[#allocation3 + $0xd8] sm:$0xff] }
 0x1a2   : > { %v1624_v46 = vpop.f32.mrf.mxu1 }
 0x1a3   : > { %3639 = vst [vmem:[%s5136_s27 + $0x368] sm:$0xff] %v3447_v7  ;;  %v3452_v30 = vadd.f32 %v5117_v17, %v1623_v63  ;;  %v1625_v61 = vadd.f32 %v1624_v46, %v1367_v29  ;;  %v1371_v16 = vpop.f32.mrf.mxu0  ;;  %2302 = vmatmul.mubr.f32.gmra.mxu0 %v4028_v19  ;;  %v4036_v63 = vld [vmem:[#allocation3 + $0xc0] sm:$0xff]  ;;  %v4038_v46 = vld [vmem:[#allocation3 + $0xe8] sm:$0xff] }
 0x1a4   : > { %v1628_v18 = vpop.f32.mrf.mxu1  ;;  %2559 = vmatmul.mubr.f32.gmra.mxu1 %v4029_v24  ;;  %2307 = vmatprep.mubr.f32.mxu0 %v4030_v40  ;;  %v4041_v40 = vld [vmem:[#allocation3 + $0xf0] sm:$0xff] }
 0x1a5   : > { %3644 = vst [vmem:[%s5136_s27 + $0x390] sm:$0xff] %v3452_v30  ;;  %v3453_v25 = vadd.f32 %v5123_v33, %v1625_v61  ;;  %v1629_v26 = vadd.f32 %v1628_v18, %v1371_v16  ;;  %2564 = vmatprep.mubr.f32.mxu1 %v4031_v41  ;;  %v1373_v42 = vpop.f32.mrf.mxu0  ;;  %v4039_v30 = vld [vmem:[#allocation3 + $0xf8] sm:$0xff] }
 0x1a6   : > { %v1630_v49 = vpop.f32.mrf.mxu1 }
 0x1a7   : > { %3645 = vst [vmem:[%s5136_s27 + $0x398] sm:$0xff] %v3453_v25  ;;  %v3458_v56 = vadd.f32 %v5117_v17, %v1629_v26  ;;  %v1631_v57 = vadd.f32 %v1630_v49, %v1373_v42  ;;  %v1377_v0 = vpop.f32.mrf.mxu0  ;;  %2308 = vmatmul.mubr.f32.gmra.mxu0 %v4032_v2  ;;  %v4040_v26 = vld [vmem:[#allocation3 + $0xe0] sm:$0xff]  ;;  %v4042_v49 = vld [vmem:[#allocation3 + $0x108] sm:$0xff] }
 0x1a8   : > { %v1634_v1 = vpop.f32.mrf.mxu1  ;;  %2565 = vmatmul.mubr.f32.gmra.mxu1 %v4033_v11  ;;  %2313 = vmatprep.mubr.f32.mxu0 %v4034_v22  ;;  %v4045_v22 = vld [vmem:[#allocation3 + $0x110] sm:$0xff] }
 0x1a9   : > { %3650 = vst [vmem:[%s5136_s27 + $0x3c0] sm:$0xff] %v3458_v56  ;;  %v3459_v20 = vadd.f32 %v5123_v33, %v1631_v57  ;;  %v1635_v21 = vadd.f32 %v1634_v1, %v1377_v0  ;;  %2570 = vmatprep.mubr.f32.mxu1 %v4035_v37  ;;  %v1379_v52 = vpop.f32.mrf.mxu0  ;;  %v4043_v56 = vld [vmem:[#allocation3 + $0x118] sm:$0xff] }
 0x1aa   : > { %v1636_v53 = vpop.f32.mrf.mxu1 }
 0x1ab   : > { %3651 = vst [vmem:[%s5136_s27 + $0x3c8] sm:$0xff] %v3459_v20  ;;  %v3464_v54 = vadd.f32 %v5117_v17, %v1635_v21  ;;  %v1637_v55 = vadd.f32 %v1636_v53, %v1379_v52  ;;  %v1383_v62 = vpop.f32.mrf.mxu0  ;;  %2314 = vmatmul.mubr.f32.gmra.mxu0 %v4036_v63  ;;  %v4044_v21 = vld [vmem:[#allocation3 + $0x100] sm:$0xff]  ;;  %v4046_v53 = vld [vmem:[#allocation3 + $0x128] sm:$0xff] }
 0x1ac   : > { %v1640_v7 = vpop.f32.mrf.mxu1  ;;  %2571 = vmatmul.mubr.f32.gmra.mxu1 %v4037_v14  ;;  %2319 = vmatprep.mubr.f32.mxu0 %v4038_v46  ;;  %v4049_v46 = vld [vmem:[#allocation3 + $0x130] sm:$0xff] }
 0x1ad   : > { %3656 = vst [vmem:[%s5136_s27 + $0x3f0] sm:$0xff] %v3464_v54  ;;  %v3465_v28 = vadd.f32 %v5123_v33, %v1637_v55  ;;  %v1641_v29 = vadd.f32 %v1640_v7, %v1383_v62  ;;  %2576 = vmatprep.mubr.f32.mxu1 %v4039_v30  ;;  %v1385_v61 = vpop.f32.mrf.mxu0  ;;  %v4047_v54 = vld [vmem:[#allocation3 + $0x138] sm:$0xff] }
 0x1ae   : > { %v1642_v16 = vpop.f32.mrf.mxu1 }
 0x1af   : > { %3657 = vst [vmem:[%s5136_s27 + $0x3f8] sm:$0xff] %v3465_v28  ;;  %v3470_v18 = vadd.f32 %v5117_v17, %v1641_v29  ;;  %v1643_v19 = vadd.f32 %v1642_v16, %v1385_v61  ;;  %v1389_v24 = vpop.f32.mrf.mxu0  ;;  %2320 = vmatmul.mubr.f32.gmra.mxu0 %v4040_v26  ;;  %v4048_v29 = vld [vmem:[#allocation3 + $0x120] sm:$0xff]  ;;  %v4050_v16 = vld [vmem:[#allocation3 + $0x148] sm:$0xff] }
 0x1b0   : > { %v1646_v25 = vpop.f32.mrf.mxu1  ;;  %2577 = vmatmul.mubr.f32.gmra.mxu1 %v4041_v40  ;;  %2325 = vmatprep.mubr.f32.mxu0 %v4042_v49  ;;  %v4053_v49 = vld [vmem:[#allocation3 + $0x150] sm:$0xff] }
 0x1b1   : > { %3662 = vst [vmem:[%s5136_s27 + $0x420] sm:$0xff] %v3470_v18  ;;  %v3471_v41 = vadd.f32 %v5123_v33, %v1643_v19  ;;  %v1647_v42 = vadd.f32 %v1646_v25, %v1389_v24  ;;  %2582 = vmatprep.mubr.f32.mxu1 %v4043_v56  ;;  %v1391_v57 = vpop.f32.mrf.mxu0  ;;  %v4051_v18 = vld [vmem:[#allocation3 + $0x158] sm:$0xff] }
 0x1b2   : > { %v1648_v0 = vpop.f32.mrf.mxu1 }
 0x1b3   : > { %3663 = vst [vmem:[%s5136_s27 + $0x428] sm:$0xff] %v3471_v41  ;;  %v3476_v1 = vadd.f32 %v5117_v17, %v1647_v42  ;;  %v1649_v2 = vadd.f32 %v1648_v0, %v1391_v57  ;;  %v1395_v11 = vpop.f32.mrf.mxu0  ;;  %2326 = vmatmul.mubr.f32.gmra.mxu0 %v4044_v21  ;;  %v4052_v42 = vld [vmem:[#allocation3 + $0x140] sm:$0xff]  ;;  %v4054_v0 = vld [vmem:[#allocation3 + $0x168] sm:$0xff] }
 0x1b4   : > { %v1652_v20 = vpop.f32.mrf.mxu1  ;;  %2583 = vmatmul.mubr.f32.gmra.mxu1 %v4045_v22  ;;  %2331 = vmatprep.mubr.f32.mxu0 %v4046_v53  ;;  %v4057_v53 = vld [vmem:[#allocation3 + $0x170] sm:$0xff] }
 0x1b5   : > { %3668 = vst [vmem:[%s5136_s27 + $0x450] sm:$0xff] %v3476_v1  ;;  %v3477_v37 = vadd.f32 %v5123_v33, %v1649_v2  ;;  %v1653_v52 = vadd.f32 %v1652_v20, %v1395_v11  ;;  %2588 = vmatprep.mubr.f32.mxu1 %v4047_v54  ;;  %v1397_v55 = vpop.f32.mrf.mxu0  ;;  %v4055_v1 = vld [vmem:[#allocation3 + $0x178] sm:$0xff] }
 0x1b6   : > { %v1654_v62 = vpop.f32.mrf.mxu1 }
 0x1b7   : > { %3669 = vst [vmem:[%s5136_s27 + $0x458] sm:$0xff] %v3477_v37  ;;  %v3482_v7 = vadd.f32 %v5117_v17, %v1653_v52  ;;  %v1655_v63 = vadd.f32 %v1654_v62, %v1397_v55  ;;  %v1401_v14 = vpop.f32.mrf.mxu0  ;;  %2332 = vmatmul.mubr.f32.gmra.mxu0 %v4048_v29  ;;  %v4056_v52 = vld [vmem:[#allocation3 + $0x160] sm:$0xff]  ;;  %v4058_v62 = vld [vmem:[#allocation3 + $0x188] sm:$0xff] }
 0x1b8   : > { %v1658_v28 = vpop.f32.mrf.mxu1  ;;  %2589 = vmatmul.mubr.f32.gmra.mxu1 %v4049_v46  ;;  %2337 = vmatprep.mubr.f32.mxu0 %v4050_v16  ;;  %v4061_v16 = vld [vmem:[#allocation3 + $0x190] sm:$0xff] }
 0x1b9   : > { %3674 = vst [vmem:[%s5136_s27 + $0x480] sm:$0xff] %v3482_v7  ;;  %v3483_v30 = vadd.f32 %v5123_v33, %v1655_v63  ;;  %v1659_v61 = vadd.f32 %v1658_v28, %v1401_v14  ;;  %2594 = vmatprep.mubr.f32.mxu1 %v4051_v18  ;;  %v1403_v19 = vpop.f32.mrf.mxu0  ;;  %v4059_v7 = vld [vmem:[#allocation3 + $0x198] sm:$0xff] }
 0x1ba   : > { %v1660_v24 = vpop.f32.mrf.mxu1 }
 0x1bb   : > { %3675 = vst [vmem:[%s5136_s27 + $0x488] sm:$0xff] %v3483_v30  ;;  %v3488_v25 = vadd.f32 %v5117_v17, %v1659_v61  ;;  %v1661_v26 = vadd.f32 %v1660_v24, %v1403_v19  ;;  %v1407_v40 = vpop.f32.mrf.mxu0  ;;  %2338 = vmatmul.mubr.f32.gmra.mxu0 %v4052_v42  ;;  %v4060_v61 = vld [vmem:[#allocation3 + $0x180] sm:$0xff]  ;;  %v4062_v24 = vld [vmem:[#allocation3 + $0x1a8] sm:$0xff] }
 0x1bc   : > { %v1664_v41 = vpop.f32.mrf.mxu1  ;;  %2595 = vmatmul.mubr.f32.gmra.mxu1 %v4053_v49  ;;  %2343 = vmatprep.mubr.f32.mxu0 %v4054_v0  ;;  %v4065_v0 = vld [vmem:[#allocation3 + $0x1b0] sm:$0xff] }
 0x1bd   : > { %3680 = vst [vmem:[%s5136_s27 + $0x4b0] sm:$0xff] %v3488_v25  ;;  %v3489_v56 = vadd.f32 %v5123_v33, %v1661_v26  ;;  %v1665_v57 = vadd.f32 %v1664_v41, %v1407_v40  ;;  %2600 = vmatprep.mubr.f32.mxu1 %v4055_v1  ;;  %v1409_v2 = vpop.f32.mrf.mxu0  ;;  %v4063_v25 = vld [vmem:[#allocation3 + $0x1b8] sm:$0xff] }
 0x1be   : > { %v1666_v11 = vpop.f32.mrf.mxu1 }
 0x1bf   : > { %3681 = vst [vmem:[%s5136_s27 + $0x4b8] sm:$0xff] %v3489_v56  ;;  %v3494_v20 = vadd.f32 %v5117_v17, %v1665_v57  ;;  %v1667_v21 = vadd.f32 %v1666_v11, %v1409_v2  ;;  %v1413_v22 = vpop.f32.mrf.mxu0  ;;  %2344 = vmatmul.mubr.f32.gmra.mxu0 %v4056_v52  ;;  %v4064_v57 = vld [vmem:[#allocation3 + $0x1a0] sm:$0xff]  ;;  %v4066_v11 = vld [vmem:[#allocation3 + $0x1c8] sm:$0xff] }
 0x1c0   : > { %v1670_v37 = vpop.f32.mrf.mxu1  ;;  %2601 = vmatmul.mubr.f32.gmra.mxu1 %v4057_v53  ;;  %2349 = vmatprep.mubr.f32.mxu0 %v4058_v62  ;;  %v4069_v62 = vld [vmem:[#allocation3 + $0x1d0] sm:$0xff] }
 0x1c1   : > { %3686 = vst [vmem:[%s5136_s27 + $0x4e0] sm:$0xff] %v3494_v20  ;;  %v3495_v54 = vadd.f32 %v5123_v33, %v1667_v21  ;;  %v1671_v55 = vadd.f32 %v1670_v37, %v1413_v22  ;;  %2606 = vmatprep.mubr.f32.mxu1 %v4059_v7  ;;  %v1415_v63 = vpop.f32.mrf.mxu0  ;;  %v4067_v20 = vld [vmem:[#allocation3 + $0x1d8] sm:$0xff] }
 0x1c2   : > { %v1672_v14 = vpop.f32.mrf.mxu1 }
 0x1c3   : > { %3687 = vst [vmem:[%s5136_s27 + $0x4e8] sm:$0xff] %v3495_v54  ;;  %v3500_v28 = vadd.f32 %v5117_v17, %v1671_v55  ;;  %v1673_v29 = vadd.f32 %v1672_v14, %v1415_v63  ;;  %v1419_v46 = vpop.f32.mrf.mxu0  ;;  %2350 = vmatmul.mubr.f32.gmra.mxu0 %v4060_v61  ;;  %v4068_v55 = vld [vmem:[#allocation3 + $0x1c0] sm:$0xff]  ;;  %v4070_v14 = vld [vmem:[#allocation3 + $0x1e8] sm:$0xff] }
 0x1c4   : > { %v1676_v30 = vpop.f32.mrf.mxu1  ;;  %2607 = vmatmul.mubr.f32.gmra.mxu1 %v4061_v16  ;;  %2355 = vmatprep.mubr.f32.mxu0 %v4062_v24  ;;  %v3318_v16 = vsub.s32 2, %v5095_v6  ;;  %v4072_v24 = vld [vmem:[#allocation3 + $0x1e0] sm:$0xff] }
 0x1c5   : > { %3692 = vst [vmem:[%s5136_s27 + $0x510] sm:$0xff] %v3500_v28  ;;  %v3501_v18 = vadd.f32 %v5123_v33, %v1673_v29  ;;  %v1677_v19 = vadd.f32 %v1676_v30, %v1419_v46  ;;  %2612 = vmatprep.mubr.f32.mxu1 %v4063_v25  ;;  %v1421_v26 = vpop.f32.mrf.mxu0  ;;  %v4071_v28 = vld [vmem:[#allocation3 + $0x1f8] sm:$0xff]  ;;  %v4073_v25 = vld [vmem:[#allocation3 + $0x1f0] sm:$0xff] }
 0x1c6   : > { %v1678_v40 = vpop.f32.mrf.mxu1 }
 0x1c7   : > { %3693 = vst [vmem:[%s5136_s27 + $0x518] sm:$0xff] %v3501_v18  ;;  %v3506_v41 = vadd.f32 %v5117_v17, %v1677_v19  ;;  %v1679_v42 = vadd.f32 %v1678_v40, %v1421_v26  ;;  %v1425_v49 = vpop.f32.mrf.mxu0  ;;  %2356 = vmatmul.mubr.f32.gmra.mxu0 %v4064_v57 }
 0x1c8   : > { %v1682_v56 = vpop.f32.mrf.mxu1  ;;  %2613 = vmatmul.mubr.f32.gmra.mxu1 %v4065_v0  ;;  %2361 = vmatprep.mubr.f32.mxu0 %v4066_v11 }
 0x1c9   : > { %3698 = vst [vmem:[%s5136_s27 + $0x540] sm:$0xff] %v3506_v41  ;;  %v3507_v1 = vadd.f32 %v5123_v33, %v1679_v42  ;;  %v1683_v2 = vadd.f32 %v1682_v56, %v1425_v49  ;;  %2618 = vmatprep.mubr.f32.mxu1 %v4067_v20  ;;  %v1427_v21 = vpop.f32.mrf.mxu0  ;;  %v4074_v41 = vld [vmem:[#allocation3 + $0x208] sm:$0xff]  ;;  %v4075_v42 = vld [vmem:[#allocation3 + $0x218] sm:$0xff]  ;;  %v3322_v49 = vsub.s32 3, %v5095_v6 }
 0x1ca   : > { %v1684_v22 = vpop.f32.mrf.mxu1 }
 0x1cb   : > { %3699 = vst [vmem:[%s5136_s27 + $0x548] sm:$0xff] %v3507_v1  ;;  %v3512_v37 = vadd.f32 %v5117_v17, %v1683_v2  ;;  %v1685_v52 = vadd.f32 %v1684_v22, %v1427_v21  ;;  %v1431_v53 = vpop.f32.mrf.mxu0  ;;  %2362 = vmatmul.mubr.f32.gmra.mxu0 %v4068_v55  ;;  %v5431_v2 = vld [vmem:[%s5108_s20] sm:$0x3f]  ;;  %v4080_v55 = vld [vmem:[#allocation3 + $0x238] sm:$0xff] }
 0x1cc   : > { %v1688_v54 = vpop.f32.mrf.mxu1  ;;  %2619 = vmatmul.mubr.f32.gmra.mxu1 %v4069_v62  ;;  %2367 = vmatprep.mubr.f32.mxu0 %v4070_v14  ;;  %v5434_v11 = vrot.slane %v5431_v2, %v3318_v16  ;;  %v4077_v22 = vld [vmem:[#allocation3 + $0x200] sm:$0xff]  ;;  %v4083_v16 = vld [vmem:[#allocation3 + $0x248] sm:$0xff] }
 0x1cd   : > { %3704 = vst [vmem:[%s5136_s27 + $0x570] sm:$0xff] %v3512_v37  ;;  %v3513_v7 = vadd.f32 %v5123_v33, %v1685_v52  ;;  %v1689_v63 = vadd.f32 %v1688_v54, %v1431_v53  ;;  %2624 = vmatprep.mubr.f32.mxu1 %v4071_v28  ;;  %v1433_v29 = vpop.f32.mrf.mxu0  ;;  %v4078_v37 = vld [vmem:[#allocation3 + $0x210] sm:$0xff]  ;;  %v5439_v54 = vrot.slane %v5431_v2, %v3322_v49 }
 0x1ce   : > { %v1690_v46 = vpop.f32.mrf.mxu1  ;;  %v4086_v49 = vld [vmem:[#allocation3 + $0x250] sm:$0xff] }
 0x1cf   : > { %3705 = vst [vmem:[%s5136_s27 + $0x578] sm:$0xff] %v3513_v7  ;;  %v3518_v30 = vadd.f32 %v5117_v17, %v1689_v63  ;;  %v1691_v61 = vadd.f32 %v1690_v46, %v1433_v29  ;;  %v1437_v18 = vpop.f32.mrf.mxu0  ;;  %2368 = vmatmul.mubr.f32.gmra.mxu0 %v4072_v24  ;;  %v4081_v46 = vld [vmem:[#allocation3 + $0x220] sm:$0xff] }
 0x1d0   : > { %v1694_v19 = vpop.f32.mrf.mxu1  ;;  %2625 = vmatmul.mubr.f32.gmra.mxu1 %v4073_v25  ;;  %2373 = vmatprep.mubr.f32.mxu0 %v4074_v41 }
 0x1d1   : > { %3710 = vst [vmem:[%s5136_s27 + $0x5a0] sm:$0xff] %v3518_v30  ;;  %v3519_v26 = vadd.f32 %v5123_v33, %v1691_v61  ;;  %v1695_v40 = vadd.f32 %v1694_v19, %v1437_v18  ;;  %2630 = vmatprep.mubr.f32.mxu1 %v4075_v42  ;;  %v1439_v56 = vpop.f32.mrf.mxu0  ;;  %v4084_v18 = vld [vmem:[#allocation3 + $0x258] sm:$0xff]  ;;  %v4085_v42 = vld [vmem:[#allocation3 + $0x240] sm:$0xff] }
 0x1d2   : > { %v1696_v57 = vpop.f32.mrf.mxu1 }
 0x1d3   : > { %3711 = vst [vmem:[%s5136_s27 + $0x5a8] sm:$0xff] %v3519_v26  ;;  %v3524_v0 = vadd.f32 %v5117_v17, %v1695_v40  ;;  %v1697_v1 = vadd.f32 %v1696_v57, %v1439_v56  ;;  %v1765_v20 = vpop.f32.mrf.mxu0  ;;  %2374 = vmatmul.mubr.f32.gmra.mxu0 %v4077_v22  ;;  %v4079_v17 = vld [vmem:[#allocation3 + $0x228] sm:$0xff] }
 0x1d4   : > { %v2022_v21 = vpop.f32.mrf.mxu1  ;;  %2631 = vmatmul.mubr.f32.gmra.mxu1 %v4078_v37  ;;  %2379 = vmatprep.mubr.f32.mxu0 %v4079_v17  ;;  %v4089_v17 = vld [vmem:[#allocation3 + $0x260] sm:$0xff] }
 0x1d5   : > { %3716 = vst [vmem:[%s5136_s27 + $0x5d0] sm:$0xff] %v3524_v0  ;;  %v3525_v52 = vadd.f32 %v5123_v33, %v1697_v1  ;;  %v2023_v53 = vadd.f32 %v2022_v21, %v1765_v20  ;;  %2636 = vmatprep.mubr.f32.mxu1 %v4080_v55  ;;  %v1767_v62 = vpop.f32.mrf.mxu0  ;;  %v4082_v33 = vld [vmem:[#allocation3 + $0x230] sm:$0xff]  ;;  %v4087_v0 = vld [vmem:[#allocation3 + $0x268] sm:$0xff]  ;;  %v4088_v1 = vld [vmem:[#allocation3 + $0x278] sm:$0xff] }
 0x1d6   : > { %v2024_v7 = vpop.f32.mrf.mxu1  ;;  %v4090_v55 = vld [vmem:[#allocation3 + $0x270] sm:$0xff] }
 0x1d7   : > { %3717 = vst [vmem:[%s5136_s27 + $0x5d8] sm:$0xff] %v3525_v52  ;;  %v3340_v63 = vadd.f32 %v5434_v11, %v2023_v53  ;;  %v2025_v14 = vadd.f32 %v2024_v7, %v1767_v62  ;;  %v1771_v28 = vpop.f32.mrf.mxu0  ;;  %2380 = vmatmul.mubr.f32.gmra.mxu0 %v4081_v46 }
 0x1d8   : > { %v2028_v29 = vpop.f32.mrf.mxu1  ;;  %2637 = vmatmul.mubr.f32.gmra.mxu1 %v4082_v33  ;;  %2385 = vmatprep.mubr.f32.mxu0 %v4083_v16  ;;  %v4093_v16 = vld [vmem:[#allocation3 + $0x280] sm:$0xff] }
 0x1d9   : > { %3532 = vst [vmem:[%s5136_s27 + $0x10] sm:$0xff] %v3340_v63  ;;  %v3341_v30 = vadd.f32 %v5439_v54, %v2025_v14  ;;  %v2029_v61 = vadd.f32 %v2028_v29, %v1771_v28  ;;  %2642 = vmatprep.mubr.f32.mxu1 %v4084_v18  ;;  %v1773_v19 = vpop.f32.mrf.mxu0  ;;  %v4091_v63 = vld [vmem:[#allocation3 + $0x288] sm:$0xff]  ;;  %v4092_v14 = vld [vmem:[#allocation3 + $0x298] sm:$0xff]  ;;  %v4094_v18 = vld [vmem:[#allocation3 + $0x290] sm:$0xff] }
 0x1da   : > { %v2030_v24 = vpop.f32.mrf.mxu1 }
 0x1db   : > { %3533 = vst [vmem:[%s5136_s27 + $0x18] sm:$0xff] %v3341_v30  ;;  %v3346_v25 = vadd.f32 %v5434_v11, %v2029_v61  ;;  %v2031_v26 = vadd.f32 %v2030_v24, %v1773_v19  ;;  %v1777_v40 = vpop.f32.mrf.mxu0  ;;  %2386 = vmatmul.mubr.f32.gmra.mxu0 %v4085_v42 }
 0x1dc   : > { %v2034_v41 = vpop.f32.mrf.mxu1  ;;  %2643 = vmatmul.mubr.f32.gmra.mxu1 %v4086_v49  ;;  %2391 = vmatprep.mubr.f32.mxu0 %v4087_v0  ;;  %v4097_v0 = vld [vmem:[#allocation3 + $0x2a0] sm:$0xff] }
 0x1dd   : > { %3538 = vst [vmem:[%s5136_s27 + $0x40] sm:$0xff] %v3346_v25  ;;  %v3347_v56 = vadd.f32 %v5439_v54, %v2031_v26  ;;  %v2035_v57 = vadd.f32 %v2034_v41, %v1777_v40  ;;  %2648 = vmatprep.mubr.f32.mxu1 %v4088_v1  ;;  %v1779_v20 = vpop.f32.mrf.mxu0  ;;  %v4095_v25 = vld [vmem:[#allocation3 + $0x2a8] sm:$0xff]  ;;  %v4096_v26 = vld [vmem:[#allocation3 + $0x2b8] sm:$0xff]  ;;  %v4098_v1 = vld [vmem:[#allocation3 + $0x2b0] sm:$0xff] }
 0x1de   : > { %v2036_v21 = vpop.f32.mrf.mxu1 }
 0x1df   : > { %3539 = vst [vmem:[%s5136_s27 + $0x48] sm:$0xff] %v3347_v56  ;;  %v3352_v22 = vadd.f32 %v5434_v11, %v2035_v57  ;;  %v2037_v37 = vadd.f32 %v2036_v21, %v1779_v20  ;;  %v1783_v52 = vpop.f32.mrf.mxu0  ;;  %2392 = vmatmul.mubr.f32.gmra.mxu0 %v4089_v17 }
 0x1e0   : > { %v2040_v53 = vpop.f32.mrf.mxu1  ;;  %2649 = vmatmul.mubr.f32.gmra.mxu1 %v4090_v55  ;;  %2397 = vmatprep.mubr.f32.mxu0 %v4091_v63  ;;  %v4101_v63 = vld [vmem:[#allocation3 + $0x2c0] sm:$0xff] }
 0x1e1   : > { %3544 = vst [vmem:[%s5136_s27 + $0x70] sm:$0xff] %v3352_v22  ;;  %v3353_v62 = vadd.f32 %v5439_v54, %v2037_v37  ;;  %v2041_v7 = vadd.f32 %v2040_v53, %v1783_v52  ;;  %2654 = vmatprep.mubr.f32.mxu1 %v4092_v14  ;;  %v1785_v28 = vpop.f32.mrf.mxu0  ;;  %v4099_v22 = vld [vmem:[#allocation3 + $0x2c8] sm:$0xff]  ;;  %v4100_v37 = vld [vmem:[#allocation3 + $0x2d8] sm:$0xff]  ;;  %v4102_v14 = vld [vmem:[#allocation3 + $0x2d0] sm:$0xff] }
 0x1e2   : > { %v2042_v29 = vpop.f32.mrf.mxu1 }
 0x1e3   : > { %3545 = vst [vmem:[%s5136_s27 + $0x78] sm:$0xff] %v3353_v62  ;;  %v3358_v46 = vadd.f32 %v5434_v11, %v2041_v7  ;;  %v2043_v33 = vadd.f32 %v2042_v29, %v1785_v28  ;;  %v1789_v30 = vpop.f32.mrf.mxu0  ;;  %2398 = vmatmul.mubr.f32.gmra.mxu0 %v4093_v16 }
 0x1e4   : > { %v2046_v61 = vpop.f32.mrf.mxu1  ;;  %2655 = vmatmul.mubr.f32.gmra.mxu1 %v4094_v18  ;;  %2403 = vmatprep.mubr.f32.mxu0 %v4095_v25  ;;  %v4105_v25 = vld [vmem:[#allocation3 + $0x2e0] sm:$0xff] }
 0x1e5   : > { %3550 = vst [vmem:[%s5136_s27 + $0xa0] sm:$0xff] %v3358_v46  ;;  %v3359_v19 = vadd.f32 %v5439_v54, %v2043_v33  ;;  %v2047_v24 = vadd.f32 %v2046_v61, %v1789_v30  ;;  %2660 = vmatprep.mubr.f32.mxu1 %v4096_v26  ;;  %v1791_v40 = vpop.f32.mrf.mxu0  ;;  %v4103_v46 = vld [vmem:[#allocation3 + $0x2e8] sm:$0xff]  ;;  %v4104_v33 = vld [vmem:[#allocation3 + $0x2f8] sm:$0xff]  ;;  %v4106_v26 = vld [vmem:[#allocation3 + $0x2f0] sm:$0xff] }
 0x1e6   : > { %v2048_v41 = vpop.f32.mrf.mxu1 }
 0x1e7   : > { %3551 = vst [vmem:[%s5136_s27 + $0xa8] sm:$0xff] %v3359_v19  ;;  %v3364_v42 = vadd.f32 %v5434_v11, %v2047_v24  ;;  %v2049_v49 = vadd.f32 %v2048_v41, %v1791_v40  ;;  %v1795_v56 = vpop.f32.mrf.mxu0  ;;  %2404 = vmatmul.mubr.f32.gmra.mxu0 %v4097_v0 }
 0x1e8   : > { %v2052_v57 = vpop.f32.mrf.mxu1  ;;  %2661 = vmatmul.mubr.f32.gmra.mxu1 %v4098_v1  ;;  %2409 = vmatprep.mubr.f32.mxu0 %v4099_v22  ;;  %v4109_v22 = vld [vmem:[#allocation3 + $0x300] sm:$0xff] }
 0x1e9   : > { %3556 = vst [vmem:[%s5136_s27 + $0xd0] sm:$0xff] %v3364_v42  ;;  %v3365_v20 = vadd.f32 %v5439_v54, %v2049_v49  ;;  %v2053_v21 = vadd.f32 %v2052_v57, %v1795_v56  ;;  %2666 = vmatprep.mubr.f32.mxu1 %v4100_v37  ;;  %v1797_v52 = vpop.f32.mrf.mxu0  ;;  %v4107_v42 = vld [vmem:[#allocation3 + $0x308] sm:$0xff]  ;;  %v4108_v49 = vld [vmem:[#allocation3 + $0x318] sm:$0xff]  ;;  %v4110_v37 = vld [vmem:[#allocation3 + $0x310] sm:$0xff] }
 0x1ea   : > { %v2054_v53 = vpop.f32.mrf.mxu1 }
 0x1eb   : > { %3557 = vst [vmem:[%s5136_s27 + $0xd8] sm:$0xff] %v3365_v20  ;;  %v3370_v17 = vadd.f32 %v5434_v11, %v2053_v21  ;;  %v2055_v55 = vadd.f32 %v2054_v53, %v1797_v52  ;;  %v1801_v62 = vpop.f32.mrf.mxu0  ;;  %2410 = vmatmul.mubr.f32.gmra.mxu0 %v4101_v63 }
 0x1ec   : > { %v2058_v7 = vpop.f32.mrf.mxu1  ;;  %2667 = vmatmul.mubr.f32.gmra.mxu1 %v4102_v14  ;;  %2415 = vmatprep.mubr.f32.mxu0 %v4103_v46 }
 0x1ed   : > { %3562 = vst [vmem:[%s5136_s27 + $0x100] sm:$0xff] %v3370_v17  ;;  %v3371_v28 = vadd.f32 %v5439_v54, %v2055_v55  ;;  %v2059_v29 = vadd.f32 %v2058_v7, %v1801_v62  ;;  %2672 = vmatprep.mubr.f32.mxu1 %v4104_v33  ;;  %v1803_v30 = vpop.f32.mrf.mxu0 }
 0x1ee   : > { %v2060_v61 = vpop.f32.mrf.mxu1 }
 0x1ef   : > { %3563 = vst [vmem:[%s5136_s27 + $0x108] sm:$0xff] %v3371_v28  ;;  %v3376_v16 = vadd.f32 %v5434_v11, %v2059_v29  ;;  %v2061_v18 = vadd.f32 %v2060_v61, %v1803_v30  ;;  %v1807_v19 = vpop.f32.mrf.mxu0  ;;  %2416 = vmatmul.mubr.f32.gmra.mxu0 %v4105_v25 }
 0x1f0   : > { %v2064_v24 = vpop.f32.mrf.mxu1  ;;  %2673 = vmatmul.mubr.f32.gmra.mxu1 %v4106_v26  ;;  %2421 = vmatprep.mubr.f32.mxu0 %v4107_v42 }
 0x1f1   : > { %3568 = vst [vmem:[%s5136_s27 + $0x130] sm:$0xff] %v3376_v16  ;;  %v3377_v40 = vadd.f32 %v5439_v54, %v2061_v18  ;;  %v2065_v41 = vadd.f32 %v2064_v24, %v1807_v19  ;;  %2678 = vmatprep.mubr.f32.mxu1 %v4108_v49  ;;  %v1809_v56 = vpop.f32.mrf.mxu0 }
 0x1f2   : > { %v2066_v57 = vpop.f32.mrf.mxu1 }
 0x1f3   : > { %3569 = vst [vmem:[%s5136_s27 + $0x138] sm:$0xff] %v3377_v40  ;;  %v3382_v0 = vadd.f32 %v5434_v11, %v2065_v41  ;;  %v2067_v1 = vadd.f32 %v2066_v57, %v1809_v56  ;;  %v1813_v20 = vpop.f32.mrf.mxu0  ;;  %2422 = vmatmul.mubr.f32.gmra.mxu0 %v4109_v22 }
 0x1f4   : > { %v2070_v21 = vpop.f32.mrf.mxu1  ;;  %2679 = vmatmul.mubr.f32.gmra.mxu1 %v4110_v37  ;;  %2427 = vmatprep.mubr.f32.mxu0 %v5226_v58 }
 0x1f5   : > { %3574 = vst [vmem:[%s5136_s27 + $0x160] sm:$0xff] %v3382_v0  ;;  %v3383_v52 = vadd.f32 %v5439_v54, %v2067_v1  ;;  %v2071_v53 = vadd.f32 %v2070_v21, %v1813_v20  ;;  %2684 = vmatprep.mubr.f32.mxu1 %v5229_v59  ;;  %v1815_v17 = vpop.f32.mrf.mxu0 }
 0x1f6   : > { %v2072_v55 = vpop.f32.mrf.mxu1 }
 0x1f7   : > { %3575 = vst [vmem:[%s5136_s27 + $0x168] sm:$0xff] %v3383_v52  ;;  %v3388_v62 = vadd.f32 %v5434_v11, %v2071_v53  ;;  %v2073_v7 = vadd.f32 %v2072_v55, %v1815_v17  ;;  %v1819_v63 = vpop.f32.mrf.mxu0  ;;  %2428 = vmatmul.mubr.f32.gmra.mxu0 %v5234_v8 }
 0x1f8   : > { %v2076_v14 = vpop.f32.mrf.mxu1  ;;  %2685 = vmatmul.mubr.f32.gmra.mxu1 %v5237_v9  ;;  %2433 = vmatprep.mubr.f32.mxu0 %v5246_v38 }
 0x1f9   : > { %3580 = vst [vmem:[%s5136_s27 + $0x190] sm:$0xff] %v3388_v62  ;;  %v3389_v28 = vadd.f32 %v5439_v54, %v2073_v7  ;;  %v2077_v58 = vadd.f32 %v2076_v14, %v1819_v63  ;;  %2690 = vmatprep.mubr.f32.mxu1 %v5249_v39  ;;  %v1821_v59 = vpop.f32.mrf.mxu0 }
 0x1fa   : > { %v2078_v29 = vpop.f32.mrf.mxu1 }
 0x1fb   : > { %3581 = vst [vmem:[%s5136_s27 + $0x198] sm:$0xff] %v3389_v28  ;;  %v3394_v46 = vadd.f32 %v5434_v11, %v2077_v58  ;;  %v2079_v33 = vadd.f32 %v2078_v29, %v1821_v59  ;;  %v1825_v30 = vpop.f32.mrf.mxu0  ;;  %2434 = vmatmul.mubr.f32.gmra.mxu0 %v5254_v4 }
 0x1fc   : > { %v2082_v8 = vpop.f32.mrf.mxu1  ;;  %2691 = vmatmul.mubr.f32.gmra.mxu1 %v5257_v5  ;;  %2439 = vmatprep.mubr.f32.mxu0 %v5266_v15 }
 0x1fd   : > { %3586 = vst [vmem:[%s5136_s27 + $0x1c0] sm:$0xff] %v3394_v46  ;;  %v3395_v9 = vadd.f32 %v5439_v54, %v2079_v33  ;;  %v2083_v38 = vadd.f32 %v2082_v8, %v1825_v30  ;;  %2696 = vmatprep.mubr.f32.mxu1 %v5269_v47  ;;  %v1827_v39 = vpop.f32.mrf.mxu0 }
 0x1fe   : > { %v2084_v61 = vpop.f32.mrf.mxu1 }
 0x1ff   : > { %3587 = vst [vmem:[%s5136_s27 + $0x1c8] sm:$0xff] %v3395_v9  ;;  %v3400_v16 = vadd.f32 %v5434_v11, %v2083_v38  ;;  %v2085_v18 = vadd.f32 %v2084_v61, %v1827_v39  ;;  %v1831_v19 = vpop.f32.mrf.mxu0  ;;  %2440 = vmatmul.mubr.f32.gmra.mxu0 %v5274_v31 }
 0x200   : > { %v2088_v4 = vpop.f32.mrf.mxu1  ;;  %2697 = vmatmul.mubr.f32.gmra.mxu1 %v5277_v60  ;;  %2445 = vmatprep.mubr.f32.mxu0 %v5286_v32 }
 0x201   : > { %3592 = vst [vmem:[%s5136_s27 + $0x1f0] sm:$0xff] %v3400_v16  ;;  %v3401_v5 = vadd.f32 %v5439_v54, %v2085_v18  ;;  %v2089_v15 = vadd.f32 %v2088_v4, %v1831_v19  ;;  %2702 = vmatprep.mubr.f32.mxu1 %v5289_v34  ;;  %v1833_v47 = vpop.f32.mrf.mxu0 }
 0x202   : > { %v2090_v24 = vpop.f32.mrf.mxu1 }
 0x203   : > { %3593 = vst [vmem:[%s5136_s27 + $0x1f8] sm:$0xff] %v3401_v5  ;;  %v3406_v25 = vadd.f32 %v5434_v11, %v2089_v15  ;;  %v2091_v26 = vadd.f32 %v2090_v24, %v1833_v47  ;;  %v1837_v40 = vpop.f32.mrf.mxu0  ;;  %2446 = vmatmul.mubr.f32.gmra.mxu0 %v5294_v43 }
 0x204   : > { %v2094_v31 = vpop.f32.mrf.mxu1  ;;  %2703 = vmatmul.mubr.f32.gmra.mxu1 %v5297_v48  ;;  %2451 = vmatprep.mubr.f32.mxu0 %v5306_v3 }
 0x205   : > { %3598 = vst [vmem:[%s5136_s27 + $0x220] sm:$0xff] %v3406_v25  ;;  %v3407_v60 = vadd.f32 %v5439_v54, %v2091_v26  ;;  %v2095_v32 = vadd.f32 %v2094_v31, %v1837_v40  ;;  %2708 = vmatprep.mubr.f32.mxu1 %v5309_v10  ;;  %v1839_v34 = vpop.f32.mrf.mxu0 }
 0x206   : > { %v2096_v41 = vpop.f32.mrf.mxu1 }
 0x207   : > { %3599 = vst [vmem:[%s5136_s27 + $0x228] sm:$0xff] %v3407_v60  ;;  %v3412_v42 = vadd.f32 %v5434_v11, %v2095_v32  ;;  %v2097_v49 = vadd.f32 %v2096_v41, %v1839_v34  ;;  %v1843_v56 = vpop.f32.mrf.mxu0  ;;  %2452 = vmatmul.mubr.f32.gmra.mxu0 %v5314_v23 }
 0x208   : > { %v2100_v43 = vpop.f32.mrf.mxu1  ;;  %2709 = vmatmul.mubr.f32.gmra.mxu1 %v5317_v36  ;;  %2457 = vmatprep.mubr.f32.mxu0 %v5326_v12 }
 0x209   : > { %3604 = vst [vmem:[%s5136_s27 + $0x250] sm:$0xff] %v3412_v42  ;;  %v3413_v48 = vadd.f32 %v5439_v54, %v2097_v49  ;;  %v2101_v3 = vadd.f32 %v2100_v43, %v1843_v56  ;;  %2714 = vmatprep.mubr.f32.mxu1 %v5329_v13  ;;  %v1845_v10 = vpop.f32.mrf.mxu0 }
 0x20a   : > { %v2102_v57 = vpop.f32.mrf.mxu1 }
 0x20b   : > { %3605 = vst [vmem:[%s5136_s27 + $0x258] sm:$0xff] %v3413_v48  ;;  %v3418_v0 = vadd.f32 %v5434_v11, %v2101_v3  ;;  %v2103_v1 = vadd.f32 %v2102_v57, %v1845_v10  ;;  %v1849_v20 = vpop.f32.mrf.mxu0  ;;  %2458 = vmatmul.mubr.f32.gmra.mxu0 %v5334_v45 }
 0x20c   : > { %v2106_v23 = vpop.f32.mrf.mxu1  ;;  %2715 = vmatmul.mubr.f32.gmra.mxu1 %v5337_v44  ;;  %2463 = vmatprep.mubr.f32.mxu0 %v5346_v27 }
 0x20d   : > { %3610 = vst [vmem:[%s5136_s27 + $0x280] sm:$0xff] %v3418_v0  ;;  %v3419_v36 = vadd.f32 %v5439_v54, %v2103_v1  ;;  %v2107_v12 = vadd.f32 %v2106_v23, %v1849_v20  ;;  %2720 = vmatprep.mubr.f32.mxu1 %v5349_v35  ;;  %v1851_v13 = vpop.f32.mrf.mxu0 }
 0x20e   : > { %v2108_v21 = vpop.f32.mrf.mxu1 }
 0x20f   : > { %3611 = vst [vmem:[%s5136_s27 + $0x288] sm:$0xff] %v3419_v36  ;;  %v3424_v22 = vadd.f32 %v5434_v11, %v2107_v12  ;;  %v2109_v37 = vadd.f32 %v2108_v21, %v1851_v13  ;;  %v1855_v45 = vpop.f32.mrf.mxu0  ;;  %2464 = vmatmul.mubr.f32.gmra.mxu0 %v5354_v50 }
 0x210   : > { %v2112_v52 = vpop.f32.mrf.mxu1  ;;  %2721 = vmatmul.mubr.f32.gmra.mxu1 %v5357_v51 }
 0x211   : > { %3616 = vst [vmem:[%s5136_s27 + $0x2b0] sm:$0xff] %v3424_v22  ;;  %v3425_v44 = vadd.f32 %v5439_v54, %v2109_v37  ;;  %v2113_v27 = vadd.f32 %v2112_v52, %v1855_v45  ;;  %v1857_v53 = vpop.f32.mrf.mxu0 }
 0x212   : > { %v2114_v35 = vpop.f32.mrf.mxu1 }
 0x213   : > { %3617 = vst [vmem:[%s5136_s27 + $0x2b8] sm:$0xff] %v3425_v44  ;;  %v3430_v17 = vadd.f32 %v5434_v11, %v2113_v27  ;;  %v2115_v55 = vadd.f32 %v2114_v35, %v1857_v53  ;;  %v1861_v62 = vpop.f32.mrf.mxu0 }
 0x214   : > { %v2118_v7 = vpop.f32.mrf.mxu1 }
 0x215   : > { %3622 = vst [vmem:[%s5136_s27 + $0x2e0] sm:$0xff] %v3430_v17  ;;  %v3431_v50 = vadd.f32 %v5439_v54, %v2115_v55  ;;  %v2119_v63 = vadd.f32 %v2118_v7, %v1861_v62  ;;  %v1863_v51 = vpop.f32.mrf.mxu0 }
 0x216   : > { %v2120_v14 = vpop.f32.mrf.mxu1 }
 0x217   : > { %3623 = vst [vmem:[%s5136_s27 + $0x2e8] sm:$0xff] %v3431_v50  ;;  %v3436_v28 = vadd.f32 %v5434_v11, %v2119_v63  ;;  %v2121_v58 = vadd.f32 %v2120_v14, %v1863_v51  ;;  %v1867_v59 = vpop.f32.mrf.mxu0 }
 0x218   : > { %v2124_v29 = vpop.f32.mrf.mxu1 }
 0x219   : > { %3628 = vst [vmem:[%s5136_s27 + $0x310] sm:$0xff] %v3436_v28  ;;  %v3437_v46 = vadd.f32 %v5439_v54, %v2121_v58  ;;  %v2125_v33 = vadd.f32 %v2124_v29, %v1867_v59  ;;  %v1869_v30 = vpop.f32.mrf.mxu0 }
 0x21a   : > { %v2126_v8 = vpop.f32.mrf.mxu1 }
 0x21b   : > { %3629 = vst [vmem:[%s5136_s27 + $0x318] sm:$0xff] %v3437_v46  ;;  %v3442_v9 = vadd.f32 %v5434_v11, %v2125_v33  ;;  %v2127_v38 = vadd.f32 %v2126_v8, %v1869_v30  ;;  %v1873_v39 = vpop.f32.mrf.mxu0 }
 0x21c   : > { %v2130_v61 = vpop.f32.mrf.mxu1 }
 0x21d   : > { %3634 = vst [vmem:[%s5136_s27 + $0x340] sm:$0xff] %v3442_v9  ;;  %v3443_v16 = vadd.f32 %v5439_v54, %v2127_v38  ;;  %v2131_v18 = vadd.f32 %v2130_v61, %v1873_v39  ;;  %v1875_v19 = vpop.f32.mrf.mxu0 }
 0x21e   : > { %v2132_v4 = vpop.f32.mrf.mxu1 }
 0x21f   : > { %3635 = vst [vmem:[%s5136_s27 + $0x348] sm:$0xff] %v3443_v16  ;;  %v3448_v5 = vadd.f32 %v5434_v11, %v2131_v18  ;;  %v2133_v15 = vadd.f32 %v2132_v4, %v1875_v19  ;;  %v1879_v47 = vpop.f32.mrf.mxu0 }
 0x220   : > { %v2136_v24 = vpop.f32.mrf.mxu1 }
 0x221   : > { %3640 = vst [vmem:[%s5136_s27 + $0x370] sm:$0xff] %v3448_v5  ;;  %v3449_v25 = vadd.f32 %v5439_v54, %v2133_v15  ;;  %v2137_v26 = vadd.f32 %v2136_v24, %v1879_v47  ;;  %v1881_v40 = vpop.f32.mrf.mxu0 }
 0x222   : > { %v2138_v31 = vpop.f32.mrf.mxu1 }
 0x223   : > { %3641 = vst [vmem:[%s5136_s27 + $0x378] sm:$0xff] %v3449_v25  ;;  %v3454_v60 = vadd.f32 %v5434_v11, %v2137_v26  ;;  %v2139_v32 = vadd.f32 %v2138_v31, %v1881_v40  ;;  %v1885_v34 = vpop.f32.mrf.mxu0 }
 0x224   : > { %v2142_v41 = vpop.f32.mrf.mxu1 }
 0x225   : > { %3646 = vst [vmem:[%s5136_s27 + $0x3a0] sm:$0xff] %v3454_v60  ;;  %v3455_v42 = vadd.f32 %v5439_v54, %v2139_v32  ;;  %v2143_v49 = vadd.f32 %v2142_v41, %v1885_v34  ;;  %v1887_v56 = vpop.f32.mrf.mxu0 }
 0x226   : > { %v2144_v43 = vpop.f32.mrf.mxu1 }
 0x227   : > { %3647 = vst [vmem:[%s5136_s27 + $0x3a8] sm:$0xff] %v3455_v42  ;;  %v3460_v48 = vadd.f32 %v5434_v11, %v2143_v49  ;;  %v2145_v3 = vadd.f32 %v2144_v43, %v1887_v56  ;;  %v1891_v10 = vpop.f32.mrf.mxu0 }
 0x228   : > { %v2148_v57 = vpop.f32.mrf.mxu1 }
 0x229   : > { %3652 = vst [vmem:[%s5136_s27 + $0x3d0] sm:$0xff] %v3460_v48  ;;  %v3461_v0 = vadd.f32 %v5439_v54, %v2145_v3  ;;  %v2149_v1 = vadd.f32 %v2148_v57, %v1891_v10  ;;  %v1893_v20 = vpop.f32.mrf.mxu0 }
 0x22a   : > { %v2150_v23 = vpop.f32.mrf.mxu1 }
 0x22b   : > { %3653 = vst [vmem:[%s5136_s27 + $0x3d8] sm:$0xff] %v3461_v0  ;;  %v3466_v36 = vadd.f32 %v5434_v11, %v2149_v1  ;;  %v2151_v12 = vadd.f32 %v2150_v23, %v1893_v20  ;;  %v1897_v13 = vpop.f32.mrf.mxu0 }
 0x22c   : > { %v2154_v21 = vpop.f32.mrf.mxu1 }
 0x22d   : > { %3658 = vst [vmem:[%s5136_s27 + $0x400] sm:$0xff] %v3466_v36  ;;  %v3467_v22 = vadd.f32 %v5439_v54, %v2151_v12  ;;  %v2155_v37 = vadd.f32 %v2154_v21, %v1897_v13  ;;  %v1899_v45 = vpop.f32.mrf.mxu0 }
 0x22e   : > { %v2156_v52 = vpop.f32.mrf.mxu1 }
 0x22f   : > { %3659 = vst [vmem:[%s5136_s27 + $0x408] sm:$0xff] %v3467_v22  ;;  %v3472_v44 = vadd.f32 %v5434_v11, %v2155_v37  ;;  %v2157_v27 = vadd.f32 %v2156_v52, %v1899_v45  ;;  %v1903_v53 = vpop.f32.mrf.mxu0 }
 0x230   : > { %v2160_v35 = vpop.f32.mrf.mxu1 }
 0x231   : > { %3664 = vst [vmem:[%s5136_s27 + $0x430] sm:$0xff] %v3472_v44  ;;  %v3473_v17 = vadd.f32 %v5439_v54, %v2157_v27  ;;  %v2161_v55 = vadd.f32 %v2160_v35, %v1903_v53  ;;  %v1905_v62 = vpop.f32.mrf.mxu0 }
 0x232   : > { %v2162_v7 = vpop.f32.mrf.mxu1 }
 0x233   : > { %3665 = vst [vmem:[%s5136_s27 + $0x438] sm:$0xff] %v3473_v17  ;;  %v3478_v50 = vadd.f32 %v5434_v11, %v2161_v55  ;;  %v2163_v63 = vadd.f32 %v2162_v7, %v1905_v62  ;;  %v1909_v51 = vpop.f32.mrf.mxu0  ;;  %v3326_v62 = vsub.s32 4, %v5095_v6 }
 0x234   : > { %v2166_v14 = vpop.f32.mrf.mxu1 }
 0x235   : > { %3670 = vst [vmem:[%s5136_s27 + $0x460] sm:$0xff] %v3478_v50  ;;  %v3479_v28 = vadd.f32 %v5439_v54, %v2163_v63  ;;  %v2167_v58 = vadd.f32 %v2166_v14, %v1909_v51  ;;  %v1911_v59 = vpop.f32.mrf.mxu0  ;;  %v3330_v14 = vsub.s32 5, %v5095_v6 }
 0x236   : > { %v2168_v29 = vpop.f32.mrf.mxu1 }
 0x237   : > { %3671 = vst [vmem:[%s5136_s27 + $0x468] sm:$0xff] %v3479_v28  ;;  %v3484_v46 = vadd.f32 %v5434_v11, %v2167_v58  ;;  %v2169_v33 = vadd.f32 %v2168_v29, %v1911_v59  ;;  %v1915_v30 = vpop.f32.mrf.mxu0 }
 0x238   : > { %v2172_v8 = vpop.f32.mrf.mxu1 }
 0x239   : > { %3676 = vst [vmem:[%s5136_s27 + $0x490] sm:$0xff] %v3484_v46  ;;  %v3485_v9 = vadd.f32 %v5439_v54, %v2169_v33  ;;  %v2173_v38 = vadd.f32 %v2172_v8, %v1915_v30  ;;  %v1917_v39 = vpop.f32.mrf.mxu0  ;;  %v5598_v46 = vrot.slane %v5431_v2, %v3326_v62 }
 0x23a   : > { %v2174_v61 = vpop.f32.mrf.mxu1 }
 0x23b   : > { %3677 = vst [vmem:[%s5136_s27 + $0x498] sm:$0xff] %v3485_v9  ;;  %v3490_v16 = vadd.f32 %v5434_v11, %v2173_v38  ;;  %v2175_v18 = vadd.f32 %v2174_v61, %v1917_v39  ;;  %v1921_v19 = vpop.f32.mrf.mxu0  ;;  %v5603_v38 = vrot.slane %v5431_v2, %v3330_v14 }
 0x23c   : > { %v2178_v4 = vpop.f32.mrf.mxu1 }
 0x23d   : > { %3682 = vst [vmem:[%s5136_s27 + $0x4c0] sm:$0xff] %v3490_v16  ;;  %v3491_v5 = vadd.f32 %v5439_v54, %v2175_v18  ;;  %v2179_v15 = vadd.f32 %v2178_v4, %v1921_v19  ;;  %v1923_v47 = vpop.f32.mrf.mxu0 }
 0x23e   : > { %v2180_v24 = vpop.f32.mrf.mxu1 }
 0x23f   : > { %3683 = vst [vmem:[%s5136_s27 + $0x4c8] sm:$0xff] %v3491_v5  ;;  %v3496_v25 = vadd.f32 %v5434_v11, %v2179_v15  ;;  %v2181_v26 = vadd.f32 %v2180_v24, %v1923_v47  ;;  %v1927_v40 = vpop.f32.mrf.mxu0 }
 0x240   : > { %v2184_v31 = vpop.f32.mrf.mxu1 }
 0x241   : > { %3688 = vst [vmem:[%s5136_s27 + $0x4f0] sm:$0xff] %v3496_v25  ;;  %v3497_v60 = vadd.f32 %v5439_v54, %v2181_v26  ;;  %v2185_v32 = vadd.f32 %v2184_v31, %v1927_v40  ;;  %v1929_v34 = vpop.f32.mrf.mxu0 }
 0x242   : > { %v2186_v41 = vpop.f32.mrf.mxu1 }
 0x243   : > { %3689 = vst [vmem:[%s5136_s27 + $0x4f8] sm:$0xff] %v3497_v60  ;;  %v3502_v42 = vadd.f32 %v5434_v11, %v2185_v32  ;;  %v2187_v49 = vadd.f32 %v2186_v41, %v1929_v34  ;;  %v1933_v56 = vpop.f32.mrf.mxu0 }
 0x244   : > { %v2190_v43 = vpop.f32.mrf.mxu1 }
 0x245   : > { %3694 = vst [vmem:[%s5136_s27 + $0x520] sm:$0xff] %v3502_v42  ;;  %v3503_v48 = vadd.f32 %v5439_v54, %v2187_v49  ;;  %v2191_v3 = vadd.f32 %v2190_v43, %v1933_v56  ;;  %v1935_v10 = vpop.f32.mrf.mxu0 }
 0x246   : > { %v2192_v57 = vpop.f32.mrf.mxu1 }
 0x247   : > { %3695 = vst [vmem:[%s5136_s27 + $0x528] sm:$0xff] %v3503_v48  ;;  %v3508_v0 = vadd.f32 %v5434_v11, %v2191_v3  ;;  %v2193_v1 = vadd.f32 %v2192_v57, %v1935_v10  ;;  %v1939_v20 = vpop.f32.mrf.mxu0 }
 0x248   : > { %v2196_v23 = vpop.f32.mrf.mxu1 }
 0x249   : > { %3700 = vst [vmem:[%s5136_s27 + $0x550] sm:$0xff] %v3508_v0  ;;  %v3509_v36 = vadd.f32 %v5439_v54, %v2193_v1  ;;  %v2197_v12 = vadd.f32 %v2196_v23, %v1939_v20  ;;  %v1941_v13 = vpop.f32.mrf.mxu0 }
 0x24a   : > { %v2198_v21 = vpop.f32.mrf.mxu1 }
 0x24b   : > { %3701 = vst [vmem:[%s5136_s27 + $0x558] sm:$0xff] %v3509_v36  ;;  %v3514_v22 = vadd.f32 %v5434_v11, %v2197_v12  ;;  %v2199_v37 = vadd.f32 %v2198_v21, %v1941_v13  ;;  %v1945_v45 = vpop.f32.mrf.mxu0 }
 0x24c   : > { %v2202_v52 = vpop.f32.mrf.mxu1 }
 0x24d   : > { %3706 = vst [vmem:[%s5136_s27 + $0x580] sm:$0xff] %v3514_v22  ;;  %v3515_v44 = vadd.f32 %v5439_v54, %v2199_v37  ;;  %v2203_v27 = vadd.f32 %v2202_v52, %v1945_v45  ;;  %v1947_v53 = vpop.f32.mrf.mxu0 }
 0x24e   : > { %v2204_v35 = vpop.f32.mrf.mxu1 }
 0x24f   : > { %3707 = vst [vmem:[%s5136_s27 + $0x588] sm:$0xff] %v3515_v44  ;;  %v3520_v17 = vadd.f32 %v5434_v11, %v2203_v27  ;;  %v2205_v55 = vadd.f32 %v2204_v35, %v1947_v53  ;;  %v1951_v7 = vpop.f32.mrf.mxu0 }
 0x250   : > { %v2208_v50 = vpop.f32.mrf.mxu1 }
 0x251   : > { %3712 = vst [vmem:[%s5136_s27 + $0x5b0] sm:$0xff] %v3520_v17  ;;  %v3521_v63 = vadd.f32 %v5439_v54, %v2205_v55  ;;  %v2209_v51 = vadd.f32 %v2208_v50, %v1951_v7  ;;  %v1953_v28 = vpop.f32.mrf.mxu0 }
 0x252   : > { %v2210_v58 = vpop.f32.mrf.mxu1 }
 0x253   : > { %3713 = vst [vmem:[%s5136_s27 + $0x5b8] sm:$0xff] %v3521_v63  ;;  %v3526_v59 = vadd.f32 %v5434_v11, %v2209_v51  ;;  %v2211_v29 = vadd.f32 %v2210_v58, %v1953_v28  ;;  %v2279_v33 = vpop.f32.mrf.mxu0 }
 0x254   : > { %v2536_v30 = vpop.f32.mrf.mxu1 }
 0x255   : > { %3718 = vst [vmem:[%s5136_s27 + $0x5e0] sm:$0xff] %v3526_v59  ;;  %v3527_v8 = vadd.f32 %v5439_v54, %v2211_v29  ;;  %v2537_v9 = vadd.f32 %v2536_v30, %v2279_v33  ;;  %v2281_v6 = vpop.f32.mrf.mxu0 }
 0x256   : > { %v2538_v39 = vpop.f32.mrf.mxu1 }
 0x257   : > { %3719 = vst [vmem:[%s5136_s27 + $0x5e8] sm:$0xff] %v3527_v8  ;;  %v3342_v11 = vadd.f32 %v5598_v46, %v2537_v9  ;;  %v2539_v61 = vadd.f32 %v2538_v39, %v2281_v6  ;;  %v2285_v16 = vpop.f32.mrf.mxu0 }
 0x258   : > { %v2542_v18 = vpop.f32.mrf.mxu1 }
 0x259   : > { %3534 = vst [vmem:[%s5136_s27 + $0x20] sm:$0xff] %v3342_v11  ;;  %v3343_v19 = vadd.f32 %v5603_v38, %v2539_v61  ;;  %v2543_v4 = vadd.f32 %v2542_v18, %v2285_v16  ;;  %v2287_v5 = vpop.f32.mrf.mxu0 }
 0x25a   : > { %v2544_v54 = vpop.f32.mrf.mxu1 }
 0x25b   : > { %3535 = vst [vmem:[%s5136_s27 + $0x28] sm:$0xff] %v3343_v19  ;;  %v3348_v2 = vadd.f32 %v5598_v46, %v2543_v4  ;;  %v2545_v15 = vadd.f32 %v2544_v54, %v2287_v5  ;;  %v2291_v47 = vpop.f32.mrf.mxu0 }
 0x25c   : > { %v2548_v24 = vpop.f32.mrf.mxu1 }
 0x25d   : > { %3540 = vst [vmem:[%s5136_s27 + $0x50] sm:$0xff] %v3348_v2  ;;  %v3349_v25 = vadd.f32 %v5603_v38, %v2545_v15  ;;  %v2549_v26 = vadd.f32 %v2548_v24, %v2291_v47  ;;  %v2293_v40 = vpop.f32.mrf.mxu0 }
 0x25e   : > { %v2550_v31 = vpop.f32.mrf.mxu1 }
 0x25f   : > { %3541 = vst [vmem:[%s5136_s27 + $0x58] sm:$0xff] %v3349_v25  ;;  %v3354_v60 = vadd.f32 %v5598_v46, %v2549_v26  ;;  %v2551_v32 = vadd.f32 %v2550_v31, %v2293_v40  ;;  %v2297_v34 = vpop.f32.mrf.mxu0 }
 0x260   : > { %v2554_v41 = vpop.f32.mrf.mxu1 }
 0x261   : > { %3546 = vst [vmem:[%s5136_s27 + $0x80] sm:$0xff] %v3354_v60  ;;  %v3355_v42 = vadd.f32 %v5603_v38, %v2551_v32  ;;  %v2555_v49 = vadd.f32 %v2554_v41, %v2297_v34  ;;  %v2299_v56 = vpop.f32.mrf.mxu0 }
 0x262   : > { %v2556_v43 = vpop.f32.mrf.mxu1 }
 0x263   : > { %3547 = vst [vmem:[%s5136_s27 + $0x88] sm:$0xff] %v3355_v42  ;;  %v3360_v48 = vadd.f32 %v5598_v46, %v2555_v49  ;;  %v2557_v3 = vadd.f32 %v2556_v43, %v2299_v56  ;;  %v2303_v10 = vpop.f32.mrf.mxu0 }
 0x264   : > { %v2560_v57 = vpop.f32.mrf.mxu1 }
 0x265   : > { %3552 = vst [vmem:[%s5136_s27 + $0xb0] sm:$0xff] %v3360_v48  ;;  %v3361_v0 = vadd.f32 %v5603_v38, %v2557_v3  ;;  %v2561_v1 = vadd.f32 %v2560_v57, %v2303_v10  ;;  %v2305_v20 = vpop.f32.mrf.mxu0 }
 0x266   : > { %v2562_v23 = vpop.f32.mrf.mxu1 }
 0x267   : > { %3553 = vst [vmem:[%s5136_s27 + $0xb8] sm:$0xff] %v3361_v0  ;;  %v3366_v36 = vadd.f32 %v5598_v46, %v2561_v1  ;;  %v2563_v12 = vadd.f32 %v2562_v23, %v2305_v20  ;;  %v2309_v13 = vpop.f32.mrf.mxu0 }
 0x268   : > { %v2566_v21 = vpop.f32.mrf.mxu1 }
 0x269   : > { %3558 = vst [vmem:[%s5136_s27 + $0xe0] sm:$0xff] %v3366_v36  ;;  %v3367_v22 = vadd.f32 %v5603_v38, %v2563_v12  ;;  %v2567_v37 = vadd.f32 %v2566_v21, %v2309_v13  ;;  %v2311_v45 = vpop.f32.mrf.mxu0 }
 0x26a   : > { %v2568_v52 = vpop.f32.mrf.mxu1 }
 0x26b   : > { %3559 = vst [vmem:[%s5136_s27 + $0xe8] sm:$0xff] %v3367_v22  ;;  %v3372_v44 = vadd.f32 %v5598_v46, %v2567_v37  ;;  %v2569_v27 = vadd.f32 %v2568_v52, %v2311_v45  ;;  %v2315_v53 = vpop.f32.mrf.mxu0 }
 0x26c   : > { %v2572_v35 = vpop.f32.mrf.mxu1 }
 0x26d   : > { %3564 = vst [vmem:[%s5136_s27 + $0x110] sm:$0xff] %v3372_v44  ;;  %v3373_v17 = vadd.f32 %v5603_v38, %v2569_v27  ;;  %v2573_v55 = vadd.f32 %v2572_v35, %v2315_v53  ;;  %v2317_v62 = vpop.f32.mrf.mxu0 }
 0x26e   : > { %v2574_v7 = vpop.f32.mrf.mxu1 }
 0x26f   : > { %3565 = vst [vmem:[%s5136_s27 + $0x118] sm:$0xff] %v3373_v17  ;;  %v3378_v50 = vadd.f32 %v5598_v46, %v2573_v55  ;;  %v2575_v63 = vadd.f32 %v2574_v7, %v2317_v62  ;;  %v2321_v51 = vpop.f32.mrf.mxu0 }
 0x270   : > { %v2578_v14 = vpop.f32.mrf.mxu1 }
 0x271   : > { %3570 = vst [vmem:[%s5136_s27 + $0x140] sm:$0xff] %v3378_v50  ;;  %v3379_v28 = vadd.f32 %v5603_v38, %v2575_v63  ;;  %v2579_v58 = vadd.f32 %v2578_v14, %v2321_v51  ;;  %v2323_v59 = vpop.f32.mrf.mxu0 }
 0x272   : > { %v2580_v29 = vpop.f32.mrf.mxu1 }
 0x273   : > { %3571 = vst [vmem:[%s5136_s27 + $0x148] sm:$0xff] %v3379_v28  ;;  %v3384_v33 = vadd.f32 %v5598_v46, %v2579_v58  ;;  %v2581_v30 = vadd.f32 %v2580_v29, %v2323_v59  ;;  %v2327_v8 = vpop.f32.mrf.mxu0 }
 0x274   : > { %v2584_v9 = vpop.f32.mrf.mxu1 }
 0x275   : > { %3576 = vst [vmem:[%s5136_s27 + $0x170] sm:$0xff] %v3384_v33  ;;  %v3385_v6 = vadd.f32 %v5603_v38, %v2581_v30  ;;  %v2585_v39 = vadd.f32 %v2584_v9, %v2327_v8  ;;  %v2329_v11 = vpop.f32.mrf.mxu0 }
 0x276   : > { %v2586_v61 = vpop.f32.mrf.mxu1 }
 0x277   : > { %3577 = vst [vmem:[%s5136_s27 + $0x178] sm:$0xff] %v3385_v6  ;;  %v3390_v16 = vadd.f32 %v5598_v46, %v2585_v39  ;;  %v2587_v18 = vadd.f32 %v2586_v61, %v2329_v11  ;;  %v2333_v19 = vpop.f32.mrf.mxu0 }
 0x278   : > { %v2590_v4 = vpop.f32.mrf.mxu1 }
 0x279   : > { %3582 = vst [vmem:[%s5136_s27 + $0x1a0] sm:$0xff] %v3390_v16  ;;  %v3391_v5 = vadd.f32 %v5603_v38, %v2587_v18  ;;  %v2591_v54 = vadd.f32 %v2590_v4, %v2333_v19  ;;  %v2335_v2 = vpop.f32.mrf.mxu0 }
 0x27a   : > { %v2592_v15 = vpop.f32.mrf.mxu1 }
 0x27b   : > { %3583 = vst [vmem:[%s5136_s27 + $0x1a8] sm:$0xff] %v3391_v5  ;;  %v3396_v47 = vadd.f32 %v5598_v46, %v2591_v54  ;;  %v2593_v24 = vadd.f32 %v2592_v15, %v2335_v2  ;;  %v2339_v25 = vpop.f32.mrf.mxu0 }
 0x27c   : > { %v2596_v26 = vpop.f32.mrf.mxu1 }
 0x27d   : > { %3588 = vst [vmem:[%s5136_s27 + $0x1d0] sm:$0xff] %v3396_v47  ;;  %v3397_v40 = vadd.f32 %v5603_v38, %v2593_v24  ;;  %v2597_v31 = vadd.f32 %v2596_v26, %v2339_v25  ;;  %v2341_v60 = vpop.f32.mrf.mxu0 }
 0x27e   : > { %v2598_v32 = vpop.f32.mrf.mxu1 }
 0x27f   : > { %3589 = vst [vmem:[%s5136_s27 + $0x1d8] sm:$0xff] %v3397_v40  ;;  %v3402_v34 = vadd.f32 %v5598_v46, %v2597_v31  ;;  %v2599_v41 = vadd.f32 %v2598_v32, %v2341_v60  ;;  %v2345_v42 = vpop.f32.mrf.mxu0 }
 0x280   : > { %v2602_v49 = vpop.f32.mrf.mxu1 }
 0x281   : > { %3594 = vst [vmem:[%s5136_s27 + $0x200] sm:$0xff] %v3402_v34  ;;  %v3403_v56 = vadd.f32 %v5603_v38, %v2599_v41  ;;  %v2603_v43 = vadd.f32 %v2602_v49, %v2345_v42  ;;  %v2347_v48 = vpop.f32.mrf.mxu0 }
 0x282   : > { %v2604_v3 = vpop.f32.mrf.mxu1 }
 0x283   : > { %3595 = vst [vmem:[%s5136_s27 + $0x208] sm:$0xff] %v3403_v56  ;;  %v3408_v10 = vadd.f32 %v5598_v46, %v2603_v43  ;;  %v2605_v57 = vadd.f32 %v2604_v3, %v2347_v48  ;;  %v2351_v0 = vpop.f32.mrf.mxu0 }
 0x284   : > { %v2608_v1 = vpop.f32.mrf.mxu1 }
 0x285   : > { %3600 = vst [vmem:[%s5136_s27 + $0x230] sm:$0xff] %v3408_v10  ;;  %v3409_v20 = vadd.f32 %v5603_v38, %v2605_v57  ;;  %v2609_v23 = vadd.f32 %v2608_v1, %v2351_v0  ;;  %v2353_v36 = vpop.f32.mrf.mxu0 }
 0x286   : > { %v2610_v12 = vpop.f32.mrf.mxu1 }
 0x287   : > { %3601 = vst [vmem:[%s5136_s27 + $0x238] sm:$0xff] %v3409_v20  ;;  %v3414_v13 = vadd.f32 %v5598_v46, %v2609_v23  ;;  %v2611_v21 = vadd.f32 %v2610_v12, %v2353_v36  ;;  %v2357_v22 = vpop.f32.mrf.mxu0 }
 0x288   : > { %v2614_v37 = vpop.f32.mrf.mxu1 }
 0x289   : > { %3606 = vst [vmem:[%s5136_s27 + $0x260] sm:$0xff] %v3414_v13  ;;  %v3415_v45 = vadd.f32 %v5603_v38, %v2611_v21  ;;  %v2615_v52 = vadd.f32 %v2614_v37, %v2357_v22  ;;  %v2359_v44 = vpop.f32.mrf.mxu0 }
 0x28a   : > { %v2616_v27 = vpop.f32.mrf.mxu1 }
 0x28b   : > { %3607 = vst [vmem:[%s5136_s27 + $0x268] sm:$0xff] %v3415_v45  ;;  %v3420_v53 = vadd.f32 %v5598_v46, %v2615_v52  ;;  %v2617_v35 = vadd.f32 %v2616_v27, %v2359_v44  ;;  %v2363_v17 = vpop.f32.mrf.mxu0 }
 0x28c   : > { %v2620_v55 = vpop.f32.mrf.mxu1 }
 0x28d   : > { %3612 = vst [vmem:[%s5136_s27 + $0x290] sm:$0xff] %v3420_v53  ;;  %v3421_v62 = vadd.f32 %v5603_v38, %v2617_v35  ;;  %v2621_v7 = vadd.f32 %v2620_v55, %v2363_v17  ;;  %v2365_v50 = vpop.f32.mrf.mxu0 }
 0x28e   : > { %v2622_v63 = vpop.f32.mrf.mxu1 }
 0x28f   : > { %3613 = vst [vmem:[%s5136_s27 + $0x298] sm:$0xff] %v3421_v62  ;;  %v3426_v51 = vadd.f32 %v5598_v46, %v2621_v7  ;;  %v2623_v14 = vadd.f32 %v2622_v63, %v2365_v50  ;;  %v2369_v28 = vpop.f32.mrf.mxu0 }
 0x290   : > { %v2626_v58 = vpop.f32.mrf.mxu1 }
 0x291   : > { %3618 = vst [vmem:[%s5136_s27 + $0x2c0] sm:$0xff] %v3426_v51  ;;  %v3427_v59 = vadd.f32 %v5603_v38, %v2623_v14  ;;  %v2627_v29 = vadd.f32 %v2626_v58, %v2369_v28  ;;  %v2371_v33 = vpop.f32.mrf.mxu0 }
 0x292   : > { %v2628_v30 = vpop.f32.mrf.mxu1 }
 0x293   : > { %3619 = vst [vmem:[%s5136_s27 + $0x2c8] sm:$0xff] %v3427_v59  ;;  %v3432_v8 = vadd.f32 %v5598_v46, %v2627_v29  ;;  %v2629_v9 = vadd.f32 %v2628_v30, %v2371_v33  ;;  %v2375_v6 = vpop.f32.mrf.mxu0 }
 0x294   : > { %v2632_v39 = vpop.f32.mrf.mxu1 }
 0x295   : > { %3624 = vst [vmem:[%s5136_s27 + $0x2f0] sm:$0xff] %v3432_v8  ;;  %v3433_v11 = vadd.f32 %v5603_v38, %v2629_v9  ;;  %v2633_v61 = vadd.f32 %v2632_v39, %v2375_v6  ;;  %v2377_v16 = vpop.f32.mrf.mxu0 }
 0x296   : > { %v2634_v18 = vpop.f32.mrf.mxu1 }
 0x297   : > { %3625 = vst [vmem:[%s5136_s27 + $0x2f8] sm:$0xff] %v3433_v11  ;;  %v3438_v19 = vadd.f32 %v5598_v46, %v2633_v61  ;;  %v2635_v4 = vadd.f32 %v2634_v18, %v2377_v16  ;;  %v2381_v5 = vpop.f32.mrf.mxu0 }
 0x298   : > { %v2638_v54 = vpop.f32.mrf.mxu1 }
 0x299   : > { %3630 = vst [vmem:[%s5136_s27 + $0x320] sm:$0xff] %v3438_v19  ;;  %v3439_v2 = vadd.f32 %v5603_v38, %v2635_v4  ;;  %v2639_v15 = vadd.f32 %v2638_v54, %v2381_v5  ;;  %v2383_v47 = vpop.f32.mrf.mxu0 }
 0x29a   : > { %v2640_v24 = vpop.f32.mrf.mxu1 }
 0x29b   : > { %3631 = vst [vmem:[%s5136_s27 + $0x328] sm:$0xff] %v3439_v2  ;;  %v3444_v25 = vadd.f32 %v5598_v46, %v2639_v15  ;;  %v2641_v26 = vadd.f32 %v2640_v24, %v2383_v47  ;;  %v2387_v40 = vpop.f32.mrf.mxu0 }
 0x29c   : > { %v2644_v31 = vpop.f32.mrf.mxu1 }
 0x29d   : > { %3636 = vst [vmem:[%s5136_s27 + $0x350] sm:$0xff] %v3444_v25  ;;  %v3445_v60 = vadd.f32 %v5603_v38, %v2641_v26  ;;  %v2645_v32 = vadd.f32 %v2644_v31, %v2387_v40  ;;  %v2389_v34 = vpop.f32.mrf.mxu0 }
 0x29e   : > { %v2646_v41 = vpop.f32.mrf.mxu1 }
 0x29f   : > { %3637 = vst [vmem:[%s5136_s27 + $0x358] sm:$0xff] %v3445_v60  ;;  %v3450_v42 = vadd.f32 %v5598_v46, %v2645_v32  ;;  %v2647_v49 = vadd.f32 %v2646_v41, %v2389_v34  ;;  %v2393_v56 = vpop.f32.mrf.mxu0 }
 0x2a0   : > { %v2650_v43 = vpop.f32.mrf.mxu1 }
 0x2a1   : > { %3642 = vst [vmem:[%s5136_s27 + $0x380] sm:$0xff] %v3450_v42  ;;  %v3451_v48 = vadd.f32 %v5603_v38, %v2647_v49  ;;  %v2651_v3 = vadd.f32 %v2650_v43, %v2393_v56  ;;  %v2395_v10 = vpop.f32.mrf.mxu0 }
 0x2a2   : > { %v2652_v57 = vpop.f32.mrf.mxu1 }
 0x2a3   : > { %3643 = vst [vmem:[%s5136_s27 + $0x388] sm:$0xff] %v3451_v48  ;;  %v3456_v0 = vadd.f32 %v5598_v46, %v2651_v3  ;;  %v2653_v1 = vadd.f32 %v2652_v57, %v2395_v10  ;;  %v2399_v20 = vpop.f32.mrf.mxu0 }
 0x2a4   : > { %v2656_v23 = vpop.f32.mrf.mxu1 }
 0x2a5   : > { %3648 = vst [vmem:[%s5136_s27 + $0x3b0] sm:$0xff] %v3456_v0  ;;  %v3457_v36 = vadd.f32 %v5603_v38, %v2653_v1  ;;  %v2657_v12 = vadd.f32 %v2656_v23, %v2399_v20  ;;  %v2401_v13 = vpop.f32.mrf.mxu0 }
 0x2a6   : > { %v2658_v21 = vpop.f32.mrf.mxu1 }
 0x2a7   : > { %3649 = vst [vmem:[%s5136_s27 + $0x3b8] sm:$0xff] %v3457_v36  ;;  %v3462_v22 = vadd.f32 %v5598_v46, %v2657_v12  ;;  %v2659_v37 = vadd.f32 %v2658_v21, %v2401_v13  ;;  %v2405_v45 = vpop.f32.mrf.mxu0 }
 0x2a8   : > { %v2662_v52 = vpop.f32.mrf.mxu1 }
 0x2a9   : > { %3654 = vst [vmem:[%s5136_s27 + $0x3e0] sm:$0xff] %v3462_v22  ;;  %v3463_v44 = vadd.f32 %v5603_v38, %v2659_v37  ;;  %v2663_v27 = vadd.f32 %v2662_v52, %v2405_v45  ;;  %v2407_v53 = vpop.f32.mrf.mxu0 }
 0x2aa   : > { %v2664_v35 = vpop.f32.mrf.mxu1 }
 0x2ab   : > { %3655 = vst [vmem:[%s5136_s27 + $0x3e8] sm:$0xff] %v3463_v44  ;;  %v3468_v17 = vadd.f32 %v5598_v46, %v2663_v27  ;;  %v2665_v55 = vadd.f32 %v2664_v35, %v2407_v53  ;;  %v2411_v62 = vpop.f32.mrf.mxu0 }
 0x2ac   : > { %v2668_v7 = vpop.f32.mrf.mxu1 }
 0x2ad   : > { %3660 = vst [vmem:[%s5136_s27 + $0x410] sm:$0xff] %v3468_v17  ;;  %v3469_v50 = vadd.f32 %v5603_v38, %v2665_v55  ;;  %v2669_v63 = vadd.f32 %v2668_v7, %v2411_v62  ;;  %v2413_v51 = vpop.f32.mrf.mxu0 }
 0x2ae   : > { %v2670_v14 = vpop.f32.mrf.mxu1 }
 0x2af   : > { %3661 = vst [vmem:[%s5136_s27 + $0x418] sm:$0xff] %v3469_v50  ;;  %v3474_v28 = vadd.f32 %v5598_v46, %v2669_v63  ;;  %v2671_v58 = vadd.f32 %v2670_v14, %v2413_v51  ;;  %v2417_v59 = vpop.f32.mrf.mxu0 }
 0x2b0   : > { %v2674_v29 = vpop.f32.mrf.mxu1 }
 0x2b1   : > { %3666 = vst [vmem:[%s5136_s27 + $0x440] sm:$0xff] %v3474_v28  ;;  %v3475_v33 = vadd.f32 %v5603_v38, %v2671_v58  ;;  %v2675_v30 = vadd.f32 %v2674_v29, %v2417_v59  ;;  %v2419_v8 = vpop.f32.mrf.mxu0 }
 0x2b2   : > { %v2676_v9 = vpop.f32.mrf.mxu1 }
 0x2b3   : > { %3667 = vst [vmem:[%s5136_s27 + $0x448] sm:$0xff] %v3475_v33  ;;  %v3480_v6 = vadd.f32 %v5598_v46, %v2675_v30  ;;  %v2677_v39 = vadd.f32 %v2676_v9, %v2419_v8  ;;  %v2423_v11 = vpop.f32.mrf.mxu0 }
 0x2b4   : > { %v2680_v61 = vpop.f32.mrf.mxu1 }
 0x2b5   : > { %3672 = vst [vmem:[%s5136_s27 + $0x470] sm:$0xff] %v3480_v6  ;;  %v3481_v16 = vadd.f32 %v5603_v38, %v2677_v39  ;;  %v2681_v18 = vadd.f32 %v2680_v61, %v2423_v11  ;;  %v2425_v19 = vpop.f32.mrf.mxu0 }
 0x2b6   : > { %v2682_v4 = vpop.f32.mrf.mxu1 }
 0x2b7   : > { %3673 = vst [vmem:[%s5136_s27 + $0x478] sm:$0xff] %v3481_v16  ;;  %v3486_v5 = vadd.f32 %v5598_v46, %v2681_v18  ;;  %v2683_v54 = vadd.f32 %v2682_v4, %v2425_v19  ;;  %v2429_v2 = vpop.f32.mrf.mxu0 }
 0x2b8   : > { %v2686_v15 = vpop.f32.mrf.mxu1 }
 0x2b9   : > { %3678 = vst [vmem:[%s5136_s27 + $0x4a0] sm:$0xff] %v3486_v5  ;;  %v3487_v47 = vadd.f32 %v5603_v38, %v2683_v54  ;;  %v2687_v24 = vadd.f32 %v2686_v15, %v2429_v2  ;;  %v2431_v25 = vpop.f32.mrf.mxu0 }
 0x2ba   : > { %v2688_v26 = vpop.f32.mrf.mxu1 }
 0x2bb   : > { %3679 = vst [vmem:[%s5136_s27 + $0x4a8] sm:$0xff] %v3487_v47  ;;  %v3492_v40 = vadd.f32 %v5598_v46, %v2687_v24  ;;  %v2689_v31 = vadd.f32 %v2688_v26, %v2431_v25  ;;  %v2435_v60 = vpop.f32.mrf.mxu0 }
 0x2bc   : > { %v2692_v32 = vpop.f32.mrf.mxu1 }
 0x2bd   : > { %3684 = vst [vmem:[%s5136_s27 + $0x4d0] sm:$0xff] %v3492_v40  ;;  %v3493_v34 = vadd.f32 %v5603_v38, %v2689_v31  ;;  %v2693_v41 = vadd.f32 %v2692_v32, %v2435_v60  ;;  %v2437_v42 = vpop.f32.mrf.mxu0 }
 0x2be   : > { %v2694_v49 = vpop.f32.mrf.mxu1 }
 0x2bf   : > { %3685 = vst [vmem:[%s5136_s27 + $0x4d8] sm:$0xff] %v3493_v34  ;;  %v3498_v56 = vadd.f32 %v5598_v46, %v2693_v41  ;;  %v2695_v43 = vadd.f32 %v2694_v49, %v2437_v42  ;;  %v2441_v48 = vpop.f32.mrf.mxu0 }
 0x2c0   : > { %v2698_v3 = vpop.f32.mrf.mxu1 }
 0x2c1   : > { %3690 = vst [vmem:[%s5136_s27 + $0x500] sm:$0xff] %v3498_v56  ;;  %v3499_v10 = vadd.f32 %v5603_v38, %v2695_v43  ;;  %v2699_v57 = vadd.f32 %v2698_v3, %v2441_v48  ;;  %v2443_v0 = vpop.f32.mrf.mxu0 }
 0x2c2   : > { %v2700_v1 = vpop.f32.mrf.mxu1 }
 0x2c3   : > { %3691 = vst [vmem:[%s5136_s27 + $0x508] sm:$0xff] %v3499_v10  ;;  %v3504_v20 = vadd.f32 %v5598_v46, %v2699_v57  ;;  %v2701_v23 = vadd.f32 %v2700_v1, %v2443_v0  ;;  %v2447_v36 = vpop.f32.mrf.mxu0 }
 0x2c4   : > { %v2704_v12 = vpop.f32.mrf.mxu1 }
 0x2c5   : > { %3696 = vst [vmem:[%s5136_s27 + $0x530] sm:$0xff] %v3504_v20  ;;  %v3505_v13 = vadd.f32 %v5603_v38, %v2701_v23  ;;  %v2705_v21 = vadd.f32 %v2704_v12, %v2447_v36  ;;  %v2449_v22 = vpop.f32.mrf.mxu0 }
 0x2c6   : > { %v2706_v37 = vpop.f32.mrf.mxu1 }
 0x2c7   : > { %3697 = vst [vmem:[%s5136_s27 + $0x538] sm:$0xff] %v3505_v13  ;;  %v3510_v45 = vadd.f32 %v5598_v46, %v2705_v21  ;;  %v2707_v52 = vadd.f32 %v2706_v37, %v2449_v22  ;;  %v2453_v44 = vpop.f32.mrf.mxu0 }
 0x2c8   : > { %v2710_v27 = vpop.f32.mrf.mxu1 }
 0x2c9   : > { %3702 = vst [vmem:[%s5136_s27 + $0x560] sm:$0xff] %v3510_v45  ;;  %v3511_v53 = vadd.f32 %v5603_v38, %v2707_v52  ;;  %v2711_v35 = vadd.f32 %v2710_v27, %v2453_v44  ;;  %v2455_v17 = vpop.f32.mrf.mxu0 }
 0x2ca   : > { %v2712_v55 = vpop.f32.mrf.mxu1 }
 0x2cb   : > { %3703 = vst [vmem:[%s5136_s27 + $0x568] sm:$0xff] %v3511_v53  ;;  %v3516_v62 = vadd.f32 %v5598_v46, %v2711_v35  ;;  %v2713_v7 = vadd.f32 %v2712_v55, %v2455_v17  ;;  %v2459_v50 = vpop.f32.mrf.mxu0 }
 0x2cc   : > { %v2716_v63 = vpop.f32.mrf.mxu1 }
 0x2cd   : > { %3708 = vst [vmem:[%s5136_s27 + $0x590] sm:$0xff] %v3516_v62  ;;  %v3517_v51 = vadd.f32 %v5603_v38, %v2713_v7  ;;  %v2717_v14 = vadd.f32 %v2716_v63, %v2459_v50  ;;  %v2461_v28 = vpop.f32.mrf.mxu0 }
 0x2ce   : > { %v2718_v58 = vpop.f32.mrf.mxu1 }
 0x2cf   : > { %3709 = vst [vmem:[%s5136_s27 + $0x598] sm:$0xff] %v3517_v51  ;;  %v3522_v59 = vadd.f32 %v5598_v46, %v2717_v14  ;;  %v2719_v29 = vadd.f32 %v2718_v58, %v2461_v28  ;;  %v2465_v33 = vpop.f32.mrf.mxu0 }
 0x2d0   : > { %v2722_v30 = vpop.f32.mrf.mxu1 }
 0x2d1   : > { %3714 = vst [vmem:[%s5136_s27 + $0x5c0] sm:$0xff] %v3522_v59  ;;  %v3523_v8 = vadd.f32 %v5603_v38, %v2719_v29  ;;  %v2723_v9 = vadd.f32 %v2722_v30, %v2465_v33  ;;  %v2467_v6 = vpop.f32.mrf.mxu0 }
 0x2d2   : > { %v2724_v39 = vpop.f32.mrf.mxu1 }
 0x2d3   : > { %3715 = vst [vmem:[%s5136_s27 + $0x5c8] sm:$0xff] %v3523_v8  ;;  %v3528_v11 = vadd.f32 %v5598_v46, %v2723_v9  ;;  %v2725_v61 = vadd.f32 %v2724_v39, %v2467_v6 }
 0x2d5   : > { %3720 = vst [vmem:[%s5136_s27 + $0x5f0] sm:$0xff] %v3528_v11  ;;  %v3529_v16 = vadd.f32 %v5603_v38, %v2725_v61 }
 0x2d7   : > { %3721 = vst [vmem:[%s5136_s27 + $0x5f8] sm:$0xff] %v3529_v16 }
 0x2d8   : > { %4206 = shalt.err (!%p4203_p6)
}
 0x2d9   : > { %s4207_s29 = scalar_lea.hbm %s5736_s15, 24576  ;;  %s4211_s5 = scalar_lea.hbm %s5792_s3, 49152 }
 0x2da   : > { %p4208_p8 = scmp.ne.s32.totalorder %s5736_s15, %s4207_s29  ;;  %p4212_p11 = scmp.lt.s32.totalorder %s5736_s15, %s5792_s3 }
 0x2db   : > { %p4213_p12 = scmp.lt.s32.totalorder %s4211_s5, %s4207_s29 }
 0x2dc   : > { %p4209_p5 = pnand %p4208_p8, %p5925_p10 }
 0x2dd   : > { %p4214_p13 = por %p4213_p12, %p4212_p11 }
 0x2de   : > { %p4210_p9 = pneg %p4209_p5 }
 0x2e0   : > { %p4215_p7 = pnand %p4214_p13, %p4210_p9 }
 0x2e2   : > { %4218 = shalt.err (!%p4215_p7)
}
 0x2e3   : > { %s4288_s27 = smov 768   ;;  %s4289_s10 = smov 1536  }
 0x2e4   : > { %s4290_s6 = smov 48  }
 0x2e5   : > { %3894 = dma.vmem_to_hbm [thread:$0]  (%p5925_p10), %s5738_s19, 24576, %s5736_s15, %s3723_s8, %s4288_s27, %s4289_s10, %s4290_s6  }
 0x2e6 PF: > { %s3754_s4 = sand.u32 1, %s4257_s12   ;;  %p5926_p2 = scmp.ne.s32.totalorder %s5839_s26, 0 }
 0x2e7   : > { %p5927_p1 = scmp.ge.s32.totalorder %s4277_s17, 2  ;;  %s3755_s9 = scalar_lea.sflag [#allocation5], %s3754_s4 }
 0x2e9   : > { %p3908_p0 = pnand %p5927_p1, %p5926_p2 }
 0x2eb   : > { %p3909_p3 = pneg %p3908_p0 }
 0x2ed   : > { %4252 = dma.done.wait (%p3909_p3), %s3755_s9, 24576  }
 0x2ee   : > { %4254 = vsyncadd (%p3909_p3), %s3755_s9, 4294942720  ;;  %s20_s17 = sadd.s32 1, %s4277_s17   ;;  %s5928_s12 = smov %s4261_s13 }
 0x2ef   : > { %p17_p4 = scmp.ge.s32.totalorder %s20_s17, 4   ;;  %s5929_s13 = smov %s4265_s14 }
 0x2f0   : > { %s5930_s14 = smov %s4359_s24  ;;  %s5931_s15 = smov %s4273_s16 }
 0x2f1   : > { %s5932_s16 = smov %s5934_s18  ;;  %19 = sbr.rel (!%p17_p4) target bundleno = 7 (0x7), region = 102 }
 0x2f6   :  { %3760 = vsyncpa [#allocation4], 1 }
 0x2f7   :  { %3762 = vsyncpa [#allocation4 + $0x1], 1 }
 0x2f8   :  { %3763 = vsyncpa [#allocation7], 1 }
 0x2f9   :  { %3765 = vsyncpa [#allocation7 + $0x1], 1 }
 0x2fa   :  { %3766 = vsyncpa [#allocation5], 1 }
 0x2fb   :  { %3768 = vsyncpa [#allocation5 + $0x1], 1 }

</bundles_post_ra>
